<compile_context>
chip_gen: v7x
topology: tpu7x:2x2x1
jax: 0.10.0
libtpu: 0.0.40
codegen_flags: <defaults>
</compile_context>

<pallas_src>
import functools

import jax
import jax.numpy as jnp
from jax import lax
from jax.experimental import pallas as pl
from jax.experimental.pallas import tpu as pltpu


def _round_up(x, m):
    return (x + m - 1) // m * m


def _pick_div_tile(dim, tmax):
    """Largest multiple of 128 <= tmax that divides round_up(dim, 128).

    Guarantees the grid covers the 128-aligned dim exactly (no extra padding
    beyond lane alignment); e.g. K=768 -> 768 (one step), N=3072 -> 768.
    """
    p = _round_up(dim, 128)
    if p <= tmax:
        return p
    t = (tmax // 128) * 128
    while t > 128 and p % t != 0:
        t -= 128
    return t


# ------------------------- tiled linear (matmul) kernels -------------------------

def _gelu_exact(y):
    # exact (erf) GELU, matching torch.nn.GELU default
    return 0.5 * y * (1.0 + lax.erf(y * 0.7071067811865476))


def _matmul_kernel_1k(x_ref, w_ref, b_ref, o_ref, *, gelu):
    # whole K reduction fits in a single tile: no accumulator scratch round trip
    y = jnp.dot(x_ref[...], w_ref[...], preferred_element_type=jnp.float32) + b_ref[...]
    if gelu:
        y = _gelu_exact(y)
    o_ref[...] = y.astype(o_ref.dtype)


def _matmul_kernel(x_ref, w_ref, b_ref, o_ref, acc_ref, *, gelu):
    @pl.when(pl.program_id(2) == 0)
    def _():
        acc_ref[...] = jnp.zeros_like(acc_ref)

    acc_ref[...] += jnp.dot(x_ref[...], w_ref[...],
                            preferred_element_type=jnp.float32)

    @pl.when(pl.program_id(2) == pl.num_programs(2) - 1)
    def _():
        y = acc_ref[...] + b_ref[...]
        if gelu:
            y = _gelu_exact(y)
        o_ref[...] = y.astype(o_ref.dtype)


def linear(x2d, w, b, gelu=False, out_dtype=jnp.bfloat16,
           tm_max=512, tn_max=768, tk_max=768):
    """(M,K) @ (K,N) + b (+ optional exact GELU). bf16 MXU inputs, f32 accumulate."""
    M, K = x2d.shape
    N = w.shape[1]
    xb = x2d.astype(jnp.bfloat16)
    wb = w.astype(jnp.bfloat16)
    bb = b.astype(jnp.float32)

    tn = _pick_div_tile(N, tn_max)
    tk = _pick_div_tile(K, tk_max)
    tm = min(tm_max, _round_up(M, 8))
    # keep M padding modest (<~12.5%) for awkward row counts
    while tm > 64 and (_round_up(M, tm) - M) * 8 > M:
        tm = _round_up(tm // 2, 8)

    Mp, Np, Kp = _round_up(M, tm), _round_up(N, tn), _round_up(K, tk)
    if (Mp, Kp) != (M, K):
        xb = jnp.pad(xb, ((0, Mp - M), (0, Kp - K)))
    if (Kp, Np) != (K, N):
        wb = jnp.pad(wb, ((0, Kp - K), (0, Np - N)))
    if Np != N:
        bb = jnp.pad(bb, (0, Np - N))
    bb = bb.reshape(1, Np)

    n_k = Kp // tk
    if n_k == 1:
        kernel = functools.partial(_matmul_kernel_1k, gelu=gelu)
        scratch = []
    else:
        kernel = functools.partial(_matmul_kernel, gelu=gelu)
        scratch = [pltpu.VMEM((tm, tn), jnp.float32)]

    out = pl.pallas_call(
        kernel,
        out_shape=jax.ShapeDtypeStruct((Mp, Np), out_dtype),
        grid_spec=pltpu.PrefetchScalarGridSpec(
            num_scalar_prefetch=0,
            grid=(Mp // tm, Np // tn, n_k),
            in_specs=[
                pl.BlockSpec((tm, tk), lambda i, j, k: (i, k)),
                pl.BlockSpec((tk, tn), lambda i, j, k: (k, j)),
                pl.BlockSpec((1, tn), lambda i, j, k: (0, j)),
            ],
            out_specs=pl.BlockSpec((tm, tn), lambda i, j, k: (i, j)),
            scratch_shapes=scratch,
        ),
        compiler_params=pltpu.CompilerParams(
            dimension_semantics=("parallel", "parallel", "arbitrary"),
            vmem_limit_bytes=48 * 1024 * 1024,   # fits v7x's 64 MiB physical VMEM
        ),
    )(xb, wb, bb)
    if (Mp, Np) != (M, N):
        out = out[:M, :N]
    return out


# ------------------------------ LayerNorm kernel --------------------------------

def _layernorm_kernel(x_ref, g_ref, b_ref, o_ref, *, eps):
    x = x_ref[...].astype(jnp.float32)
    mu = jnp.mean(x, axis=-1, keepdims=True)
    var = jnp.mean(jnp.square(x - mu), axis=-1, keepdims=True)
    y = (x - mu) * lax.rsqrt(var + eps)
    o_ref[...] = (y * g_ref[...] + b_ref[...]).astype(o_ref.dtype)


def layernorm(x, g, b, eps=1e-6, out_dtype=jnp.bfloat16, tm_max=512):
    shp = x.shape
    D = shp[-1]
    x2 = x.reshape(-1, D)
    M = x2.shape[0]
    tm = min(tm_max, _round_up(M, 8))
    Mp = _round_up(M, tm)
    if Mp != M:
        x2 = jnp.pad(x2, ((0, Mp - M), (0, 0)))
    out = pl.pallas_call(
        functools.partial(_layernorm_kernel, eps=eps),
        out_shape=jax.ShapeDtypeStruct((Mp, D), out_dtype),
        grid=(Mp // tm,),
        in_specs=[
            pl.BlockSpec((tm, D), lambda i: (i, 0)),
            pl.BlockSpec((1, D), lambda i: (0, 0)),
            pl.BlockSpec((1, D), lambda i: (0, 0)),
        ],
        out_specs=pl.BlockSpec((tm, D), lambda i: (i, 0)),
        compiler_params=pltpu.CompilerParams(dimension_semantics=("parallel",)),
    )(x2, g.reshape(1, D), b.reshape(1, D))
    if Mp != M:
        out = out[:M]
    return out.reshape(shp)


# ------------------------------ attention kernel ---------------------------------

def _attn_kernel(q_ref, k_ref, v_ref, o_ref, *, num_heads, scale):
    C = q_ref.shape[-1]
    Dh = C // num_heads
    # group heads so each ref load / store spans >=128 lanes (lane-dense, bounded
    # live intermediates: only one head-group in flight at a time)
    hpg = 1
    if Dh < 128:
        hpg = max(1, 128 // Dh)
        while num_heads % hpg != 0:
            hpg -= 1
    cw = hpg * Dh
    for g in range(num_heads // hpg):          # static unroll over head groups
        c0 = g * cw
        qg = q_ref[:, :, c0:c0 + cw]           # (G, N, cw) bf16, lane-aligned chunk
        kg = k_ref[:, :, c0:c0 + cw]
        vg = v_ref[:, :, c0:c0 + cw]
        outs = []
        for hh in range(hpg):                  # static unroll over heads in group
            s0 = hh * Dh
            q = qg[:, :, s0:s0 + Dh]
            k = kg[:, :, s0:s0 + Dh]
            v = vg[:, :, s0:s0 + Dh]
            s = lax.dot_general(q, k, (((2,), (2,)), ((0,), (0,))),
                                preferred_element_type=jnp.float32)   # (G, N, N)
            s = s * scale                       # f32 elementwise (v5e-friendly)
            s = s - jnp.max(s, axis=-1, keepdims=True)
            p = jnp.exp(s)
            p = p * pl.reciprocal(jnp.sum(p, axis=-1, keepdims=True), approx=True)
            o = lax.dot_general(p.astype(v.dtype), v, (((2,), (1,)), ((0,), (0,))),
                                preferred_element_type=jnp.float32)   # (G, N, Dh)
            outs.append(o.astype(o_ref.dtype))
        og = outs[0] if hpg == 1 else jnp.concatenate(outs, axis=-1)
        o_ref[:, :, c0:c0 + cw] = og            # lane-dense per-group store


def attention_core(qkv3d, num_heads, scale, *, target_rows=2048):
    """qkv3d: (Bq, N, 3C) fused qkv.  Returns (Bq, N, C) attention output (bf16)."""
    Bq, N, C3 = qkv3d.shape
    C = C3 // 3
    # batch as many sequences as possible per grid step (amortize step overhead,
    # critical for the tiny temporal-attention N=T case) while keeping >= 2 grid
    # steps so both v7x TensorCores get work.
    limit = max(1, min(Bq, target_rows // max(N, 1)))
    if Bq >= 2:
        limit = min(limit, max(1, Bq // 2))
    G = 1
    for d in range(limit, 0, -1):
        if Bq % d == 0:
            G = d
            break

    kernel = functools.partial(_attn_kernel, num_heads=num_heads, scale=scale)
    if C % 128 == 0:
        # slice q / k / v straight out of the fused qkv tensor via block index maps
        # (no JAX-level 5-D transpose, no extra HBM round trip)
        inputs = (qkv3d, qkv3d, qkv3d)
        in_specs = [
            pl.BlockSpec((G, N, C), lambda i: (i, 0, 0)),
            pl.BlockSpec((G, N, C), lambda i: (i, 0, 1)),
            pl.BlockSpec((G, N, C), lambda i: (i, 0, 2)),
        ]
    else:
        # fallback for lane-misaligned embed dims (tiny test configs only)
        q, k, v = jnp.split(qkv3d, 3, axis=-1)
        inputs = (q, k, v)
        in_specs = [pl.BlockSpec((G, N, C), lambda i: (i, 0, 0))] * 3

    return pl.pallas_call(
        kernel,
        out_shape=jax.ShapeDtypeStruct((Bq, N, C), jnp.bfloat16),
        grid=(Bq // G,),
        in_specs=in_specs,
        out_specs=pl.BlockSpec((G, N, C), lambda i: (i, 0, 0)),
        compiler_params=pltpu.CompilerParams(
            dimension_semantics=("parallel",),
            vmem_limit_bytes=48 * 1024 * 1024,
        ),
    )(*inputs)


# ------------------------------- model pieces ------------------------------------

def attention_module(x, p, num_heads):
    """Attention(with_qkv=True): x (B, N, C) -> (B, N, C) bf16."""
    B, N, C = x.shape
    Dh = C // num_heads
    scale = Dh ** (-0.5)
    qkv = linear(x.reshape(B * N, C), p['qkv_w'], p['qkv_b'])           # (B*N, 3C) bf16
    o = attention_core(qkv.reshape(B, N, 3 * C), num_heads, scale)      # (B, N, C) bf16
    return linear(o.reshape(B * N, C), p['proj_w'], p['proj_b']).reshape(B, N, C)


def mlp_module(x, p):
    shp = x.shape
    D = shp[-1]
    h = linear(x.reshape(-1, D), p['fc1_w'], p['fc1_b'], gelu=True)
    o = linear(h, p['fc2_w'], p['fc2_b'])
    return o.reshape(shp)


def block_forward(x, p, B, T, W, num_heads):
    """divided_space_time Block: x (B, 1 + H*W*T, D) bf16."""
    D = x.shape[2]
    num_spatial = (x.shape[1] - 1) // T
    Hh = num_spatial // W
    HW = Hh * W

    # ---- temporal attention: 'b (h w t) m -> (b h w) t m'
    xt_in = x[:, 1:, :]                                        # (B, HW*T, D) bf16
    xt = xt_in.reshape(B * HW, T, D)
    res_t = attention_module(
        layernorm(xt, p['temporal_norm1_g'], p['temporal_norm1_b']),
        p['temporal_attn'], num_heads)
    res_t = res_t.reshape(B, HW * T, D)
    # TODO(synk): temporal_fc could be fused into the temporal proj epilogue.
    res_t = linear(res_t.reshape(-1, D), p['temporal_fc_w'],
                   p['temporal_fc_b']).reshape(B, HW * T, D)
    xt = xt_in + res_t                                         # bf16 residual

    # ---- spatial attention: 'b (h w t) m -> (b t) (h w) m' with per-frame cls token
    # TODO(synk): these per-block transposes could be folded into the LayerNorm/qkv
    # BlockSpec index_map (scalar-prefetched row offsets) to save an HBM round trip.
    init_cls = x[:, 0:1, :]                                    # (B, 1, D)
    cls_rep = jnp.repeat(init_cls, T, axis=1).reshape(B * T, 1, D)
    xs = xt.reshape(B, HW, T, D).transpose(0, 2, 1, 3).reshape(B * T, HW, D)
    xs = jnp.concatenate([cls_rep, xs], axis=1)                # (B*T, 1+HW, D)
    res_s = attention_module(
        layernorm(xs, p['norm1_g'], p['norm1_b']),
        p['attn'], num_heads)
    cls_t = jnp.mean(res_s[:, 0, :].astype(jnp.float32).reshape(B, T, D),
                     axis=1, keepdims=True).astype(x.dtype)    # (B,1,D)
    res_s = res_s[:, 1:, :].reshape(B, T, HW, D).transpose(0, 2, 1, 3).reshape(B, HW * T, D)

    x = jnp.concatenate([init_cls, xt], axis=1) + jnp.concatenate([cls_t, res_s], axis=1)

    # ---- MLP
    x = x + mlp_module(layernorm(x, p['norm2_g'], p['norm2_b']), p)
    return x


def timesformer_forward(x, params, *, patch_size, num_heads):
    B, T, C, H, W = x.shape
    # (B,T,C,H,W) --fold--> (B*T, C, H, W)  NCHW ; patchify in bf16 (half the bytes)
    x = x.reshape(B * T, C, H, W).astype(jnp.bfloat16)
    p = patch_size
    Hp, Wp = H // p, W // p
    Np = Hp * Wp
    D = params['patch_b'].shape[0]

    # PatchEmbed: conv(k=stride=p) == patchify + linear projection (Pallas matmul)
    # TODO(synk): the patchify transpose could be folded into the projection
    # matmul's index_map to save one image HBM round trip.
    patches = x.reshape(B * T, C, Hp, p, Wp, p).transpose(0, 2, 4, 1, 3, 5)
    patches = patches.reshape(B * T * Np, C * p * p)
    emb = linear(patches, params['patch_w'], params['patch_b'])        # bf16
    x = emb.reshape(B * T, Np, D)
    W_out = Wp

    # cls token + pos embed (bf16 residual stream)
    cls = jnp.broadcast_to(params['cls_token'].astype(jnp.bfloat16), (B * T, 1, D))
    x = jnp.concatenate([cls, x], axis=1) + params['pos_embed'].astype(jnp.bfloat16)

    # time embed:  '(b t) n m -> (b n) t m'  (+time_embed)  -> 'b (n t) m'
    cls_tokens = x[:B, 0, :][:, None, :]                               # (B,1,D)
    x = x[:, 1:, :]
    x = x.reshape(B, T, Np, D).transpose(0, 2, 1, 3).reshape(B * Np, T, D)
    x = x + params['time_embed'].astype(jnp.bfloat16)
    x = x.reshape(B, Np * T, D)
    x = jnp.concatenate([cls_tokens, x], axis=1)                       # (B, 1 + Np*T, D)

    for blk in params['blocks']:
        x = block_forward(x, blk, B, T, W_out, num_heads)

    x = layernorm(x, params['norm_g'], params['norm_b'], out_dtype=jnp.float32)
    return x[:, 0]                                                     # (B, D) f32


# --------------------------- parameter construction ------------------------------

def init_params(key, *, embed_dim, depth, mlp_ratio, in_chans, patch_size,
                num_patches, num_frames):
    D = embed_dim
    hidden = int(D * mlp_ratio)
    keys = iter(jax.random.split(key, 16 + 16 * depth))

    # matmul weights are stored in bf16 (cast once here, fed to the MXU as-is)
    def nrm(shape, dtype=jnp.bfloat16):
        return (jax.random.normal(next(keys), shape, jnp.float32) * 0.02).astype(dtype)

    params = {
        'patch_w': nrm((in_chans * patch_size * patch_size, D)),
        'patch_b': jnp.zeros((D,), jnp.float32),
        'cls_token': nrm((1, 1, D), jnp.float32),
        'pos_embed': nrm((1, num_patches + 1, D), jnp.float32),
        'time_embed': nrm((1, num_frames, D), jnp.float32),
        'norm_g': jnp.ones((D,), jnp.float32),
        'norm_b': jnp.zeros((D,), jnp.float32),
        'blocks': [],
    }
    for i in range(depth):
        blk = {
            'norm1_g': jnp.ones((D,), jnp.float32), 'norm1_b': jnp.zeros((D,), jnp.float32),
            'temporal_norm1_g': jnp.ones((D,), jnp.float32),
            'temporal_norm1_b': jnp.zeros((D,), jnp.float32),
            'norm2_g': jnp.ones((D,), jnp.float32), 'norm2_b': jnp.zeros((D,), jnp.float32),
            'attn': {'qkv_w': nrm((D, 3 * D)), 'qkv_b': jnp.zeros((3 * D,), jnp.float32),
                     'proj_w': nrm((D, D)), 'proj_b': jnp.zeros((D,), jnp.float32)},
            'temporal_attn': {'qkv_w': nrm((D, 3 * D)), 'qkv_b': jnp.zeros((3 * D,), jnp.float32),
                              'proj_w': nrm((D, D)), 'proj_b': jnp.zeros((D,), jnp.float32)},
            # matches module init: temporal_fc zeroed for all blocks except block 0
            'temporal_fc_w': nrm((D, D)) if i == 0 else jnp.zeros((D, D), jnp.bfloat16),
            'temporal_fc_b': jnp.zeros((D,), jnp.float32),
            'fc1_w': nrm((D, hidden)), 'fc1_b': jnp.zeros((hidden,), jnp.float32),
            'fc2_w': nrm((hidden, D)), 'fc2_b': jnp.zeros((D,), jnp.float32),
        }
        params['blocks'].append(blk)
    return params


# ------------------------------------ main ---------------------------------------

if __name__ == "__main__":
    # small but structurally faithful config (scaled-down TimeSformer vit_base_patch16_224)
    B, T, C, IMG = 2, 2, 3, 32
    PATCH = 16
    EMBED = 128        # multiple of 128 -> lane-aligned qkv column slicing (as in real C=768)
    DEPTH = 2
    HEADS = 4
    MLP_RATIO = 4.0
    NUM_PATCHES = (IMG // PATCH) * (IMG // PATCH)

    key = jax.random.PRNGKey(0)
    xkey, pkey = jax.random.split(key)
    x = jax.random.normal(xkey, (B, T, C, IMG, IMG), jnp.float32)

    params = init_params(pkey, embed_dim=EMBED, depth=DEPTH, mlp_ratio=MLP_RATIO,
                         in_chans=C, patch_size=PATCH, num_patches=NUM_PATCHES,
                         num_frames=T)

    fwd = jax.jit(functools.partial(timesformer_forward,
                                    patch_size=PATCH, num_heads=HEADS))
    out = jax.block_until_ready(fwd(x, params))
    assert out.shape == (B, EMBED), out.shape
    print("KERNEL_OK")
</pallas_src>

<mosaic_0001>
module attributes {stable_mosaic.version = 11 : i64} {
  func.func @_matmul_kernel_1k(%arg0: i32, %arg1: i32, %arg2: i32, %arg3: memref<16x768xbf16, #tpu.memory_space<vmem>>, %arg4: memref<768x128xbf16, #tpu.memory_space<vmem>>, %arg5: memref<1x128xf32, #tpu.memory_space<vmem>>, %arg6: memref<16x128xbf16, #tpu.memory_space<vmem>>) attributes {dimension_semantics = [#tpu.dimension_semantics<parallel>, #tpu.dimension_semantics<parallel>, #tpu.dimension_semantics<arbitrary>], iteration_bounds = array<i64: 1, 1, 1>, scalar_prefetch = 0 : i64, scratch_operands = 0 : i64, tpu.core_type = #tpu.core_type<tc>, window_params = [{transform_indices = @transform_0, window_bounds = array<i64: 16, 768>}, {transform_indices = @transform_1, window_bounds = array<i64: 768, 128>}, {transform_indices = @transform_2, window_bounds = array<i64: 1, 128>}, {transform_indices = @transform_3, window_bounds = array<i64: 16, 128>}]} {
    %c0 = arith.constant 0 : index
    %c0_0 = arith.constant 0 : index
    %0 = vector.load %arg3[%c0, %c0_0] : memref<16x768xbf16, #tpu.memory_space<vmem>>, vector<16x768xbf16>
    %c0_1 = arith.constant 0 : index
    %c0_2 = arith.constant 0 : index
    %1 = vector.load %arg4[%c0_1, %c0_2] : memref<768x128xbf16, #tpu.memory_space<vmem>>, vector<768x128xbf16>
    %cst = arith.constant dense<0.000000e+00> : vector<16x128xf32>
    %2 = tpu.matmul %0, %1, %cst {dimension_numbers = #tpu.dot_dimension_numbers<[1], [0], [0], [1], [0, 0, 1, 1], [], []>} : vector<16x768xbf16>, vector<768x128xbf16>, vector<16x128xf32> -> vector<16x128xf32>
    %c0_3 = arith.constant 0 : index
    %c0_4 = arith.constant 0 : index
    %3 = vector.load %arg5[%c0_3, %c0_4] : memref<1x128xf32, #tpu.memory_space<vmem>>, vector<1x128xf32>
    %4 = vector.broadcast %3 : vector<1x128xf32> to vector<16x128xf32>
    %5 = arith.addf %2, %4 : vector<16x128xf32>
    %6 = arith.truncf %5 : vector<16x128xf32> to vector<16x128xbf16>
    %c0_5 = arith.constant 0 : index
    %c0_6 = arith.constant 0 : index
    %7 = vector.load %arg6[%c0_5, %c0_6] : memref<16x128xbf16, #tpu.memory_space<vmem>>, vector<16x128xbf16>
    tpu.vector_store %arg6[%c0_5, %c0_6], %6 {strides = array<i32>} : memref<16x128xbf16, #tpu.memory_space<vmem>>, vector<16x128xbf16>,
    return
  }
  func.func @transform_0(%arg0: i32, %arg1: i32, %arg2: i32) -> (i32, i32) {
    %c0_i32 = arith.constant 0 : i32
    return %arg0, %arg2 : i32, i32
  }
  func.func @transform_1(%arg0: i32, %arg1: i32, %arg2: i32) -> (i32, i32) {
    %c0_i32 = arith.constant 0 : i32
    return %arg2, %arg1 : i32, i32
  }
  func.func @transform_2(%arg0: i32, %arg1: i32, %arg2: i32) -> (i32, i32) {
    %c0_i32 = arith.constant 0 : i32
    %c0_i32_0 = arith.constant 0 : i32
    return %c0_i32, %arg1 : i32, i32
  }
  func.func @transform_3(%arg0: i32, %arg1: i32, %arg2: i32) -> (i32, i32) {
    %c0_i32 = arith.constant 0 : i32
    return %arg0, %arg1 : i32, i32
  }
}

module attributes {stable_mosaic.version = 11 : i64} {
  func.func @_layernorm_kernel(%arg0: i32, %arg1: memref<16x128xbf16, #tpu.memory_space<vmem>>, %arg2: memref<1x128xf32, #tpu.memory_space<vmem>>, %arg3: memref<1x128xf32, #tpu.memory_space<vmem>>, %arg4: memref<16x128xbf16, #tpu.memory_space<vmem>>) attributes {dimension_semantics = [#tpu.dimension_semantics<parallel>], iteration_bounds = array<i64: 1>, scalar_prefetch = 0 : i64, scratch_operands = 0 : i64, tpu.core_type = #tpu.core_type<tc>, window_params = [{transform_indices = @transform_0, window_bounds = array<i64: 16, 128>}, {pipeline_mode = #tpu.pipeline_mode<synchronous>, transform_indices = @transform_1, window_bounds = array<i64: 1, 128>}, {pipeline_mode = #tpu.pipeline_mode<synchronous>, transform_indices = @transform_2, window_bounds = array<i64: 1, 128>}, {transform_indices = @transform_3, window_bounds = array<i64: 16, 128>}]} {
    %c0 = arith.constant 0 : index
    %c0_0 = arith.constant 0 : index
    %0 = vector.load %arg1[%c0, %c0_0] : memref<16x128xbf16, #tpu.memory_space<vmem>>, vector<16x128xbf16>
    %1 = arith.extf %0 : vector<16x128xbf16> to vector<16x128xf32>
    %cst = arith.constant dense<0.000000e+00> : vector<16xf32>
    %2 = vector.multi_reduction <add>, %1, %cst [1] : vector<16x128xf32> to vector<16xf32>
    %3 = vector.shape_cast %2 : vector<16xf32> to vector<16x1xf32>
    %cst_1 = arith.constant 1.280000e+02 : f32
    %4 = vector.broadcast %cst_1 : f32 to vector<16x1xf32>
    %5 = arith.divf %3, %4 : vector<16x1xf32>
    %6 = vector.broadcast %5 : vector<16x1xf32> to vector<16x128xf32>
    %7 = arith.subf %1, %6 : vector<16x128xf32>
    %8 = arith.mulf %7, %7 : vector<16x128xf32>
    %cst_2 = arith.constant dense<0.000000e+00> : vector<16xf32>
    %9 = vector.multi_reduction <add>, %8, %cst_2 [1] : vector<16x128xf32> to vector<16xf32>
    %10 = vector.shape_cast %9 : vector<16xf32> to vector<16x1xf32>
    %cst_3 = arith.constant 1.280000e+02 : f32
    %11 = vector.broadcast %cst_3 : f32 to vector<16x1xf32>
    %12 = arith.divf %10, %11 : vector<16x1xf32>
    %13 = vector.broadcast %5 : vector<16x1xf32> to vector<16x128xf32>
    %14 = arith.subf %1, %13 : vector<16x128xf32>
    %cst_4 = arith.constant 9.99999997E-7 : f32
    %15 = vector.broadcast %cst_4 : f32 to vector<16x1xf32>
    %16 = arith.addf %12, %15 : vector<16x1xf32>
    %17 = math.rsqrt %16 : vector<16x1xf32>
    %18 = vector.broadcast %17 : vector<16x1xf32> to vector<16x128xf32>
    %19 = arith.mulf %14, %18 : vector<16x128xf32>
    %c0_5 = arith.constant 0 : index
    %c0_6 = arith.constant 0 : index
    %20 = vector.load %arg2[%c0_5, %c0_6] : memref<1x128xf32, #tpu.memory_space<vmem>>, vector<1x128xf32>
    %21 = vector.broadcast %20 : vector<1x128xf32> to vector<16x128xf32>
    %22 = arith.mulf %19, %21 : vector<16x128xf32>
    %c0_7 = arith.constant 0 : index
    %c0_8 = arith.constant 0 : index
    %23 = vector.load %arg3[%c0_7, %c0_8] : memref<1x128xf32, #tpu.memory_space<vmem>>, vector<1x128xf32>
    %24 = vector.broadcast %23 : vector<1x128xf32> to vector<16x128xf32>
    %25 = arith.addf %22, %24 : vector<16x128xf32>
    %26 = arith.truncf %25 : vector<16x128xf32> to vector<16x128xbf16>
    %c0_9 = arith.constant 0 : index
    %c0_10 = arith.constant 0 : index
    %27 = vector.load %arg4[%c0_9, %c0_10] : memref<16x128xbf16, #tpu.memory_space<vmem>>, vector<16x128xbf16>
    tpu.vector_store %arg4[%c0_9, %c0_10], %26 {strides = array<i32>} : memref<16x128xbf16, #tpu.memory_space<vmem>>, vector<16x128xbf16>,
    return
  }
  func.func @transform_0(%arg0: i32) -> (i32, i32) {
    %c0_i32 = arith.constant 0 : i32
    %c0_i32_0 = arith.constant 0 : i32
    return %arg0, %c0_i32 : i32, i32
  }
  func.func @transform_1(%arg0: i32) -> (i32, i32) {
    %c0_i32 = arith.constant 0 : i32
    %c0_i32_0 = arith.constant 0 : i32
    %c0_i32_1 = arith.constant 0 : i32
    return %c0_i32, %c0_i32_0 : i32, i32
  }
  func.func @transform_2(%arg0: i32) -> (i32, i32) {
    %c0_i32 = arith.constant 0 : i32
    %c0_i32_0 = arith.constant 0 : i32
    %c0_i32_1 = arith.constant 0 : i32
    return %c0_i32, %c0_i32_0 : i32, i32
  }
  func.func @transform_3(%arg0: i32) -> (i32, i32) {
    %c0_i32 = arith.constant 0 : i32
    %c0_i32_0 = arith.constant 0 : i32
    return %arg0, %c0_i32 : i32, i32
  }
}

module attributes {stable_mosaic.version = 11 : i64} {
  func.func @_matmul_kernel_1k(%arg0: i32, %arg1: i32, %arg2: i32, %arg3: memref<16x128xbf16, #tpu.memory_space<vmem>>, %arg4: memref<128x384xbf16, #tpu.memory_space<vmem>>, %arg5: memref<1x384xf32, #tpu.memory_space<vmem>>, %arg6: memref<16x384xbf16, #tpu.memory_space<vmem>>) attributes {dimension_semantics = [#tpu.dimension_semantics<parallel>, #tpu.dimension_semantics<parallel>, #tpu.dimension_semantics<arbitrary>], iteration_bounds = array<i64: 1, 1, 1>, scalar_prefetch = 0 : i64, scratch_operands = 0 : i64, tpu.core_type = #tpu.core_type<tc>, window_params = [{transform_indices = @transform_0, window_bounds = array<i64: 16, 128>}, {transform_indices = @transform_1, window_bounds = array<i64: 128, 384>}, {transform_indices = @transform_2, window_bounds = array<i64: 1, 384>}, {transform_indices = @transform_3, window_bounds = array<i64: 16, 384>}]} {
    %c0 = arith.constant 0 : index
    %c0_0 = arith.constant 0 : index
    %0 = vector.load %arg3[%c0, %c0_0] : memref<16x128xbf16, #tpu.memory_space<vmem>>, vector<16x128xbf16>
    %c0_1 = arith.constant 0 : index
    %c0_2 = arith.constant 0 : index
    %1 = vector.load %arg4[%c0_1, %c0_2] : memref<128x384xbf16, #tpu.memory_space<vmem>>, vector<128x384xbf16>
    %cst = arith.constant dense<0.000000e+00> : vector<16x384xf32>
    %2 = tpu.matmul %0, %1, %cst {dimension_numbers = #tpu.dot_dimension_numbers<[1], [0], [0], [1], [0, 0, 1, 1], [], []>} : vector<16x128xbf16>, vector<128x384xbf16>, vector<16x384xf32> -> vector<16x384xf32>
    %c0_3 = arith.constant 0 : index
    %c0_4 = arith.constant 0 : index
    %3 = vector.load %arg5[%c0_3, %c0_4] : memref<1x384xf32, #tpu.memory_space<vmem>>, vector<1x384xf32>
    %4 = vector.broadcast %3 : vector<1x384xf32> to vector<16x384xf32>
    %5 = arith.addf %2, %4 : vector<16x384xf32>
    %6 = arith.truncf %5 : vector<16x384xf32> to vector<16x384xbf16>
    %c0_5 = arith.constant 0 : index
    %c0_6 = arith.constant 0 : index
    %7 = vector.load %arg6[%c0_5, %c0_6] : memref<16x384xbf16, #tpu.memory_space<vmem>>, vector<16x384xbf16>
    tpu.vector_store %arg6[%c0_5, %c0_6], %6 {strides = array<i32>} : memref<16x384xbf16, #tpu.memory_space<vmem>>, vector<16x384xbf16>,
    return
  }
  func.func @transform_0(%arg0: i32, %arg1: i32, %arg2: i32) -> (i32, i32) {
    %c0_i32 = arith.constant 0 : i32
    return %arg0, %arg2 : i32, i32
  }
  func.func @transform_1(%arg0: i32, %arg1: i32, %arg2: i32) -> (i32, i32) {
    %c0_i32 = arith.constant 0 : i32
    return %arg2, %arg1 : i32, i32
  }
  func.func @transform_2(%arg0: i32, %arg1: i32, %arg2: i32) -> (i32, i32) {
    %c0_i32 = arith.constant 0 : i32
    %c0_i32_0 = arith.constant 0 : i32
    return %c0_i32, %arg1 : i32, i32
  }
  func.func @transform_3(%arg0: i32, %arg1: i32, %arg2: i32) -> (i32, i32) {
    %c0_i32 = arith.constant 0 : i32
    return %arg0, %arg1 : i32, i32
  }
}

module attributes {stable_mosaic.version = 11 : i64} {
  func.func @_attn_kernel(%arg0: i32, %arg1: memref<4x2x128xbf16, #tpu.memory_space<vmem>>, %arg2: memref<4x2x128xbf16, #tpu.memory_space<vmem>>, %arg3: memref<4x2x128xbf16, #tpu.memory_space<vmem>>, %arg4: memref<4x2x128xbf16, #tpu.memory_space<vmem>>) attributes {dimension_semantics = [#tpu.dimension_semantics<parallel>], iteration_bounds = array<i64: 2>, scalar_prefetch = 0 : i64, scratch_operands = 0 : i64, tpu.core_type = #tpu.core_type<tc>, window_params = [{transform_indices = @transform_0, window_bounds = array<i64: 4, 2, 128>}, {transform_indices = @transform_1, window_bounds = array<i64: 4, 2, 128>}, {transform_indices = @transform_2, window_bounds = array<i64: 4, 2, 128>}, {transform_indices = @transform_3, window_bounds = array<i64: 4, 2, 128>}]} {
    %c0 = arith.constant 0 : index
    %c0_0 = arith.constant 0 : index
    %c0_1 = arith.constant 0 : index
    %0 = vector.load %arg1[%c0, %c0_0, %c0_1] : memref<4x2x128xbf16, #tpu.memory_space<vmem>>, vector<4x2x128xbf16>
    %c0_2 = arith.constant 0 : index
    %c0_3 = arith.constant 0 : index
    %c0_4 = arith.constant 0 : index
    %1 = vector.load %arg2[%c0_2, %c0_3, %c0_4] : memref<4x2x128xbf16, #tpu.memory_space<vmem>>, vector<4x2x128xbf16>
    %c0_5 = arith.constant 0 : index
    %c0_6 = arith.constant 0 : index
    %c0_7 = arith.constant 0 : index
    %2 = vector.load %arg3[%c0_5, %c0_6, %c0_7] : memref<4x2x128xbf16, #tpu.memory_space<vmem>>, vector<4x2x128xbf16>
    %3 = vector.extract_strided_slice %0 {offsets = [0, 0, 0], sizes = [4, 2, 32], strides = [1, 1, 1]} : vector<4x2x128xbf16> to vector<4x2x32xbf16>
    %4 = vector.extract_strided_slice %1 {offsets = [0, 0, 0], sizes = [4, 2, 32], strides = [1, 1, 1]} : vector<4x2x128xbf16> to vector<4x2x32xbf16>
    %5 = vector.extract_strided_slice %2 {offsets = [0, 0, 0], sizes = [4, 2, 32], strides = [1, 1, 1]} : vector<4x2x128xbf16> to vector<4x2x32xbf16>
    %cst = arith.constant dense<0.000000e+00> : vector<4x2x2xf32>
    %6 = tpu.matmul %3, %4, %cst {dimension_numbers = #tpu.dot_dimension_numbers<[2], [2], [1], [1], [0, 0, 0, 1, 1, 1], [0], [0]>} : vector<4x2x32xbf16>, vector<4x2x32xbf16>, vector<4x2x2xf32> -> vector<4x2x2xf32>
    %cst_8 = arith.constant 0.176776692 : f32
    %7 = vector.broadcast %cst_8 : f32 to vector<4x2x2xf32>
    %8 = arith.mulf %6, %7 : vector<4x2x2xf32>
    %cst_9 = arith.constant dense<0xFF800000> : vector<4x2xf32>
    %9 = vector.multi_reduction <maximumf>, %8, %cst_9 [2] : vector<4x2x2xf32> to vector<4x2xf32>
    %10 = vector.shape_cast %9 : vector<4x2xf32> to vector<4x2x1xf32>
    %11 = vector.broadcast %10 : vector<4x2x1xf32> to vector<4x2x2xf32>
    %12 = arith.subf %8, %11 : vector<4x2x2xf32>
    %13 = math.exp %12 : vector<4x2x2xf32>
    %cst_10 = arith.constant dense<0.000000e+00> : vector<4x2xf32>
    %14 = vector.multi_reduction <add>, %13, %cst_10 [2] : vector<4x2x2xf32> to vector<4x2xf32>
    %15 = vector.shape_cast %14 : vector<4x2xf32> to vector<4x2x1xf32>
    %16 = tpu.reciprocal %15 {approx = true} : vector<4x2x1xf32> -> vector<4x2x1xf32>
    %17 = vector.broadcast %16 : vector<4x2x1xf32> to vector<4x2x2xf32>
    %18 = arith.mulf %13, %17 : vector<4x2x2xf32>
    %19 = arith.truncf %18 : vector<4x2x2xf32> to vector<4x2x2xbf16>
    %cst_11 = arith.constant dense<0.000000e+00> : vector<4x2x32xf32>
    %20 = tpu.matmul %19, %5, %cst_11 {dimension_numbers = #tpu.dot_dimension_numbers<[2], [1], [1], [2], [0, 0, 0, 1, 1, 2], [0], [0]>} : vector<4x2x2xbf16>, vector<4x2x32xbf16>, vector<4x2x32xf32> -> vector<4x2x32xf32>
    %21 = arith.truncf %20 : vector<4x2x32xf32> to vector<4x2x32xbf16>
    %22 = vector.extract_strided_slice %0 {offsets = [0, 0, 32], sizes = [4, 2, 32], strides = [1, 1, 1]} : vector<4x2x128xbf16> to vector<4x2x32xbf16>
    %23 = vector.extract_strided_slice %1 {offsets = [0, 0, 32], sizes = [4, 2, 32], strides = [1, 1, 1]} : vector<4x2x128xbf16> to vector<4x2x32xbf16>
    %24 = vector.extract_strided_slice %2 {offsets = [0, 0, 32], sizes = [4, 2, 32], strides = [1, 1, 1]} : vector<4x2x128xbf16> to vector<4x2x32xbf16>
    %cst_12 = arith.constant dense<0.000000e+00> : vector<4x2x2xf32>
    %25 = tpu.matmul %22, %23, %cst_12 {dimension_numbers = #tpu.dot_dimension_numbers<[2], [2], [1], [1], [0, 0, 0, 1, 1, 1], [0], [0]>} : vector<4x2x32xbf16>, vector<4x2x32xbf16>, vector<4x2x2xf32> -> vector<4x2x2xf32>
    %cst_13 = arith.constant 0.176776692 : f32
    %26 = vector.broadcast %cst_13 : f32 to vector<4x2x2xf32>
    %27 = arith.mulf %25, %26 : vector<4x2x2xf32>
    %cst_14 = arith.constant dense<0xFF800000> : vector<4x2xf32>
    %28 = vector.multi_reduction <maximumf>, %27, %cst_14 [2] : vector<4x2x2xf32> to vector<4x2xf32>
    %29 = vector.shape_cast %28 : vector<4x2xf32> to vector<4x2x1xf32>
    %30 = vector.broadcast %29 : vector<4x2x1xf32> to vector<4x2x2xf32>
    %31 = arith.subf %27, %30 : vector<4x2x2xf32>
    %32 = math.exp %31 : vector<4x2x2xf32>
    %cst_15 = arith.constant dense<0.000000e+00> : vector<4x2xf32>
    %33 = vector.multi_reduction <add>, %32, %cst_15 [2] : vector<4x2x2xf32> to vector<4x2xf32>
    %34 = vector.shape_cast %33 : vector<4x2xf32> to vector<4x2x1xf32>
    %35 = tpu.reciprocal %34 {approx = true} : vector<4x2x1xf32> -> vector<4x2x1xf32>
    %36 = vector.broadcast %35 : vector<4x2x1xf32> to vector<4x2x2xf32>
    %37 = arith.mulf %32, %36 : vector<4x2x2xf32>
    %38 = arith.truncf %37 : vector<4x2x2xf32> to vector<4x2x2xbf16>
    %cst_16 = arith.constant dense<0.000000e+00> : vector<4x2x32xf32>
    %39 = tpu.matmul %38, %24, %cst_16 {dimension_numbers = #tpu.dot_dimension_numbers<[2], [1], [1], [2], [0, 0, 0, 1, 1, 2], [0], [0]>} : vector<4x2x2xbf16>, vector<4x2x32xbf16>, vector<4x2x32xf32> -> vector<4x2x32xf32>
    %40 = arith.truncf %39 : vector<4x2x32xf32> to vector<4x2x32xbf16>
    %41 = vector.extract_strided_slice %0 {offsets = [0, 0, 64], sizes = [4, 2, 32], strides = [1, 1, 1]} : vector<4x2x128xbf16> to vector<4x2x32xbf16>
    %42 = vector.extract_strided_slice %1 {offsets = [0, 0, 64], sizes = [4, 2, 32], strides = [1, 1, 1]} : vector<4x2x128xbf16> to vector<4x2x32xbf16>
    %43 = vector.extract_strided_slice %2 {offsets = [0, 0, 64], sizes = [4, 2, 32], strides = [1, 1, 1]} : vector<4x2x128xbf16> to vector<4x2x32xbf16>
    %cst_17 = arith.constant dense<0.000000e+00> : vector<4x2x2xf32>
    %44 = tpu.matmul %41, %42, %cst_17 {dimension_numbers = #tpu.dot_dimension_numbers<[2], [2], [1], [1], [0, 0, 0, 1, 1, 1], [0], [0]>} : vector<4x2x32xbf16>, vector<4x2x32xbf16>, vector<4x2x2xf32> -> vector<4x2x2xf32>
    %cst_18 = arith.constant 0.176776692 : f32
    %45 = vector.broadcast %cst_18 : f32 to vector<4x2x2xf32>
    %46 = arith.mulf %44, %45 : vector<4x2x2xf32>
    %cst_19 = arith.constant dense<0xFF800000> : vector<4x2xf32>
    %47 = vector.multi_reduction <maximumf>, %46, %cst_19 [2] : vector<4x2x2xf32> to vector<4x2xf32>
    %48 = vector.shape_cast %47 : vector<4x2xf32> to vector<4x2x1xf32>
    %49 = vector.broadcast %48 : vector<4x2x1xf32> to vector<4x2x2xf32>
    %50 = arith.subf %46, %49 : vector<4x2x2xf32>
    %51 = math.exp %50 : vector<4x2x2xf32>
    %cst_20 = arith.constant dense<0.000000e+00> : vector<4x2xf32>
    %52 = vector.multi_reduction <add>, %51, %cst_20 [2] : vector<4x2x2xf32> to vector<4x2xf32>
    %53 = vector.shape_cast %52 : vector<4x2xf32> to vector<4x2x1xf32>
    %54 = tpu.reciprocal %53 {approx = true} : vector<4x2x1xf32> -> vector<4x2x1xf32>
    %55 = vector.broadcast %54 : vector<4x2x1xf32> to vector<4x2x2xf32>
    %56 = arith.mulf %51, %55 : vector<4x2x2xf32>
    %57 = arith.truncf %56 : vector<4x2x2xf32> to vector<4x2x2xbf16>
    %cst_21 = arith.constant dense<0.000000e+00> : vector<4x2x32xf32>
    %58 = tpu.matmul %57, %43, %cst_21 {dimension_numbers = #tpu.dot_dimension_numbers<[2], [1], [1], [2], [0, 0, 0, 1, 1, 2], [0], [0]>} : vector<4x2x2xbf16>, vector<4x2x32xbf16>, vector<4x2x32xf32> -> vector<4x2x32xf32>
    %59 = arith.truncf %58 : vector<4x2x32xf32> to vector<4x2x32xbf16>
    %60 = vector.extract_strided_slice %0 {offsets = [0, 0, 96], sizes = [4, 2, 32], strides = [1, 1, 1]} : vector<4x2x128xbf16> to vector<4x2x32xbf16>
    %61 = vector.extract_strided_slice %1 {offsets = [0, 0, 96], sizes = [4, 2, 32], strides = [1, 1, 1]} : vector<4x2x128xbf16> to vector<4x2x32xbf16>
    %62 = vector.extract_strided_slice %2 {offsets = [0, 0, 96], sizes = [4, 2, 32], strides = [1, 1, 1]} : vector<4x2x128xbf16> to vector<4x2x32xbf16>
    %cst_22 = arith.constant dense<0.000000e+00> : vector<4x2x2xf32>
    %63 = tpu.matmul %60, %61, %cst_22 {dimension_numbers = #tpu.dot_dimension_numbers<[2], [2], [1], [1], [0, 0, 0, 1, 1, 1], [0], [0]>} : vector<4x2x32xbf16>, vector<4x2x32xbf16>, vector<4x2x2xf32> -> vector<4x2x2xf32>
    %cst_23 = arith.constant 0.176776692 : f32
    %64 = vector.broadcast %cst_23 : f32 to vector<4x2x2xf32>
    %65 = arith.mulf %63, %64 : vector<4x2x2xf32>
    %cst_24 = arith.constant dense<0xFF800000> : vector<4x2xf32>
    %66 = vector.multi_reduction <maximumf>, %65, %cst_24 [2] : vector<4x2x2xf32> to vector<4x2xf32>
    %67 = vector.shape_cast %66 : vector<4x2xf32> to vector<4x2x1xf32>
    %68 = vector.broadcast %67 : vector<4x2x1xf32> to vector<4x2x2xf32>
    %69 = arith.subf %65, %68 : vector<4x2x2xf32>
    %70 = math.exp %69 : vector<4x2x2xf32>
    %cst_25 = arith.constant dense<0.000000e+00> : vector<4x2xf32>
    %71 = vector.multi_reduction <add>, %70, %cst_25 [2] : vector<4x2x2xf32> to vector<4x2xf32>
    %72 = vector.shape_cast %71 : vector<4x2xf32> to vector<4x2x1xf32>
    %73 = tpu.reciprocal %72 {approx = true} : vector<4x2x1xf32> -> vector<4x2x1xf32>
    %74 = vector.broadcast %73 : vector<4x2x1xf32> to vector<4x2x2xf32>
    %75 = arith.mulf %70, %74 : vector<4x2x2xf32>
    %76 = arith.truncf %75 : vector<4x2x2xf32> to vector<4x2x2xbf16>
    %cst_26 = arith.constant dense<0.000000e+00> : vector<4x2x32xf32>
    %77 = tpu.matmul %76, %62, %cst_26 {dimension_numbers = #tpu.dot_dimension_numbers<[2], [1], [1], [2], [0, 0, 0, 1, 1, 2], [0], [0]>} : vector<4x2x2xbf16>, vector<4x2x32xbf16>, vector<4x2x32xf32> -> vector<4x2x32xf32>
    %78 = arith.truncf %77 : vector<4x2x32xf32> to vector<4x2x32xbf16>
    %79 = tpu.concatenate %21, %40, %59, %78 in 2 : vector<4x2x32xbf16>, vector<4x2x32xbf16>, vector<4x2x32xbf16>, vector<4x2x32xbf16> -> vector<4x2x128xbf16>
    %c0_27 = arith.constant 0 : index
    %c0_28 = arith.constant 0 : index
    %c0_29 = arith.constant 0 : index
    %80 = vector.load %arg4[%c0_27, %c0_28, %c0_29] : memref<4x2x128xbf16, #tpu.memory_space<vmem>>, vector<4x2x128xbf16>
    tpu.vector_store %arg4[%c0_27, %c0_28, %c0_29], %79 {strides = array<i32>} : memref<4x2x128xbf16, #tpu.memory_space<vmem>>, vector<4x2x128xbf16>,
    return
  }
  func.func @transform_0(%arg0: i32) -> (i32, i32, i32) {
    %c0_i32 = arith.constant 0 : i32
    %c0_i32_0 = arith.constant 0 : i32
    %c0_i32_1 = arith.constant 0 : i32
    return %arg0, %c0_i32, %c0_i32_0 : i32, i32, i32
  }
  func.func @transform_1(%arg0: i32) -> (i32, i32, i32) {
    %c0_i32 = arith.constant 0 : i32
    %c1_i32 = arith.constant 1 : i32
    %c0_i32_0 = arith.constant 0 : i32
    return %arg0, %c0_i32, %c1_i32 : i32, i32, i32
  }
  func.func @transform_2(%arg0: i32) -> (i32, i32, i32) {
    %c0_i32 = arith.constant 0 : i32
    %c2_i32 = arith.constant 2 : i32
    %c0_i32_0 = arith.constant 0 : i32
    return %arg0, %c0_i32, %c2_i32 : i32, i32, i32
  }
  func.func @transform_3(%arg0: i32) -> (i32, i32, i32) {
    %c0_i32 = arith.constant 0 : i32
    %c0_i32_0 = arith.constant 0 : i32
    %c0_i32_1 = arith.constant 0 : i32
    return %arg0, %c0_i32, %c0_i32_0 : i32, i32, i32
  }
}

module attributes {stable_mosaic.version = 11 : i64} {
  func.func @_matmul_kernel_1k(%arg0: i32, %arg1: i32, %arg2: i32, %arg3: memref<16x128xbf16, #tpu.memory_space<vmem>>, %arg4: memref<128x128xbf16, #tpu.memory_space<vmem>>, %arg5: memref<1x128xf32, #tpu.memory_space<vmem>>, %arg6: memref<16x128xbf16, #tpu.memory_space<vmem>>) attributes {dimension_semantics = [#tpu.dimension_semantics<parallel>, #tpu.dimension_semantics<parallel>, #tpu.dimension_semantics<arbitrary>], iteration_bounds = array<i64: 1, 1, 1>, scalar_prefetch = 0 : i64, scratch_operands = 0 : i64, tpu.core_type = #tpu.core_type<tc>, window_params = [{transform_indices = @transform_0, window_bounds = array<i64: 16, 128>}, {transform_indices = @transform_1, window_bounds = array<i64: 128, 128>}, {transform_indices = @transform_2, window_bounds = array<i64: 1, 128>}, {transform_indices = @transform_3, window_bounds = array<i64: 16, 128>}]} {
    %c0 = arith.constant 0 : index
    %c0_0 = arith.constant 0 : index
    %0 = vector.load %arg3[%c0, %c0_0] : memref<16x128xbf16, #tpu.memory_space<vmem>>, vector<16x128xbf16>
    %c0_1 = arith.constant 0 : index
    %c0_2 = arith.constant 0 : index
    %1 = vector.load %arg4[%c0_1, %c0_2] : memref<128x128xbf16, #tpu.memory_space<vmem>>, vector<128x128xbf16>
    %cst = arith.constant dense<0.000000e+00> : vector<16x128xf32>
    %2 = tpu.matmul %0, %1, %cst {dimension_numbers = #tpu.dot_dimension_numbers<[1], [0], [0], [1], [0, 0, 1, 1], [], []>} : vector<16x128xbf16>, vector<128x128xbf16>, vector<16x128xf32> -> vector<16x128xf32>
    %c0_3 = arith.constant 0 : index
    %c0_4 = arith.constant 0 : index
    %3 = vector.load %arg5[%c0_3, %c0_4] : memref<1x128xf32, #tpu.memory_space<vmem>>, vector<1x128xf32>
    %4 = vector.broadcast %3 : vector<1x128xf32> to vector<16x128xf32>
    %5 = arith.addf %2, %4 : vector<16x128xf32>
    %6 = arith.truncf %5 : vector<16x128xf32> to vector<16x128xbf16>
    %c0_5 = arith.constant 0 : index
    %c0_6 = arith.constant 0 : index
    %7 = vector.load %arg6[%c0_5, %c0_6] : memref<16x128xbf16, #tpu.memory_space<vmem>>, vector<16x128xbf16>
    tpu.vector_store %arg6[%c0_5, %c0_6], %6 {strides = array<i32>} : memref<16x128xbf16, #tpu.memory_space<vmem>>, vector<16x128xbf16>,
    return
  }
  func.func @transform_0(%arg0: i32, %arg1: i32, %arg2: i32) -> (i32, i32) {
    %c0_i32 = arith.constant 0 : i32
    return %arg0, %arg2 : i32, i32
  }
  func.func @transform_1(%arg0: i32, %arg1: i32, %arg2: i32) -> (i32, i32) {
    %c0_i32 = arith.constant 0 : i32
    return %arg2, %arg1 : i32, i32
  }
  func.func @transform_2(%arg0: i32, %arg1: i32, %arg2: i32) -> (i32, i32) {
    %c0_i32 = arith.constant 0 : i32
    %c0_i32_0 = arith.constant 0 : i32
    return %c0_i32, %arg1 : i32, i32
  }
  func.func @transform_3(%arg0: i32, %arg1: i32, %arg2: i32) -> (i32, i32) {
    %c0_i32 = arith.constant 0 : i32
    return %arg0, %arg1 : i32, i32
  }
}

module attributes {stable_mosaic.version = 11 : i64} {
  func.func @_layernorm_kernel(%arg0: i32, %arg1: memref<24x128xbf16, #tpu.memory_space<vmem>>, %arg2: memref<1x128xf32, #tpu.memory_space<vmem>>, %arg3: memref<1x128xf32, #tpu.memory_space<vmem>>, %arg4: memref<24x128xbf16, #tpu.memory_space<vmem>>) attributes {dimension_semantics = [#tpu.dimension_semantics<parallel>], iteration_bounds = array<i64: 1>, scalar_prefetch = 0 : i64, scratch_operands = 0 : i64, tpu.core_type = #tpu.core_type<tc>, window_params = [{transform_indices = @transform_0, window_bounds = array<i64: 24, 128>}, {pipeline_mode = #tpu.pipeline_mode<synchronous>, transform_indices = @transform_1, window_bounds = array<i64: 1, 128>}, {pipeline_mode = #tpu.pipeline_mode<synchronous>, transform_indices = @transform_2, window_bounds = array<i64: 1, 128>}, {transform_indices = @transform_3, window_bounds = array<i64: 24, 128>}]} {
    %c0 = arith.constant 0 : index
    %c0_0 = arith.constant 0 : index
    %0 = vector.load %arg1[%c0, %c0_0] : memref<24x128xbf16, #tpu.memory_space<vmem>>, vector<24x128xbf16>
    %1 = arith.extf %0 : vector<24x128xbf16> to vector<24x128xf32>
    %cst = arith.constant dense<0.000000e+00> : vector<24xf32>
    %2 = vector.multi_reduction <add>, %1, %cst [1] : vector<24x128xf32> to vector<24xf32>
    %3 = vector.shape_cast %2 : vector<24xf32> to vector<24x1xf32>
    %cst_1 = arith.constant 1.280000e+02 : f32
    %4 = vector.broadcast %cst_1 : f32 to vector<24x1xf32>
    %5 = arith.divf %3, %4 : vector<24x1xf32>
    %6 = vector.broadcast %5 : vector<24x1xf32> to vector<24x128xf32>
    %7 = arith.subf %1, %6 : vector<24x128xf32>
    %8 = arith.mulf %7, %7 : vector<24x128xf32>
    %cst_2 = arith.constant dense<0.000000e+00> : vector<24xf32>
    %9 = vector.multi_reduction <add>, %8, %cst_2 [1] : vector<24x128xf32> to vector<24xf32>
    %10 = vector.shape_cast %9 : vector<24xf32> to vector<24x1xf32>
    %cst_3 = arith.constant 1.280000e+02 : f32
    %11 = vector.broadcast %cst_3 : f32 to vector<24x1xf32>
    %12 = arith.divf %10, %11 : vector<24x1xf32>
    %13 = vector.broadcast %5 : vector<24x1xf32> to vector<24x128xf32>
    %14 = arith.subf %1, %13 : vector<24x128xf32>
    %cst_4 = arith.constant 9.99999997E-7 : f32
    %15 = vector.broadcast %cst_4 : f32 to vector<24x1xf32>
    %16 = arith.addf %12, %15 : vector<24x1xf32>
    %17 = math.rsqrt %16 : vector<24x1xf32>
    %18 = vector.broadcast %17 : vector<24x1xf32> to vector<24x128xf32>
    %19 = arith.mulf %14, %18 : vector<24x128xf32>
    %c0_5 = arith.constant 0 : index
    %c0_6 = arith.constant 0 : index
    %20 = vector.load %arg2[%c0_5, %c0_6] : memref<1x128xf32, #tpu.memory_space<vmem>>, vector<1x128xf32>
    %21 = vector.broadcast %20 : vector<1x128xf32> to vector<24x128xf32>
    %22 = arith.mulf %19, %21 : vector<24x128xf32>
    %c0_7 = arith.constant 0 : index
    %c0_8 = arith.constant 0 : index
    %23 = vector.load %arg3[%c0_7, %c0_8] : memref<1x128xf32, #tpu.memory_space<vmem>>, vector<1x128xf32>
    %24 = vector.broadcast %23 : vector<1x128xf32> to vector<24x128xf32>
    %25 = arith.addf %22, %24 : vector<24x128xf32>
    %26 = arith.truncf %25 : vector<24x128xf32> to vector<24x128xbf16>
    %c0_9 = arith.constant 0 : index
    %c0_10 = arith.constant 0 : index
    %27 = vector.load %arg4[%c0_9, %c0_10] : memref<24x128xbf16, #tpu.memory_space<vmem>>, vector<24x128xbf16>
    tpu.vector_store %arg4[%c0_9, %c0_10], %26 {strides = array<i32>} : memref<24x128xbf16, #tpu.memory_space<vmem>>, vector<24x128xbf16>,
    return
  }
  func.func @transform_0(%arg0: i32) -> (i32, i32) {
    %c0_i32 = arith.constant 0 : i32
    %c0_i32_0 = arith.constant 0 : i32
    return %arg0, %c0_i32 : i32, i32
  }
  func.func @transform_1(%arg0: i32) -> (i32, i32) {
    %c0_i32 = arith.constant 0 : i32
    %c0_i32_0 = arith.constant 0 : i32
    %c0_i32_1 = arith.constant 0 : i32
    return %c0_i32, %c0_i32_0 : i32, i32
  }
  func.func @transform_2(%arg0: i32) -> (i32, i32) {
    %c0_i32 = arith.constant 0 : i32
    %c0_i32_0 = arith.constant 0 : i32
    %c0_i32_1 = arith.constant 0 : i32
    return %c0_i32, %c0_i32_0 : i32, i32
  }
  func.func @transform_3(%arg0: i32) -> (i32, i32) {
    %c0_i32 = arith.constant 0 : i32
    %c0_i32_0 = arith.constant 0 : i32
    return %arg0, %c0_i32 : i32, i32
  }
}

module attributes {stable_mosaic.version = 11 : i64} {
  func.func @_matmul_kernel_1k(%arg0: i32, %arg1: i32, %arg2: i32, %arg3: memref<24x128xbf16, #tpu.memory_space<vmem>>, %arg4: memref<128x384xbf16, #tpu.memory_space<vmem>>, %arg5: memref<1x384xf32, #tpu.memory_space<vmem>>, %arg6: memref<24x384xbf16, #tpu.memory_space<vmem>>) attributes {dimension_semantics = [#tpu.dimension_semantics<parallel>, #tpu.dimension_semantics<parallel>, #tpu.dimension_semantics<arbitrary>], iteration_bounds = array<i64: 1, 1, 1>, scalar_prefetch = 0 : i64, scratch_operands = 0 : i64, tpu.core_type = #tpu.core_type<tc>, window_params = [{transform_indices = @transform_0, window_bounds = array<i64: 24, 128>}, {transform_indices = @transform_1, window_bounds = array<i64: 128, 384>}, {transform_indices = @transform_2, window_bounds = array<i64: 1, 384>}, {transform_indices = @transform_3, window_bounds = array<i64: 24, 384>}]} {
    %c0 = arith.constant 0 : index
    %c0_0 = arith.constant 0 : index
    %0 = vector.load %arg3[%c0, %c0_0] : memref<24x128xbf16, #tpu.memory_space<vmem>>, vector<24x128xbf16>
    %c0_1 = arith.constant 0 : index
    %c0_2 = arith.constant 0 : index
    %1 = vector.load %arg4[%c0_1, %c0_2] : memref<128x384xbf16, #tpu.memory_space<vmem>>, vector<128x384xbf16>
    %cst = arith.constant dense<0.000000e+00> : vector<24x384xf32>
    %2 = tpu.matmul %0, %1, %cst {dimension_numbers = #tpu.dot_dimension_numbers<[1], [0], [0], [1], [0, 0, 1, 1], [], []>} : vector<24x128xbf16>, vector<128x384xbf16>, vector<24x384xf32> -> vector<24x384xf32>
    %c0_3 = arith.constant 0 : index
    %c0_4 = arith.constant 0 : index
    %3 = vector.load %arg5[%c0_3, %c0_4] : memref<1x384xf32, #tpu.memory_space<vmem>>, vector<1x384xf32>
    %4 = vector.broadcast %3 : vector<1x384xf32> to vector<24x384xf32>
    %5 = arith.addf %2, %4 : vector<24x384xf32>
    %6 = arith.truncf %5 : vector<24x384xf32> to vector<24x384xbf16>
    %c0_5 = arith.constant 0 : index
    %c0_6 = arith.constant 0 : index
    %7 = vector.load %arg6[%c0_5, %c0_6] : memref<24x384xbf16, #tpu.memory_space<vmem>>, vector<24x384xbf16>
    tpu.vector_store %arg6[%c0_5, %c0_6], %6 {strides = array<i32>} : memref<24x384xbf16, #tpu.memory_space<vmem>>, vector<24x384xbf16>,
    return
  }
  func.func @transform_0(%arg0: i32, %arg1: i32, %arg2: i32) -> (i32, i32) {
    %c0_i32 = arith.constant 0 : i32
    return %arg0, %arg2 : i32, i32
  }
  func.func @transform_1(%arg0: i32, %arg1: i32, %arg2: i32) -> (i32, i32) {
    %c0_i32 = arith.constant 0 : i32
    return %arg2, %arg1 : i32, i32
  }
  func.func @transform_2(%arg0: i32, %arg1: i32, %arg2: i32) -> (i32, i32) {
    %c0_i32 = arith.constant 0 : i32
    %c0_i32_0 = arith.constant 0 : i32
    return %c0_i32, %arg1 : i32, i32
  }
  func.func @transform_3(%arg0: i32, %arg1: i32, %arg2: i32) -> (i32, i32) {
    %c0_i32 = arith.constant 0 : i32
    return %arg0, %arg1 : i32, i32
  }
}

module attributes {stable_mosaic.version = 11 : i64} {
  func.func @_attn_kernel(%arg0: i32, %arg1: memref<2x5x128xbf16, #tpu.memory_space<vmem>>, %arg2: memref<2x5x128xbf16, #tpu.memory_space<vmem>>, %arg3: memref<2x5x128xbf16, #tpu.memory_space<vmem>>, %arg4: memref<2x5x128xbf16, #tpu.memory_space<vmem>>) attributes {dimension_semantics = [#tpu.dimension_semantics<parallel>], iteration_bounds = array<i64: 2>, scalar_prefetch = 0 : i64, scratch_operands = 0 : i64, tpu.core_type = #tpu.core_type<tc>, window_params = [{transform_indices = @transform_0, window_bounds = array<i64: 2, 5, 128>}, {transform_indices = @transform_1, window_bounds = array<i64: 2, 5, 128>}, {transform_indices = @transform_2, window_bounds = array<i64: 2, 5, 128>}, {transform_indices = @transform_3, window_bounds = array<i64: 2, 5, 128>}]} {
    %c0 = arith.constant 0 : index
    %c0_0 = arith.constant 0 : index
    %c0_1 = arith.constant 0 : index
    %0 = vector.load %arg1[%c0, %c0_0, %c0_1] : memref<2x5x128xbf16, #tpu.memory_space<vmem>>, vector<2x5x128xbf16>
    %c0_2 = arith.constant 0 : index
    %c0_3 = arith.constant 0 : index
    %c0_4 = arith.constant 0 : index
    %1 = vector.load %arg2[%c0_2, %c0_3, %c0_4] : memref<2x5x128xbf16, #tpu.memory_space<vmem>>, vector<2x5x128xbf16>
    %c0_5 = arith.constant 0 : index
    %c0_6 = arith.constant 0 : index
    %c0_7 = arith.constant 0 : index
    %2 = vector.load %arg3[%c0_5, %c0_6, %c0_7] : memref<2x5x128xbf16, #tpu.memory_space<vmem>>, vector<2x5x128xbf16>
    %3 = vector.extract_strided_slice %0 {offsets = [0, 0, 0], sizes = [2, 5, 32], strides = [1, 1, 1]} : vector<2x5x128xbf16> to vector<2x5x32xbf16>
    %4 = vector.extract_strided_slice %1 {offsets = [0, 0, 0], sizes = [2, 5, 32], strides = [1, 1, 1]} : vector<2x5x128xbf16> to vector<2x5x32xbf16>
    %5 = vector.extract_strided_slice %2 {offsets = [0, 0, 0], sizes = [2, 5, 32], strides = [1, 1, 1]} : vector<2x5x128xbf16> to vector<2x5x32xbf16>
    %cst = arith.constant dense<0.000000e+00> : vector<2x5x5xf32>
    %6 = tpu.matmul %3, %4, %cst {dimension_numbers = #tpu.dot_dimension_numbers<[2], [2], [1], [1], [0, 0, 0, 1, 1, 1], [0], [0]>} : vector<2x5x32xbf16>, vector<2x5x32xbf16>, vector<2x5x5xf32> -> vector<2x5x5xf32>
    %cst_8 = arith.constant 0.176776692 : f32
    %7 = vector.broadcast %cst_8 : f32 to vector<2x5x5xf32>
    %8 = arith.mulf %6, %7 : vector<2x5x5xf32>
    %cst_9 = arith.constant dense<0xFF800000> : vector<2x5xf32>
    %9 = vector.multi_reduction <maximumf>, %8, %cst_9 [2] : vector<2x5x5xf32> to vector<2x5xf32>
    %10 = vector.shape_cast %9 : vector<2x5xf32> to vector<2x5x1xf32>
    %11 = vector.broadcast %10 : vector<2x5x1xf32> to vector<2x5x5xf32>
    %12 = arith.subf %8, %11 : vector<2x5x5xf32>
    %13 = math.exp %12 : vector<2x5x5xf32>
    %cst_10 = arith.constant dense<0.000000e+00> : vector<2x5xf32>
    %14 = vector.multi_reduction <add>, %13, %cst_10 [2] : vector<2x5x5xf32> to vector<2x5xf32>
    %15 = vector.shape_cast %14 : vector<2x5xf32> to vector<2x5x1xf32>
    %16 = tpu.reciprocal %15 {approx = true} : vector<2x5x1xf32> -> vector<2x5x1xf32>
    %17 = vector.broadcast %16 : vector<2x5x1xf32> to vector<2x5x5xf32>
    %18 = arith.mulf %13, %17 : vector<2x5x5xf32>
    %19 = arith.truncf %18 : vector<2x5x5xf32> to vector<2x5x5xbf16>
    %cst_11 = arith.constant dense<0.000000e+00> : vector<2x5x32xf32>
    %20 = tpu.matmul %19, %5, %cst_11 {dimension_numbers = #tpu.dot_dimension_numbers<[2], [1], [1], [2], [0, 0, 0, 1, 1, 2], [0], [0]>} : vector<2x5x5xbf16>, vector<2x5x32xbf16>, vector<2x5x32xf32> -> vector<2x5x32xf32>
    %21 = arith.truncf %20 : vector<2x5x32xf32> to vector<2x5x32xbf16>
    %22 = vector.extract_strided_slice %0 {offsets = [0, 0, 32], sizes = [2, 5, 32], strides = [1, 1, 1]} : vector<2x5x128xbf16> to vector<2x5x32xbf16>
    %23 = vector.extract_strided_slice %1 {offsets = [0, 0, 32], sizes = [2, 5, 32], strides = [1, 1, 1]} : vector<2x5x128xbf16> to vector<2x5x32xbf16>
    %24 = vector.extract_strided_slice %2 {offsets = [0, 0, 32], sizes = [2, 5, 32], strides = [1, 1, 1]} : vector<2x5x128xbf16> to vector<2x5x32xbf16>
    %cst_12 = arith.constant dense<0.000000e+00> : vector<2x5x5xf32>
    %25 = tpu.matmul %22, %23, %cst_12 {dimension_numbers = #tpu.dot_dimension_numbers<[2], [2], [1], [1], [0, 0, 0, 1, 1, 1], [0], [0]>} : vector<2x5x32xbf16>, vector<2x5x32xbf16>, vector<2x5x5xf32> -> vector<2x5x5xf32>
    %cst_13 = arith.constant 0.176776692 : f32
    %26 = vector.broadcast %cst_13 : f32 to vector<2x5x5xf32>
    %27 = arith.mulf %25, %26 : vector<2x5x5xf32>
    %cst_14 = arith.constant dense<0xFF800000> : vector<2x5xf32>
    %28 = vector.multi_reduction <maximumf>, %27, %cst_14 [2] : vector<2x5x5xf32> to vector<2x5xf32>
    %29 = vector.shape_cast %28 : vector<2x5xf32> to vector<2x5x1xf32>
    %30 = vector.broadcast %29 : vector<2x5x1xf32> to vector<2x5x5xf32>
    %31 = arith.subf %27, %30 : vector<2x5x5xf32>
    %32 = math.exp %31 : vector<2x5x5xf32>
    %cst_15 = arith.constant dense<0.000000e+00> : vector<2x5xf32>
    %33 = vector.multi_reduction <add>, %32, %cst_15 [2] : vector<2x5x5xf32> to vector<2x5xf32>
    %34 = vector.shape_cast %33 : vector<2x5xf32> to vector<2x5x1xf32>
    %35 = tpu.reciprocal %34 {approx = true} : vector<2x5x1xf32> -> vector<2x5x1xf32>
    %36 = vector.broadcast %35 : vector<2x5x1xf32> to vector<2x5x5xf32>
    %37 = arith.mulf %32, %36 : vector<2x5x5xf32>
    %38 = arith.truncf %37 : vector<2x5x5xf32> to vector<2x5x5xbf16>
    %cst_16 = arith.constant dense<0.000000e+00> : vector<2x5x32xf32>
    %39 = tpu.matmul %38, %24, %cst_16 {dimension_numbers = #tpu.dot_dimension_numbers<[2], [1], [1], [2], [0, 0, 0, 1, 1, 2], [0], [0]>} : vector<2x5x5xbf16>, vector<2x5x32xbf16>, vector<2x5x32xf32> -> vector<2x5x32xf32>
    %40 = arith.truncf %39 : vector<2x5x32xf32> to vector<2x5x32xbf16>
    %41 = vector.extract_strided_slice %0 {offsets = [0, 0, 64], sizes = [2, 5, 32], strides = [1, 1, 1]} : vector<2x5x128xbf16> to vector<2x5x32xbf16>
    %42 = vector.extract_strided_slice %1 {offsets = [0, 0, 64], sizes = [2, 5, 32], strides = [1, 1, 1]} : vector<2x5x128xbf16> to vector<2x5x32xbf16>
    %43 = vector.extract_strided_slice %2 {offsets = [0, 0, 64], sizes = [2, 5, 32], strides = [1, 1, 1]} : vector<2x5x128xbf16> to vector<2x5x32xbf16>
    %cst_17 = arith.constant dense<0.000000e+00> : vector<2x5x5xf32>
    %44 = tpu.matmul %41, %42, %cst_17 {dimension_numbers = #tpu.dot_dimension_numbers<[2], [2], [1], [1], [0, 0, 0, 1, 1, 1], [0], [0]>} : vector<2x5x32xbf16>, vector<2x5x32xbf16>, vector<2x5x5xf32> -> vector<2x5x5xf32>
    %cst_18 = arith.constant 0.176776692 : f32
    %45 = vector.broadcast %cst_18 : f32 to vector<2x5x5xf32>
    %46 = arith.mulf %44, %45 : vector<2x5x5xf32>
    %cst_19 = arith.constant dense<0xFF800000> : vector<2x5xf32>
    %47 = vector.multi_reduction <maximumf>, %46, %cst_19 [2] : vector<2x5x5xf32> to vector<2x5xf32>
    %48 = vector.shape_cast %47 : vector<2x5xf32> to vector<2x5x1xf32>
    %49 = vector.broadcast %48 : vector<2x5x1xf32> to vector<2x5x5xf32>
    %50 = arith.subf %46, %49 : vector<2x5x5xf32>
    %51 = math.exp %50 : vector<2x5x5xf32>
    %cst_20 = arith.constant dense<0.000000e+00> : vector<2x5xf32>
    %52 = vector.multi_reduction <add>, %51, %cst_20 [2] : vector<2x5x5xf32> to vector<2x5xf32>
    %53 = vector.shape_cast %52 : vector<2x5xf32> to vector<2x5x1xf32>
    %54 = tpu.reciprocal %53 {approx = true} : vector<2x5x1xf32> -> vector<2x5x1xf32>
    %55 = vector.broadcast %54 : vector<2x5x1xf32> to vector<2x5x5xf32>
    %56 = arith.mulf %51, %55 : vector<2x5x5xf32>
    %57 = arith.truncf %56 : vector<2x5x5xf32> to vector<2x5x5xbf16>
    %cst_21 = arith.constant dense<0.000000e+00> : vector<2x5x32xf32>
    %58 = tpu.matmul %57, %43, %cst_21 {dimension_numbers = #tpu.dot_dimension_numbers<[2], [1], [1], [2], [0, 0, 0, 1, 1, 2], [0], [0]>} : vector<2x5x5xbf16>, vector<2x5x32xbf16>, vector<2x5x32xf32> -> vector<2x5x32xf32>
    %59 = arith.truncf %58 : vector<2x5x32xf32> to vector<2x5x32xbf16>
    %60 = vector.extract_strided_slice %0 {offsets = [0, 0, 96], sizes = [2, 5, 32], strides = [1, 1, 1]} : vector<2x5x128xbf16> to vector<2x5x32xbf16>
    %61 = vector.extract_strided_slice %1 {offsets = [0, 0, 96], sizes = [2, 5, 32], strides = [1, 1, 1]} : vector<2x5x128xbf16> to vector<2x5x32xbf16>
    %62 = vector.extract_strided_slice %2 {offsets = [0, 0, 96], sizes = [2, 5, 32], strides = [1, 1, 1]} : vector<2x5x128xbf16> to vector<2x5x32xbf16>
    %cst_22 = arith.constant dense<0.000000e+00> : vector<2x5x5xf32>
    %63 = tpu.matmul %60, %61, %cst_22 {dimension_numbers = #tpu.dot_dimension_numbers<[2], [2], [1], [1], [0, 0, 0, 1, 1, 1], [0], [0]>} : vector<2x5x32xbf16>, vector<2x5x32xbf16>, vector<2x5x5xf32> -> vector<2x5x5xf32>
    %cst_23 = arith.constant 0.176776692 : f32
    %64 = vector.broadcast %cst_23 : f32 to vector<2x5x5xf32>
    %65 = arith.mulf %63, %64 : vector<2x5x5xf32>
    %cst_24 = arith.constant dense<0xFF800000> : vector<2x5xf32>
    %66 = vector.multi_reduction <maximumf>, %65, %cst_24 [2] : vector<2x5x5xf32> to vector<2x5xf32>
    %67 = vector.shape_cast %66 : vector<2x5xf32> to vector<2x5x1xf32>
    %68 = vector.broadcast %67 : vector<2x5x1xf32> to vector<2x5x5xf32>
    %69 = arith.subf %65, %68 : vector<2x5x5xf32>
    %70 = math.exp %69 : vector<2x5x5xf32>
    %cst_25 = arith.constant dense<0.000000e+00> : vector<2x5xf32>
    %71 = vector.multi_reduction <add>, %70, %cst_25 [2] : vector<2x5x5xf32> to vector<2x5xf32>
    %72 = vector.shape_cast %71 : vector<2x5xf32> to vector<2x5x1xf32>
    %73 = tpu.reciprocal %72 {approx = true} : vector<2x5x1xf32> -> vector<2x5x1xf32>
    %74 = vector.broadcast %73 : vector<2x5x1xf32> to vector<2x5x5xf32>
    %75 = arith.mulf %70, %74 : vector<2x5x5xf32>
    %76 = arith.truncf %75 : vector<2x5x5xf32> to vector<2x5x5xbf16>
    %cst_26 = arith.constant dense<0.000000e+00> : vector<2x5x32xf32>
    %77 = tpu.matmul %76, %62, %cst_26 {dimension_numbers = #tpu.dot_dimension_numbers<[2], [1], [1], [2], [0, 0, 0, 1, 1, 2], [0], [0]>} : vector<2x5x5xbf16>, vector<2x5x32xbf16>, vector<2x5x32xf32> -> vector<2x5x32xf32>
    %78 = arith.truncf %77 : vector<2x5x32xf32> to vector<2x5x32xbf16>
    %79 = tpu.concatenate %21, %40, %59, %78 in 2 : vector<2x5x32xbf16>, vector<2x5x32xbf16>, vector<2x5x32xbf16>, vector<2x5x32xbf16> -> vector<2x5x128xbf16>
    %c0_27 = arith.constant 0 : index
    %c0_28 = arith.constant 0 : index
    %c0_29 = arith.constant 0 : index
    %80 = vector.load %arg4[%c0_27, %c0_28, %c0_29] : memref<2x5x128xbf16, #tpu.memory_space<vmem>>, vector<2x5x128xbf16>
    tpu.vector_store %arg4[%c0_27, %c0_28, %c0_29], %79 {strides = array<i32>} : memref<2x5x128xbf16, #tpu.memory_space<vmem>>, vector<2x5x128xbf16>,
    return
  }
  func.func @transform_0(%arg0: i32) -> (i32, i32, i32) {
    %c0_i32 = arith.constant 0 : i32
    %c0_i32_0 = arith.constant 0 : i32
    %c0_i32_1 = arith.constant 0 : i32
    return %arg0, %c0_i32, %c0_i32_0 : i32, i32, i32
  }
  func.func @transform_1(%arg0: i32) -> (i32, i32, i32) {
    %c0_i32 = arith.constant 0 : i32
    %c1_i32 = arith.constant 1 : i32
    %c0_i32_0 = arith.constant 0 : i32
    return %arg0, %c0_i32, %c1_i32 : i32, i32, i32
  }
  func.func @transform_2(%arg0: i32) -> (i32, i32, i32) {
    %c0_i32 = arith.constant 0 : i32
    %c2_i32 = arith.constant 2 : i32
    %c0_i32_0 = arith.constant 0 : i32
    return %arg0, %c0_i32, %c2_i32 : i32, i32, i32
  }
  func.func @transform_3(%arg0: i32) -> (i32, i32, i32) {
    %c0_i32 = arith.constant 0 : i32
    %c0_i32_0 = arith.constant 0 : i32
    %c0_i32_1 = arith.constant 0 : i32
    return %arg0, %c0_i32, %c0_i32_0 : i32, i32, i32
  }
}

module attributes {stable_mosaic.version = 11 : i64} {
  func.func @_matmul_kernel_1k(%arg0: i32, %arg1: i32, %arg2: i32, %arg3: memref<24x128xbf16, #tpu.memory_space<vmem>>, %arg4: memref<128x128xbf16, #tpu.memory_space<vmem>>, %arg5: memref<1x128xf32, #tpu.memory_space<vmem>>, %arg6: memref<24x128xbf16, #tpu.memory_space<vmem>>) attributes {dimension_semantics = [#tpu.dimension_semantics<parallel>, #tpu.dimension_semantics<parallel>, #tpu.dimension_semantics<arbitrary>], iteration_bounds = array<i64: 1, 1, 1>, scalar_prefetch = 0 : i64, scratch_operands = 0 : i64, tpu.core_type = #tpu.core_type<tc>, window_params = [{transform_indices = @transform_0, window_bounds = array<i64: 24, 128>}, {transform_indices = @transform_1, window_bounds = array<i64: 128, 128>}, {transform_indices = @transform_2, window_bounds = array<i64: 1, 128>}, {transform_indices = @transform_3, window_bounds = array<i64: 24, 128>}]} {
    %c0 = arith.constant 0 : index
    %c0_0 = arith.constant 0 : index
    %0 = vector.load %arg3[%c0, %c0_0] : memref<24x128xbf16, #tpu.memory_space<vmem>>, vector<24x128xbf16>
    %c0_1 = arith.constant 0 : index
    %c0_2 = arith.constant 0 : index
    %1 = vector.load %arg4[%c0_1, %c0_2] : memref<128x128xbf16, #tpu.memory_space<vmem>>, vector<128x128xbf16>
    %cst = arith.constant dense<0.000000e+00> : vector<24x128xf32>
    %2 = tpu.matmul %0, %1, %cst {dimension_numbers = #tpu.dot_dimension_numbers<[1], [0], [0], [1], [0, 0, 1, 1], [], []>} : vector<24x128xbf16>, vector<128x128xbf16>, vector<24x128xf32> -> vector<24x128xf32>
    %c0_3 = arith.constant 0 : index
    %c0_4 = arith.constant 0 : index
    %3 = vector.load %arg5[%c0_3, %c0_4] : memref<1x128xf32, #tpu.memory_space<vmem>>, vector<1x128xf32>
    %4 = vector.broadcast %3 : vector<1x128xf32> to vector<24x128xf32>
    %5 = arith.addf %2, %4 : vector<24x128xf32>
    %6 = arith.truncf %5 : vector<24x128xf32> to vector<24x128xbf16>
    %c0_5 = arith.constant 0 : index
    %c0_6 = arith.constant 0 : index
    %7 = vector.load %arg6[%c0_5, %c0_6] : memref<24x128xbf16, #tpu.memory_space<vmem>>, vector<24x128xbf16>
    tpu.vector_store %arg6[%c0_5, %c0_6], %6 {strides = array<i32>} : memref<24x128xbf16, #tpu.memory_space<vmem>>, vector<24x128xbf16>,
    return
  }
  func.func @transform_0(%arg0: i32, %arg1: i32, %arg2: i32) -> (i32, i32) {
    %c0_i32 = arith.constant 0 : i32
    return %arg0, %arg2 : i32, i32
  }
  func.func @transform_1(%arg0: i32, %arg1: i32, %arg2: i32) -> (i32, i32) {
    %c0_i32 = arith.constant 0 : i32
    return %arg2, %arg1 : i32, i32
  }
  func.func @transform_2(%arg0: i32, %arg1: i32, %arg2: i32) -> (i32, i32) {
    %c0_i32 = arith.constant 0 : i32
    %c0_i32_0 = arith.constant 0 : i32
    return %c0_i32, %arg1 : i32, i32
  }
  func.func @transform_3(%arg0: i32, %arg1: i32, %arg2: i32) -> (i32, i32) {
    %c0_i32 = arith.constant 0 : i32
    return %arg0, %arg1 : i32, i32
  }
}

module attributes {stable_mosaic.version = 11 : i64} {
  func.func @_matmul_kernel_1k(%arg0: i32, %arg1: i32, %arg2: i32, %arg3: memref<24x512xbf16, #tpu.memory_space<vmem>>, %arg4: memref<512x128xbf16, #tpu.memory_space<vmem>>, %arg5: memref<1x128xf32, #tpu.memory_space<vmem>>, %arg6: memref<24x128xbf16, #tpu.memory_space<vmem>>) attributes {dimension_semantics = [#tpu.dimension_semantics<parallel>, #tpu.dimension_semantics<parallel>, #tpu.dimension_semantics<arbitrary>], iteration_bounds = array<i64: 1, 1, 1>, scalar_prefetch = 0 : i64, scratch_operands = 0 : i64, tpu.core_type = #tpu.core_type<tc>, window_params = [{transform_indices = @transform_0, window_bounds = array<i64: 24, 512>}, {transform_indices = @transform_1, window_bounds = array<i64: 512, 128>}, {transform_indices = @transform_2, window_bounds = array<i64: 1, 128>}, {transform_indices = @transform_3, window_bounds = array<i64: 24, 128>}]} {
    %c0 = arith.constant 0 : index
    %c0_0 = arith.constant 0 : index
    %0 = vector.load %arg3[%c0, %c0_0] : memref<24x512xbf16, #tpu.memory_space<vmem>>, vector<24x512xbf16>
    %c0_1 = arith.constant 0 : index
    %c0_2 = arith.constant 0 : index
    %1 = vector.load %arg4[%c0_1, %c0_2] : memref<512x128xbf16, #tpu.memory_space<vmem>>, vector<512x128xbf16>
    %cst = arith.constant dense<0.000000e+00> : vector<24x128xf32>
    %2 = tpu.matmul %0, %1, %cst {dimension_numbers = #tpu.dot_dimension_numbers<[1], [0], [0], [1], [0, 0, 1, 1], [], []>} : vector<24x512xbf16>, vector<512x128xbf16>, vector<24x128xf32> -> vector<24x128xf32>
    %c0_3 = arith.constant 0 : index
    %c0_4 = arith.constant 0 : index
    %3 = vector.load %arg5[%c0_3, %c0_4] : memref<1x128xf32, #tpu.memory_space<vmem>>, vector<1x128xf32>
    %4 = vector.broadcast %3 : vector<1x128xf32> to vector<24x128xf32>
    %5 = arith.addf %2, %4 : vector<24x128xf32>
    %6 = arith.truncf %5 : vector<24x128xf32> to vector<24x128xbf16>
    %c0_5 = arith.constant 0 : index
    %c0_6 = arith.constant 0 : index
    %7 = vector.load %arg6[%c0_5, %c0_6] : memref<24x128xbf16, #tpu.memory_space<vmem>>, vector<24x128xbf16>
    tpu.vector_store %arg6[%c0_5, %c0_6], %6 {strides = array<i32>} : memref<24x128xbf16, #tpu.memory_space<vmem>>, vector<24x128xbf16>,
    return
  }
  func.func @transform_0(%arg0: i32, %arg1: i32, %arg2: i32) -> (i32, i32) {
    %c0_i32 = arith.constant 0 : i32
    return %arg0, %arg2 : i32, i32
  }
  func.func @transform_1(%arg0: i32, %arg1: i32, %arg2: i32) -> (i32, i32) {
    %c0_i32 = arith.constant 0 : i32
    return %arg2, %arg1 : i32, i32
  }
  func.func @transform_2(%arg0: i32, %arg1: i32, %arg2: i32) -> (i32, i32) {
    %c0_i32 = arith.constant 0 : i32
    %c0_i32_0 = arith.constant 0 : i32
    return %c0_i32, %arg1 : i32, i32
  }
  func.func @transform_3(%arg0: i32, %arg1: i32, %arg2: i32) -> (i32, i32) {
    %c0_i32 = arith.constant 0 : i32
    return %arg0, %arg1 : i32, i32
  }
}

module attributes {stable_mosaic.version = 11 : i64} {
  func.func @_matmul_kernel_1k(%arg0: i32, %arg1: i32, %arg2: i32, %arg3: memref<24x128xbf16, #tpu.memory_space<vmem>>, %arg4: memref<128x512xbf16, #tpu.memory_space<vmem>>, %arg5: memref<1x512xf32, #tpu.memory_space<vmem>>, %arg6: memref<24x512xbf16, #tpu.memory_space<vmem>>) attributes {dimension_semantics = [#tpu.dimension_semantics<parallel>, #tpu.dimension_semantics<parallel>, #tpu.dimension_semantics<arbitrary>], iteration_bounds = array<i64: 1, 1, 1>, scalar_prefetch = 0 : i64, scratch_operands = 0 : i64, tpu.core_type = #tpu.core_type<tc>, window_params = [{transform_indices = @transform_0, window_bounds = array<i64: 24, 128>}, {transform_indices = @transform_1, window_bounds = array<i64: 128, 512>}, {transform_indices = @transform_2, window_bounds = array<i64: 1, 512>}, {transform_indices = @transform_3, window_bounds = array<i64: 24, 512>}]} {
    %c0 = arith.constant 0 : index
    %c0_0 = arith.constant 0 : index
    %0 = vector.load %arg3[%c0, %c0_0] : memref<24x128xbf16, #tpu.memory_space<vmem>>, vector<24x128xbf16>
    %c0_1 = arith.constant 0 : index
    %c0_2 = arith.constant 0 : index
    %1 = vector.load %arg4[%c0_1, %c0_2] : memref<128x512xbf16, #tpu.memory_space<vmem>>, vector<128x512xbf16>
    %cst = arith.constant dense<0.000000e+00> : vector<24x512xf32>
    %2 = tpu.matmul %0, %1, %cst {dimension_numbers = #tpu.dot_dimension_numbers<[1], [0], [0], [1], [0, 0, 1, 1], [], []>} : vector<24x128xbf16>, vector<128x512xbf16>, vector<24x512xf32> -> vector<24x512xf32>
    %c0_3 = arith.constant 0 : index
    %c0_4 = arith.constant 0 : index
    %3 = vector.load %arg5[%c0_3, %c0_4] : memref<1x512xf32, #tpu.memory_space<vmem>>, vector<1x512xf32>
    %4 = vector.broadcast %3 : vector<1x512xf32> to vector<24x512xf32>
    %5 = arith.addf %2, %4 : vector<24x512xf32>
    %cst_5 = arith.constant 5.000000e-01 : f32
    %6 = vector.broadcast %cst_5 : f32 to vector<24x512xf32>
    %7 = arith.mulf %6, %5 : vector<24x512xf32>
    %cst_6 = arith.constant 0.707106769 : f32
    %8 = vector.broadcast %cst_6 : f32 to vector<24x512xf32>
    %9 = arith.mulf %5, %8 : vector<24x512xf32>
    %10 = math.erf %9 : vector<24x512xf32>
    %cst_7 = arith.constant 1.000000e+00 : f32
    %11 = vector.broadcast %cst_7 : f32 to vector<24x512xf32>
    %12 = arith.addf %11, %10 : vector<24x512xf32>
    %13 = arith.mulf %7, %12 : vector<24x512xf32>
    %14 = arith.truncf %13 : vector<24x512xf32> to vector<24x512xbf16>
    %c0_8 = arith.constant 0 : index
    %c0_9 = arith.constant 0 : index
    %15 = vector.load %arg6[%c0_8, %c0_9] : memref<24x512xbf16, #tpu.memory_space<vmem>>, vector<24x512xbf16>
    tpu.vector_store %arg6[%c0_8, %c0_9], %14 {strides = array<i32>} : memref<24x512xbf16, #tpu.memory_space<vmem>>, vector<24x512xbf16>,
    return
  }
  func.func @transform_0(%arg0: i32, %arg1: i32, %arg2: i32) -> (i32, i32) {
    %c0_i32 = arith.constant 0 : i32
    return %arg0, %arg2 : i32, i32
  }
  func.func @transform_1(%arg0: i32, %arg1: i32, %arg2: i32) -> (i32, i32) {
    %c0_i32 = arith.constant 0 : i32
    return %arg2, %arg1 : i32, i32
  }
  func.func @transform_2(%arg0: i32, %arg1: i32, %arg2: i32) -> (i32, i32) {
    %c0_i32 = arith.constant 0 : i32
    %c0_i32_0 = arith.constant 0 : i32
    return %c0_i32, %arg1 : i32, i32
  }
  func.func @transform_3(%arg0: i32, %arg1: i32, %arg2: i32) -> (i32, i32) {
    %c0_i32 = arith.constant 0 : i32
    return %arg0, %arg1 : i32, i32
  }
}

module attributes {stable_mosaic.version = 11 : i64} {
  func.func @_layernorm_kernel(%arg0: i32, %arg1: memref<24x128xbf16, #tpu.memory_space<vmem>>, %arg2: memref<1x128xf32, #tpu.memory_space<vmem>>, %arg3: memref<1x128xf32, #tpu.memory_space<vmem>>, %arg4: memref<24x128xf32, #tpu.memory_space<vmem>>) attributes {dimension_semantics = [#tpu.dimension_semantics<parallel>], iteration_bounds = array<i64: 1>, scalar_prefetch = 0 : i64, scratch_operands = 0 : i64, tpu.core_type = #tpu.core_type<tc>, window_params = [{transform_indices = @transform_0, window_bounds = array<i64: 24, 128>}, {pipeline_mode = #tpu.pipeline_mode<synchronous>, transform_indices = @transform_1, window_bounds = array<i64: 1, 128>}, {pipeline_mode = #tpu.pipeline_mode<synchronous>, transform_indices = @transform_2, window_bounds = array<i64: 1, 128>}, {transform_indices = @transform_3, window_bounds = array<i64: 24, 128>}]} {
    %c0 = arith.constant 0 : index
    %c0_0 = arith.constant 0 : index
    %0 = vector.load %arg1[%c0, %c0_0] : memref<24x128xbf16, #tpu.memory_space<vmem>>, vector<24x128xbf16>
    %1 = arith.extf %0 : vector<24x128xbf16> to vector<24x128xf32>
    %cst = arith.constant dense<0.000000e+00> : vector<24xf32>
    %2 = vector.multi_reduction <add>, %1, %cst [1] : vector<24x128xf32> to vector<24xf32>
    %3 = vector.shape_cast %2 : vector<24xf32> to vector<24x1xf32>
    %cst_1 = arith.constant 1.280000e+02 : f32
    %4 = vector.broadcast %cst_1 : f32 to vector<24x1xf32>
    %5 = arith.divf %3, %4 : vector<24x1xf32>
    %6 = vector.broadcast %5 : vector<24x1xf32> to vector<24x128xf32>
    %7 = arith.subf %1, %6 : vector<24x128xf32>
    %8 = arith.mulf %7, %7 : vector<24x128xf32>
    %cst_2 = arith.constant dense<0.000000e+00> : vector<24xf32>
    %9 = vector.multi_reduction <add>, %8, %cst_2 [1] : vector<24x128xf32> to vector<24xf32>
    %10 = vector.shape_cast %9 : vector<24xf32> to vector<24x1xf32>
    %cst_3 = arith.constant 1.280000e+02 : f32
    %11 = vector.broadcast %cst_3 : f32 to vector<24x1xf32>
    %12 = arith.divf %10, %11 : vector<24x1xf32>
    %13 = vector.broadcast %5 : vector<24x1xf32> to vector<24x128xf32>
    %14 = arith.subf %1, %13 : vector<24x128xf32>
    %cst_4 = arith.constant 9.99999997E-7 : f32
    %15 = vector.broadcast %cst_4 : f32 to vector<24x1xf32>
    %16 = arith.addf %12, %15 : vector<24x1xf32>
    %17 = math.rsqrt %16 : vector<24x1xf32>
    %18 = vector.broadcast %17 : vector<24x1xf32> to vector<24x128xf32>
    %19 = arith.mulf %14, %18 : vector<24x128xf32>
    %c0_5 = arith.constant 0 : index
    %c0_6 = arith.constant 0 : index
    %20 = vector.load %arg2[%c0_5, %c0_6] : memref<1x128xf32, #tpu.memory_space<vmem>>, vector<1x128xf32>
    %21 = vector.broadcast %20 : vector<1x128xf32> to vector<24x128xf32>
    %22 = arith.mulf %19, %21 : vector<24x128xf32>
    %c0_7 = arith.constant 0 : index
    %c0_8 = arith.constant 0 : index
    %23 = vector.load %arg3[%c0_7, %c0_8] : memref<1x128xf32, #tpu.memory_space<vmem>>, vector<1x128xf32>
    %24 = vector.broadcast %23 : vector<1x128xf32> to vector<24x128xf32>
    %25 = arith.addf %22, %24 : vector<24x128xf32>
    %c0_9 = arith.constant 0 : index
    %c0_10 = arith.constant 0 : index
    %26 = vector.load %arg4[%c0_9, %c0_10] : memref<24x128xf32, #tpu.memory_space<vmem>>, vector<24x128xf32>
    tpu.vector_store %arg4[%c0_9, %c0_10], %25 {strides = array<i32>} : memref<24x128xf32, #tpu.memory_space<vmem>>, vector<24x128xf32>,
    return
  }
  func.func @transform_0(%arg0: i32) -> (i32, i32) {
    %c0_i32 = arith.constant 0 : i32
    %c0_i32_0 = arith.constant 0 : i32
    return %arg0, %c0_i32 : i32, i32
  }
  func.func @transform_1(%arg0: i32) -> (i32, i32) {
    %c0_i32 = arith.constant 0 : i32
    %c0_i32_0 = arith.constant 0 : i32
    %c0_i32_1 = arith.constant 0 : i32
    return %c0_i32, %c0_i32_0 : i32, i32
  }
  func.func @transform_2(%arg0: i32) -> (i32, i32) {
    %c0_i32 = arith.constant 0 : i32
    %c0_i32_0 = arith.constant 0 : i32
    %c0_i32_1 = arith.constant 0 : i32
    return %c0_i32, %c0_i32_0 : i32, i32
  }
  func.func @transform_3(%arg0: i32) -> (i32, i32) {
    %c0_i32 = arith.constant 0 : i32
    %c0_i32_0 = arith.constant 0 : i32
    return %arg0, %c0_i32 : i32, i32
  }
}

</mosaic_0001>

<bundles_post_ra>
// kernel: timesformer_forward.27
= control target key start
LH: loop header
LB: loop body
LE: loop exit
PB: predicated region body
PF: predicated region fallthrough
CT: control target
= control target key end

     0   :  { %s124_s0 = inlined_call_operand.vmem [shape: bf16[16,128], index: 0, kind: input, shape index: {}]   ;;  %s125_s1 = inlined_call_operand.vmem [shape: f32[1,128], index: 1, kind: input, shape index: {}]   ;;  %s126_s2 = inlined_call_operand.vmem [shape: f32[1,128], index: 2, kind: input, shape index: {}]   ;;  %s127_s3 = inlined_call_operand.vmem [shape: bf16[16,128], index: 3, kind: output, shape index: {}]  }
   0x1   :  { %v80_v0 = vld [vmem:[%s124_s0] sm:$0xff]  }
   0x2   :  { %v81_v1 = vunpack.c.l.bf16 %v80_v0  ;;  %v82_v2 = vunpack.c.h.bf16 %v80_v0  ;;  %v73_v19 = vld [vmem:[%s125_s1] ss:$0 sm:$0xff] }
   0x3   :  { %v74_v23 = vld [vmem:[%s126_s2] ss:$0 sm:$0xff] }
   0x4   :  { %18 = vadd.xlane.f32.xlu0 %v81_v1 }
   0x8   :  { %20 = vadd.xlane.f32.xlu0 %v82_v2 }
  0x91   :  { %v19_v3 = vpop.xlane.xlu0 %18 }
  0x92   :  { %v23_v4 = vmul.f32 0.0078125, %v19_v3 }
  0x94   :  { %v25_v5 = vsub.f32 %v81_v1, %v23_v4 }
  0x95   :  { %v21_v6 = vpop.xlane.xlu0 %20 }
  0x96   :  { %v24_v7 = vmul.f32 0.0078125, %v21_v6  ;;  %v27_v8 = vmul.f32 %v25_v5, %v25_v5 }
  0x98   :  { %v26_v9 = vsub.f32 %v82_v2, %v24_v7  ;;  %29 = vadd.xlane.f32.xlu1 %v27_v8 }
  0x9a   :  { %v28_v10 = vmul.f32 %v26_v9, %v26_v9 }
  0x9c   :  { %31 = vadd.xlane.f32.xlu1 %v28_v10 }
 0x125   :  { %v30_v11 = vpop.xlane.xlu1 %29 }
 0x126   :  { %v33_v12 = vmul.f32 0.0078125, %v30_v11 }
 0x128   :  { %v35_v13 = vadd.f32 1e-06, %v33_v12 }
 0x129   :  { %v32_v14 = vpop.xlane.xlu1 %31 }
 0x12a   :  { %88 = vrsqrt.f32 %v35_v13  ;;  %v34_v15 = vmul.f32 0.0078125, %v32_v14 }
 0x12c   :  { %v36_v16 = vadd.f32 1e-06, %v34_v15 }
 0x12e   :  { %90 = vrsqrt.f32 %v36_v16 }
 0x134   :  { %v89_v17 = vpop.eup %88 }
 0x135   :  { %v39_v18 = vmul.f32 %v89_v17, %v25_v5 }
 0x137   :  { %v48_v21 = vmul.f32 %v73_v19, %v39_v18 }
 0x138   :  { %v91_v20 = vpop.eup %90 }
 0x139   :  { %v40_v22 = vmul.f32 %v91_v20, %v26_v9  ;;  %v57_v25 = vadd.f32 %v74_v23, %v48_v21 }
 0x13b   :  { %v49_v24 = vmul.f32 %v73_v19, %v40_v22 }
 0x13d   :  { %v58_v26 = vadd.f32 %v74_v23, %v49_v24 }
 0x13f   :  { %v86_v27 = vpack.c.bf16 %v58_v26, %v57_v25 }
 0x141   :  { %87 = vst [vmem:[%s127_s3] sm:$0xff] %v86_v27  }

// kernel: timesformer_forward.26
= control target key start
LH: loop header
LB: loop body
LE: loop exit
PB: predicated region body
PF: predicated region fallthrough
CT: control target
= control target key end

     0   :  { %s954_s1 = inlined_call_operand.vmem [shape: bf16[768,128], index: 1, kind: input, shape index: {}]   ;;  %s955_s0 = inlined_call_operand.vmem [shape: bf16[16,768], index: 0, kind: input, shape index: {}]   ;;  %s956_s2 = inlined_call_operand.vmem [shape: f32[1,128], index: 2, kind: input, shape index: {}]   ;;  %s957_s3 = inlined_call_operand.vmem [shape: bf16[16,128], index: 3, kind: output, shape index: {}]  }
   0x1   :  { %v709_v0 = vld [vmem:[%s954_s1 + $0x40] sm:$0xff]   ;;  %v713_v4 = vld [vmem:[%s954_s1 + $0x48] sm:$0xff]   ;;  %v717_v8 = vld [vmem:[%s954_s1 + $0x50] sm:$0xff]  }
   0x2   :  { %v710_v1 = vld [vmem:[%s954_s1] sm:$0xff]   ;;  %643 = vmatprep.subr.bf16.mxu0 %v709_v0  ;;  %v714_v5 = vld [vmem:[%s954_s1 + $0x8] sm:$0xff]   ;;  %v718_v9 = vld [vmem:[%s954_s1 + $0x10] sm:$0xff]  }
   0x3   :  { %v711_v2 = vld [vmem:[%s954_s1 + $0xc0] sm:$0xff]   ;;  %644 = vmatpush3.bf16.msra.mxu0 %v710_v1  ;;  %v715_v6 = vld [vmem:[%s954_s1 + $0xc8] sm:$0xff]   ;;  %v719_v10 = vld [vmem:[%s954_s1 + $0xd0] sm:$0xff]  }
   0x4   :  { %v712_v3 = vld [vmem:[%s954_s1 + $0x80] sm:$0xff]   ;;  %665 = vmatprep.subr.bf16.mxu1 %v711_v2  ;;  %645 = vmatprep.subr.bf16.mxu0 %v713_v4  ;;  %v716_v7 = vld [vmem:[%s954_s1 + $0x88] sm:$0xff]   ;;  %v720_v11 = vld [vmem:[%s954_s1 + $0x90] sm:$0xff]  }
   0x5   :  { %666 = vmatpush3.bf16.msra.mxu1 %v712_v3  ;;  %v721_v12 = vld [vmem:[%s954_s1 + $0x58] sm:$0xff]   ;;  %v725_v16 = vld [vmem:[%s954_s1 + $0x60] sm:$0xff]   ;;  %v729_v20 = vld [vmem:[%s954_s1 + $0x68] sm:$0xff]  }
   0x6   :  { %667 = vmatprep.subr.bf16.mxu1 %v715_v6  ;;  %v722_v13 = vld [vmem:[%s954_s1 + $0x18] sm:$0xff]   ;;  %v726_v17 = vld [vmem:[%s954_s1 + $0x20] sm:$0xff]   ;;  %v730_v21 = vld [vmem:[%s954_s1 + $0x28] sm:$0xff]  }
   0x7   :  { %646 = vmatpush3.bf16.msra.mxu0 %v714_v5  ;;  %v723_v14 = vld [vmem:[%s954_s1 + $0xd8] sm:$0xff]   ;;  %v727_v18 = vld [vmem:[%s954_s1 + $0xe0] sm:$0xff]   ;;  %v731_v22 = vld [vmem:[%s954_s1 + $0xe8] sm:$0xff]  }
   0x8   :  { %647 = vmatprep.subr.bf16.mxu0 %v717_v8  ;;  %v724_v15 = vld [vmem:[%s954_s1 + $0x98] sm:$0xff]   ;;  %v728_v19 = vld [vmem:[%s954_s1 + $0xa0] sm:$0xff]   ;;  %v732_v23 = vld [vmem:[%s954_s1 + $0xa8] sm:$0xff]  }
   0x9   :  { %668 = vmatpush3.bf16.msra.mxu1 %v716_v7  ;;  %v733_v24 = vld [vmem:[%s954_s1 + $0x70] sm:$0xff]   ;;  %v737_v28 = vld [vmem:[%s954_s1 + $0x78] sm:$0xff]   ;;  %v744_v34 = vld [vmem:[%s954_s1 + $0x140] sm:$0xff]  }
   0xa   :  { %669 = vmatprep.subr.bf16.mxu1 %v719_v10  ;;  %v734_v25 = vld [vmem:[%s954_s1 + $0x30] sm:$0xff]   ;;  %v738_v29 = vld [vmem:[%s954_s1 + $0x38] sm:$0xff]   ;;  %v745_v35 = vld [vmem:[%s955_s0 + $0x8] ss:$24 sps:$4 sm:$0xff]  }
   0xb   :  { %648 = vmatpush3.bf16.msra.mxu0 %v718_v9  ;;  %v735_v26 = vld [vmem:[%s954_s1 + $0xf0] sm:$0xff]   ;;  %v739_v30 = vld [vmem:[%s954_s1 + $0xf8] sm:$0xff]   ;;  %v747_v36 = vld [vmem:[%s955_s0 + $0xc] ss:$24 sps:$4 sm:$0xff]  }
   0xc   :  { %649 = vmatprep.subr.bf16.mxu0 %v721_v12  ;;  %v736_v27 = vld [vmem:[%s954_s1 + $0xb0] sm:$0xff]   ;;  %v740_v31 = vld [vmem:[%s955_s0] ss:$24 sps:$4 sm:$0xff]   ;;  %v742_v32 = vld [vmem:[%s955_s0 + $0x4] ss:$24 sps:$4 sm:$0xff]   ;;  %515 = vmatprep.mubr.bf16.mxu1 %v747_v36 }
   0xd   :  { %670 = vmatpush3.bf16.msra.mxu1 %v720_v11  ;;  %v743_v33 = vld [vmem:[%s954_s1 + $0xb8] sm:$0xff]   ;;  %474 = vmatprep.mubr.bf16.mxu0 %v742_v32  ;;  %v748_v37 = vld [vmem:[%s954_s1 + $0x100] sm:$0xff]   ;;  %v749_v38 = vld [vmem:[%s954_s1 + $0x148] sm:$0xff]  }
   0xe   :  { %671 = vmatprep.subr.bf16.mxu1 %v723_v14  ;;  %v750_v39 = vld [vmem:[%s954_s1 + $0x108] sm:$0xff]   ;;  %v751_v40 = vld [vmem:[%s954_s1 + $0x150] sm:$0xff]   ;;  %v753_v42 = vld [vmem:[%s954_s1 + $0x158] sm:$0xff]  }
   0xf   :  { %650 = vmatpush3.bf16.msra.mxu0 %v722_v13  ;;  %v752_v41 = vld [vmem:[%s954_s1 + $0x110] sm:$0xff]   ;;  %v754_v43 = vld [vmem:[%s954_s1 + $0x118] sm:$0xff]   ;;  %v755_v44 = vld [vmem:[%s954_s1 + $0x160] sm:$0xff]  }
  0x10   :  { %651 = vmatprep.subr.bf16.mxu0 %v725_v16  ;;  %v756_v45 = vld [vmem:[%s954_s1 + $0x120] sm:$0xff]   ;;  %v757_v46 = vld [vmem:[%s954_s1 + $0x168] sm:$0xff]   ;;  %v759_v49 = vld [vmem:[%s954_s1 + $0x170] sm:$0xff]  }
  0x11   :  { %672 = vmatpush3.bf16.msra.mxu1 %v724_v15  ;;  %v765_v47 = vld [vmem:[%s955_s0 + $0x14] ss:$24 sps:$4 sm:$0xff]   ;;  %v761_v51 = vld [vmem:[%s954_s1 + $0x178] sm:$0xff]   ;;  %v763_v53 = vld [vmem:[%s955_s0 + $0x10] ss:$24 sps:$4 sm:$0xff]  }
  0x12   :  { %673 = vmatprep.subr.bf16.mxu1 %v727_v18  ;;  %v758_v48 = vld [vmem:[%s954_s1 + $0x128] sm:$0xff]   ;;  %v760_v50 = vld [vmem:[%s954_s1 + $0x130] sm:$0xff]   ;;  %v762_v52 = vld [vmem:[%s954_s1 + $0x138] sm:$0xff]  }
  0x13   :  { %652 = vmatpush3.bf16.msra.mxu0 %v726_v17  ;;  %v579_v55 = vld [vmem:[%s956_s2] ss:$0 sm:$0xff] }
  0x14   :  { %653 = vmatprep.subr.bf16.mxu0 %v729_v20 }
  0x15   :  { %674 = vmatpush3.bf16.msra.mxu1 %v728_v19 }
  0x16   :  { %675 = vmatprep.subr.bf16.mxu1 %v731_v22 }
  0x17   :  { %654 = vmatpush3.bf16.msra.mxu0 %v730_v21 }
  0x18   :  { %655 = vmatprep.subr.bf16.mxu0 %v733_v24 }
  0x19   :  { %676 = vmatpush3.bf16.msra.mxu1 %v732_v23 }
  0x1a   :  { %677 = vmatprep.subr.bf16.mxu1 %v735_v26 }
  0x1b   :  { %656 = vmatpush3.bf16.msra.mxu0 %v734_v25 }
  0x1c   :  { %657 = vmatprep.subr.bf16.mxu0 %v737_v28 }
  0x1d   :  { %678 = vmatpush3.bf16.msra.mxu1 %v736_v27 }
  0x1e   :  { %679 = vmatprep.subr.bf16.mxu1 %v739_v30 }
  0x1f   :  { %658 = vmatpush3.bf16.msra.mxu0 %v738_v29 }
  0x20   :  { %687 = vmatprep.subr.bf16.mxu0 %v744_v34 }
  0x21   :  { %680 = vmatpush3.bf16.msra.mxu1 %v743_v33 }
  0x22   :  { %475 = vmatmul.mubr.bf16.vlgmr.msra.gmra.mrb[0].mxu0 %v740_v31 }
  0x23   :  { %688 = vmatpush3.bf16.msra.mxu0 %v748_v37  ;;  %556 = vmatprep.mubr.bf16.mxu0 %v765_v47 }
  0x24   :  { %516 = vmatmul.mubr.bf16.vlgmr.msra.gmra.mrb[0].mxu1 %v745_v35  ;;  %689 = vmatprep.subr.bf16.mxu0 %v749_v38 }
  0x27   :  { %690 = vmatpush3.bf16.msra.mxu0 %v750_v39 }
  0x28   :  { %691 = vmatprep.subr.bf16.mxu0 %v751_v40 }
  0x2b   :  { %692 = vmatpush3.bf16.msra.mxu0 %v752_v41 }
  0x2c   :  { %693 = vmatprep.subr.bf16.mxu0 %v753_v42 }
  0x2f   :  { %694 = vmatpush3.bf16.msra.mxu0 %v754_v43 }
  0x30   :  { %695 = vmatprep.subr.bf16.mxu0 %v755_v44 }
  0x33   :  { %696 = vmatpush3.bf16.msra.mxu0 %v756_v45 }
  0x34   :  { %697 = vmatprep.subr.bf16.mxu0 %v757_v46 }
  0x37   :  { %698 = vmatpush3.bf16.msra.mxu0 %v758_v48 }
  0x38   :  { %699 = vmatprep.subr.bf16.mxu0 %v759_v49 }
  0x3b   :  { %700 = vmatpush3.bf16.msra.mxu0 %v760_v50 }
  0x3c   :  { %701 = vmatprep.subr.bf16.mxu0 %v761_v51 }
  0x3f   :  { %702 = vmatpush3.bf16.msra.mxu0 %v762_v52 }
  0x42   :  { %557 = vmatmul.mubr.bf16.vlgmr.msra.gmra.mrb[4].mxu0 %v763_v53 }
  0xf5   :  { %v659_v54 = vpop.f32.mrb[0].mxu0 }
  0xf6   :  { %v660_v56 = vpop.f32.mrb[1].mxu0 }
  0xf7   :  { %v661_v57 = vadd.f32 %v660_v56, %v659_v54  ;;  %v662_v58 = vpop.f32.mrb[2].mxu0  ;;  %v681_v59 = vpop.f32.mrb[0].mxu1 }
  0xf8   :  { %v663_v60 = vpop.f32.mrb[3].mxu0  ;;  %v682_v63 = vpop.f32.mrb[1].mxu1 }
  0xf9   :  { %v477_v61 = vadd.f32 %v661_v57, %v579_v55  ;;  %v664_v62 = vadd.f32 %v663_v60, %v662_v58  ;;  %v683_v0 = vadd.f32 %v682_v63, %v681_v59  ;;  %v684_v1 = vpop.f32.mrb[2].mxu1 }
  0xfa   :  { %v685_v3 = vpop.f32.mrb[3].mxu1 }
  0xfb   :  { %v480_v2 = vadd.f32 %v664_v62, %v579_v55  ;;  %v518_v4 = vadd.f32 %v683_v0, %v477_v61  ;;  %v686_v5 = vadd.f32 %v685_v3, %v684_v1 }
  0xfd   :  { %v521_v6 = vadd.f32 %v686_v5, %v480_v2 }
 0x115   :  { %v703_v7 = vpop.f32.mrb[4].mxu0 }
 0x116   :  { %v704_v8 = vpop.f32.mrb[5].mxu0 }
 0x117   :  { %v705_v9 = vadd.f32 %v704_v8, %v703_v7  ;;  %v706_v10 = vpop.f32.mrb[6].mxu0 }
 0x118   :  { %v707_v11 = vpop.f32.mrb[7].mxu0 }
 0x119   :  { %v559_v12 = vadd.f32 %v705_v9, %v518_v4  ;;  %v708_v13 = vadd.f32 %v707_v11, %v706_v10 }
 0x11b   :  { %v562_v14 = vadd.f32 %v708_v13, %v521_v6 }
 0x11d   :  { %v641_v15 = vpack.c.bf16 %v562_v14, %v559_v12 }
 0x11f   :  { %642 = vst [vmem:[%s957_s3] sm:$0xff] %v641_v15  }

// kernel: timesformer_forward.28
= control target key start
LH: loop header
LB: loop body
LE: loop exit
PB: predicated region body
PF: predicated region fallthrough
CT: control target
= control target key end

     0   :  { %v410_v0 = vmov 0.0   ;;  %vm411_vm0 = vmmov 0   ;;  %v412_v3 = vmov 0   ;;  %v51_v27 = vlaneseq  ;;  %s523_s1 = inlined_call_operand.vmem [shape: bf16[128,384], index: 1, kind: input, shape index: {}]   ;;  %s524_s0 = inlined_call_operand.vmem [shape: bf16[16,128], index: 0, kind: input, shape index: {}]   ;;  %s525_s2 = inlined_call_operand.vmem [shape: f32[1,384], index: 2, kind: input, shape index: {}]   ;;  %s526_s3 = inlined_call_operand.vmem [shape: bf16[16,384], index: 3, kind: output, shape index: {}]  }
   0x1   :  { %354 = vmatprep.subr.bf16.mxu1 %v410_v0  ;;  %v377_v1 = vld [vmem:[%s523_s1 + $0x4] ss:$12 sps:$4 sm:$0xff]   ;;  %370 = vmatprep.mubr.msk.bf16.mxu1 %vm411_vm0, %v410_v0  ;;  %v379_v2 = vld [vmem:[%s523_s1 + $0x8] ss:$12 sps:$4 sm:$0xff]   ;;  %v380_v4 = vld [vmem:[%s523_s1] ss:$12 sps:$4 sm:$0xff]  }
   0x2   :  { %232 = vmatprep.mubr.bf16.mxu0 %v412_v3  ;;  %200 = vmatprep.subr.bf16.mxu0 %v377_v1  ;;  %v381_v5 = vld [vmem:[%s523_s1 + $0x1c] ss:$12 sps:$4 sm:$0xff]   ;;  %v383_v6 = vld [vmem:[%s523_s1 + $0x20] ss:$12 sps:$4 sm:$0xff]   ;;  %v384_v7 = vld [vmem:[%s523_s1 + $0x18] ss:$12 sps:$4 sm:$0xff]  }
   0x3   :  { %355 = vmatpush3.bf16.msra.mxu1 %v379_v2  ;;  %201 = vmatpush1.bf16.msra.mxu0 %v380_v4  ;;  %v385_v8 = vld [vmem:[%s523_s1 + $0x34] ss:$12 sps:$4 sm:$0xff]   ;;  %v387_v9 = vld [vmem:[%s523_s1 + $0x38] ss:$12 sps:$4 sm:$0xff]   ;;  %v388_v10 = vld [vmem:[%s523_s1 + $0x30] ss:$12 sps:$4 sm:$0xff]  }
   0x4   :  { %356 = vmatprep.subr.bf16.mxu1 %v410_v0  ;;  %202 = vmatprep.subr.bf16.mxu0 %v381_v5  ;;  %v389_v11 = vld [vmem:[%s523_s1 + $0x4c] ss:$12 sps:$4 sm:$0xff]   ;;  %v391_v12 = vld [vmem:[%s523_s1 + $0x50] ss:$12 sps:$4 sm:$0xff]   ;;  %v392_v13 = vld [vmem:[%s523_s1 + $0x48] ss:$12 sps:$4 sm:$0xff]  }
   0x5   :  { %v393_v14 = vld [vmem:[%s523_s1 + $0x64] ss:$12 sps:$4 sm:$0xff]   ;;  %v395_v15 = vld [vmem:[%s523_s1 + $0x68] ss:$12 sps:$4 sm:$0xff]   ;;  %v396_v16 = vld [vmem:[%s523_s1 + $0x60] ss:$12 sps:$4 sm:$0xff]  }
   0x6   :  { %v397_v17 = vld [vmem:[%s523_s1 + $0x7c] ss:$12 sps:$4 sm:$0xff]   ;;  %v399_v18 = vld [vmem:[%s523_s1 + $0x80] ss:$12 sps:$4 sm:$0xff]   ;;  %v400_v19 = vld [vmem:[%s523_s1 + $0x78] ss:$12 sps:$4 sm:$0xff]  }
   0x7   :  { %357 = vmatpush3.bf16.msra.mxu1 %v383_v6  ;;  %203 = vmatpush1.bf16.msra.mxu0 %v384_v7  ;;  %v401_v20 = vld [vmem:[%s523_s1 + $0x94] ss:$12 sps:$4 sm:$0xff]   ;;  %v403_v21 = vld [vmem:[%s523_s1 + $0x98] ss:$12 sps:$4 sm:$0xff]   ;;  %v404_v22 = vld [vmem:[%s523_s1 + $0x90] ss:$12 sps:$4 sm:$0xff]  }
   0x8   :  { %358 = vmatprep.subr.bf16.mxu1 %v410_v0  ;;  %204 = vmatprep.subr.bf16.mxu0 %v385_v8  ;;  %v405_v23 = vld [vmem:[%s523_s1 + $0xac] ss:$12 sps:$4 sm:$0xff]   ;;  %v407_v24 = vld [vmem:[%s523_s1 + $0xb0] ss:$12 sps:$4 sm:$0xff]   ;;  %v408_v25 = vld [vmem:[%s523_s1 + $0xa8] ss:$12 sps:$4 sm:$0xff]  }
   0x9   :  { %v409_v26 = vld [vmem:[%s524_s0] sm:$0xff]   ;;  %v52_v28 = vshrl.u32 %v51_v27, 7 }
   0xa   :  { %v49_v30 = vld [vmem:[%s525_s2] sm:$0x7] }
   0xb   :  { %359 = vmatpush3.bf16.msra.mxu1 %v387_v9  ;;  %205 = vmatpush1.bf16.msra.mxu0 %v388_v10  ;;  %v61_v29 = vsub.s32 2, %v52_v28  ;;  %v53_v31 = vsub.s32 0, %v52_v28  ;;  %v57_v32 = vsub.s32 1, %v52_v28 }
   0xc   :  { %360 = vmatprep.subr.bf16.mxu1 %v410_v0  ;;  %206 = vmatprep.subr.bf16.mxu0 %v389_v11 }
   0xd   :  { %v62_v33 = vrot.slane %v49_v30, %v61_v29  ;;  %v54_v34 = vrot.slane %v49_v30, %v53_v31  ;;  %v58_v35 = vrot.slane %v49_v30, %v57_v32 }
   0xf   :  { %361 = vmatpush3.bf16.msra.mxu1 %v391_v12  ;;  %207 = vmatpush1.bf16.msra.mxu0 %v392_v13 }
  0x10   :  { %362 = vmatprep.subr.bf16.mxu1 %v410_v0  ;;  %208 = vmatprep.subr.bf16.mxu0 %v393_v14 }
  0x13   :  { %363 = vmatpush3.bf16.msra.mxu1 %v395_v15  ;;  %209 = vmatpush1.bf16.msra.mxu0 %v396_v16 }
  0x14   :  { %364 = vmatprep.subr.bf16.mxu1 %v410_v0  ;;  %210 = vmatprep.subr.bf16.mxu0 %v397_v17 }
  0x17   :  { %365 = vmatpush3.bf16.msra.mxu1 %v399_v18  ;;  %211 = vmatpush1.bf16.msra.mxu0 %v400_v19 }
  0x18   :  { %366 = vmatprep.subr.bf16.mxu1 %v410_v0  ;;  %212 = vmatprep.subr.bf16.mxu0 %v401_v20 }
  0x1b   :  { %367 = vmatpush3.bf16.msra.mxu1 %v403_v21  ;;  %213 = vmatpush1.bf16.msra.mxu0 %v404_v22 }
  0x1c   :  { %368 = vmatprep.subr.bf16.mxu1 %v410_v0  ;;  %214 = vmatprep.subr.bf16.mxu0 %v405_v23 }
  0x1f   :  { %369 = vmatpush3.bf16.msra.mxu1 %v407_v24  ;;  %215 = vmatpush1.bf16.msra.mxu0 %v408_v25 }
  0x22   :  { %371 = vmatmul.mubr.bf16.vlgmr.msra.gmra.mrb[0].mxu1 %v409_v26  ;;  %233 = vmatmul.mubr.bf16.vlgmr.msra.gmra.mrb[0].mxu0 %v409_v26 }
  0xf5   :  { %v277_v36 = vpop.f32.mrb[0].mxu1  ;;  %v234_v38 = vpop.f32.mrb[0].mxu0 }
  0xf6   :  { %v278_v37 = vadd.f32 %v277_v36, %v62_v33  ;;  %v372_v39 = vpop.f32.mrb[1].mxu1  ;;  %v235_v40 = vadd.f32 %v234_v38, %v54_v34  ;;  %v236_v41 = vpop.f32.mrb[1].mxu0 }
  0xf7   :  { %v280_v42 = vpop.f32.mrb[2].mxu1  ;;  %v237_v44 = vadd.f32 %v236_v41, %v58_v35  ;;  %v238_v46 = vpop.f32.mrb[2].mxu0 }
  0xf8   :  { %v342_v43 = vpack.c.bf16 %v278_v37, %v278_v37  ;;  %v281_v45 = vadd.f32 %v280_v42, %v62_v33  ;;  %v373_v47 = vpop.f32.mrb[3].mxu1  ;;  %v239_v48 = vadd.f32 %v238_v46, %v54_v34  ;;  %v240_v49 = vpop.f32.mrb[3].mxu0 }
  0xf9   :  { %v341_v50 = vpack.c.bf16 %v237_v44, %v235_v40  ;;  %v241_v52 = vadd.f32 %v240_v49, %v58_v35 }
  0xfa   :  { %305 = vst [vmem:[%s526_s3 + $0x8] sm:$0xf] %v342_v43  ;;  %v344_v51 = vpack.c.bf16 %v281_v45, %v281_v45 }
  0xfb   :  { %304 = vst [vmem:[%s526_s3] sm:$0xff] %v341_v50  ;;  %v343_v53 = vpack.c.bf16 %v241_v52, %v239_v48 }
  0xfc   :  { %307 = vst [vmem:[%s526_s3 + $0x14] sm:$0xf] %v344_v51 }
  0xfd   :  { %306 = vst [vmem:[%s526_s3 + $0xc] sm:$0xff] %v343_v53 }

// kernel: timesformer_forward.30
= control target key start
LH: loop header
LB: loop body
LE: loop exit
PB: predicated region body
PF: predicated region fallthrough
CT: control target
= control target key end

     0   :  { %v208_v0 = vmov 0.0   ;;  %vm209_vm0 = vmmov 0   ;;  %s263_s1 = inlined_call_operand.vmem [shape: bf16[128,128], index: 1, kind: input, shape index: {}]   ;;  %s264_s0 = inlined_call_operand.vmem [shape: bf16[16,128], index: 0, kind: input, shape index: {}]   ;;  %s265_s2 = inlined_call_operand.vmem [shape: f32[1,128], index: 2, kind: input, shape index: {}]   ;;  %s266_s3 = inlined_call_operand.vmem [shape: bf16[16,128], index: 3, kind: output, shape index: {}]  }
   0x1   :  { %177 = vmatprep.subr.bf16.mxu0 %v208_v0  ;;  %v199_v1 = vld [vmem:[%s263_s1] sm:$0xff]   ;;  %193 = vmatprep.mubr.msk.bf16.mxu0 %vm209_vm0, %v208_v0  ;;  %v200_v2 = vld [vmem:[%s263_s1 + $0x8] sm:$0xff]   ;;  %v201_v3 = vld [vmem:[%s263_s1 + $0x10] sm:$0xff]  }
   0x2   :  { %178 = vmatpush3.bf16.msra.mxu0 %v199_v1  ;;  %v202_v4 = vld [vmem:[%s263_s1 + $0x18] sm:$0xff]   ;;  %v203_v5 = vld [vmem:[%s263_s1 + $0x20] sm:$0xff]   ;;  %v204_v6 = vld [vmem:[%s263_s1 + $0x28] sm:$0xff]  }
   0x3   :  { %179 = vmatprep.subr.bf16.mxu0 %v208_v0  ;;  %v205_v7 = vld [vmem:[%s263_s1 + $0x30] sm:$0xff]   ;;  %v206_v8 = vld [vmem:[%s263_s1 + $0x38] sm:$0xff]   ;;  %v207_v9 = vld [vmem:[%s264_s0] sm:$0xff]  }
   0x4   :  { %v149_v10 = vld [vmem:[%s265_s2] ss:$0 sm:$0xff] }
   0x6   :  { %180 = vmatpush3.bf16.msra.mxu0 %v200_v2 }
   0x7   :  { %181 = vmatprep.subr.bf16.mxu0 %v208_v0 }
   0xa   :  { %182 = vmatpush3.bf16.msra.mxu0 %v201_v3 }
   0xb   :  { %183 = vmatprep.subr.bf16.mxu0 %v208_v0 }
   0xe   :  { %184 = vmatpush3.bf16.msra.mxu0 %v202_v4 }
   0xf   :  { %185 = vmatprep.subr.bf16.mxu0 %v208_v0 }
  0x12   :  { %186 = vmatpush3.bf16.msra.mxu0 %v203_v5 }
  0x13   :  { %187 = vmatprep.subr.bf16.mxu0 %v208_v0 }
  0x16   :  { %188 = vmatpush3.bf16.msra.mxu0 %v204_v6 }
  0x17   :  { %189 = vmatprep.subr.bf16.mxu0 %v208_v0 }
  0x1a   :  { %190 = vmatpush3.bf16.msra.mxu0 %v205_v7 }
  0x1b   :  { %191 = vmatprep.subr.bf16.mxu0 %v208_v0 }
  0x1e   :  { %192 = vmatpush3.bf16.msra.mxu0 %v206_v8 }
  0x21   :  { %194 = vmatmul.mubr.bf16.vlgmr.msra.gmra.mrb[0].mxu0 %v207_v9 }
  0xf4   :  { %v128_v11 = vpop.f32.mrb[0].mxu0 }
  0xf5   :  { %v195_v12 = vpop.f32.mrb[1].mxu0  ;;  %v129_v14 = vadd.f32 %v149_v10, %v128_v11 }
  0xf6   :  { %v131_v13 = vpop.f32.mrb[2].mxu0 }
  0xf7   :  { %v132_v15 = vadd.f32 %v149_v10, %v131_v13  ;;  %v196_v16 = vpop.f32.mrb[3].mxu0 }
  0xf9   :  { %v166_v17 = vpack.c.bf16 %v132_v15, %v129_v14 }
  0xfb   :  { %167 = vst [vmem:[%s266_s3] sm:$0xff] %v166_v17  }

// kernel: timesformer_forward.29
= control target key start
LH: loop header
LB: loop body
LE: loop exit
PB: predicated region body
PF: predicated region fallthrough
CT: control target
= control target key end

     0   :  { %s2943_s12 = smov 0   ;;  %s2945_s13 = smov 0   ;;  %s3476_s0 = inlined_call_operand.vmem [shape: bf16[8,2,384], index: 0, kind: input, shape index: {}, may-alias: {0,1,2}]   ;;  %s3477_s1 = inlined_call_operand.vmem [shape: bf16[8,2,384], index: 1, kind: input, shape index: {}, may-alias: {0,1,2}]   ;;  %s3478_s2 = inlined_call_operand.vmem [shape: bf16[8,2,384], index: 2, kind: input, shape index: {}, may-alias: {0,1,2}]   ;;  %s3479_s3 = inlined_call_operand.vmem [shape: bf16[8,2,128], index: 3, kind: output, shape index: {}]  }
   0x1   :  { %s2947_s14 = smov 0  }
   0x2 LB: > { %s2486_s15 = sadd.s32 4294967295, %s2915_s14   ;;  %s2960_s16 = sadd.s32 1, %s2915_s14   ;;  %s2915_s14 = sphi %s2947_s14, %s3483_s14   ;;  %s2911_s13 = sphi %s2945_s13, %s3482_s13   ;;  %s2907_s12 = sphi %s2943_s12, %s3481_s12  }
   0x3   : > { %s17_s17 = ssub.s32 %s2915_s14, %s2960_s16  ;;  %s20_s18 = sadd.s32 1, %s2911_s13 }
   0x4   : > { %p18_p0 = scmp.eq.s32.totalorder %s17_s17, 0  ;;  %p27_p1 = scmp.ne.s32.totalorder %s2911_s13, %s2907_s12 }
   0x5   : > { %p28_p2 = scmp.eq.s32.totalorder %s2915_s14, 0  ;;  %p2489_p4 = scmp.ge.s32.totalorder %s2915_s14, 2 }
   0x6   : > { %s2969_s19 = scalar_select %p18_p0, %s2911_s13, %s20_s18  }
   0x7   : > { %p2971_p3 = por %p28_p2, %p27_p1  ;;  %131 = sbr.rel (%p2489_p4) target bundleno = 35 (0x23), region = 16 }
   0xe   : > { %134 = sbr.rel (!%p2971_p3) target bundleno = 21 (0x15), region = 20  ;;  %s136_s21 = sand.u32 (%p2971_p3), 1, %s2911_s13  }
   0xf   : > { %s2798_s22 = smul.u32 (%p2971_p3), 12, %s2915_s14  ;;  %s2490_s23 = sshll.u32 (%p2971_p3), %s136_s21, 2 }
  0x10   : > { %s138_s27 = scalar_lea.vmem (%p2971_p3), [#allocation2], %s2490_s23 }
  0x11   : > { %s141_s26 = scalar_lea.vmem (%p2971_p3), %s3476_s0, %s2798_s22 }
  0x12   : > { %v157_v0 = vld [vmem:[%s141_s26] sm:$0x1] (%p2971_p3)  ;;  %v159_v1 = vld [vmem:[%s141_s26 + $0x3] sm:$0x1] (%p2971_p3)  ;;  %v161_v2 = vld [vmem:[%s141_s26 + $0x6] sm:$0x1] (%p2971_p3) }
  0x13   : > { %158 = vst [vmem:[%s138_s27] sm:$0x1] (%p2971_p3), %v157_v0  ;;  %160 = vst [vmem:[%s138_s27 + $0x1] sm:$0x1] (%p2971_p3), %v159_v1  ;;  %v163_v3 = vld [vmem:[%s141_s26 + $0x9] sm:$0x1] (%p2971_p3) }
  0x14   : > { %162 = vst [vmem:[%s138_s27 + $0x2] sm:$0x1] (%p2971_p3), %v161_v2  ;;  %164 = vst [vmem:[%s138_s27 + $0x3] sm:$0x1] (%p2971_p3), %v163_v3 }
  0x15 PF: > { %187 = sbr.rel (!%p2971_p3) target bundleno = 28 (0x1c), region = 54  ;;  %s189_s28 = sand.u32 (%p2971_p3), 1, %s2911_s13  }
  0x16   : > { %s2418_s29 = smul.u32 (%p2971_p3), 12, %s2915_s14  ;;  %s2493_s30 = sshll.u32 (%p2971_p3), %s189_s28, 2 }
  0x17   : > { %s191_s7 = scalar_lea.vmem (%p2971_p3), [#allocation3], %s2493_s30 }
  0x18   : > { %s2419_s6 = scalar_lea.vmem (%p2971_p3), %s3477_s1, %s2418_s29 }
  0x19   : > { %v2494_v4 = vld [vmem:[%s2419_s6 + $0x1] sm:$0x1] (%p2971_p3)  ;;  %v2495_v5 = vld [vmem:[%s2419_s6 + $0x4] sm:$0x1] (%p2971_p3)  ;;  %v2496_v6 = vld [vmem:[%s2419_s6 + $0x7] sm:$0x1] (%p2971_p3) }
  0x1a   : > { %212 = vst [vmem:[%s191_s7] sm:$0x1] (%p2971_p3), %v2494_v4  ;;  %214 = vst [vmem:[%s191_s7 + $0x1] sm:$0x1] (%p2971_p3), %v2495_v5  ;;  %v2497_v7 = vld [vmem:[%s2419_s6 + $0xa] sm:$0x1] (%p2971_p3) }
  0x1b   : > { %216 = vst [vmem:[%s191_s7 + $0x2] sm:$0x1] (%p2971_p3), %v2496_v6  ;;  %218 = vst [vmem:[%s191_s7 + $0x3] sm:$0x1] (%p2971_p3), %v2497_v7 }
  0x1c PF: > { %241 = sbr.rel (!%p2971_p3) target bundleno = 35 (0x23), region = 88  ;;  %s243_s8 = sand.u32 (%p2971_p3), 1, %s2911_s13  }
  0x1d   : > { %s2423_s9 = smul.u32 (%p2971_p3), 12, %s2915_s14  ;;  %s2498_s10 = sshll.u32 (%p2971_p3), %s243_s8, 2 }
  0x1e   : > { %s245_s21 = scalar_lea.vmem (%p2971_p3), [#allocation4], %s2498_s10 }
  0x1f   : > { %s2424_s18 = scalar_lea.vmem (%p2971_p3), %s3478_s2, %s2423_s9 }
  0x20   : > { %v2499_v8 = vld [vmem:[%s2424_s18 + $0x2] sm:$0x1] (%p2971_p3)  ;;  %v2500_v9 = vld [vmem:[%s2424_s18 + $0x5] sm:$0x1] (%p2971_p3)  ;;  %v2501_v10 = vld [vmem:[%s2424_s18 + $0x8] sm:$0x1] (%p2971_p3) }
  0x21   : > { %266 = vst [vmem:[%s245_s21] sm:$0x1] (%p2971_p3), %v2499_v8  ;;  %268 = vst [vmem:[%s245_s21 + $0x1] sm:$0x1] (%p2971_p3), %v2500_v9  ;;  %v2502_v11 = vld [vmem:[%s2424_s18 + $0xb] sm:$0x1] (%p2971_p3) }
  0x22   : > { %270 = vst [vmem:[%s245_s21 + $0x2] sm:$0x1] (%p2971_p3), %v2501_v10  ;;  %272 = vst [vmem:[%s245_s21 + $0x3] sm:$0x1] (%p2971_p3), %v2502_v11 }
  0x23 PF: > { %p2503_p5 = scmp.ge.s32.totalorder %s2915_s14, 1  ;;  %p294_p6 = scmp.lt.s32.totalorder %s2915_s14, 3 }
  0x25   : > { %p295_p7 = pnand %p2503_p5, %p294_p6 }
  0x26   : > { %s301_s20 = sand.u32 (!%p295_p7), 1, %s2907_s12   ;;  %v2917_v12 = vmov (!%p295_p7), 0.0   ;;  %vm366_vm0 = vcmask (!%p295_p7), 261120   ;;  %vm2918_vm1 = vmmov (!%p295_p7), 0   ;;  %vm555_vm2 = vcmask (!%p295_p7), 9216   ;;  %s2920_s24 = smov (!%p295_p7), 96  }
  0x27   : > { %298 = sbr.rel (%p295_p7) target bundleno = 2749 (0xabd), region = 122  ;;  %2606 = vmatprep.subr.bf16.mxu0 (!%p295_p7), %v2917_v12  ;;  %s3001_s22 = sshll.u32 (!%p295_p7), %s301_s20, 2  ;;  %2612 = vmatprep.subr.bf16.mxu1 (!%p295_p7), %v2917_v12  ;;  %v2919_v60 = vmov (!%p295_p7), 1966171168   ;;  %v798_v62 = vlaneseq (!%p295_p7)  ;;  %vm608_vm3 = vcmask (!%p295_p7), 1040384   ;;  %vm604_vm4 = vcmask (!%p295_p7), 15360  }
  0x28   : > { %2608 = vmatprep.mubr.msk.bf16.mxu0 (!%p295_p7), %vm2918_vm1, %v2917_v12  ;;  %2614 = vmatprep.mubr.msk.bf16.mxu1 (!%p295_p7), %vm2918_vm1, %v2917_v12  ;;  %s310_s23 = scalar_lea.vmem (!%p295_p7), [#allocation3], %s3001_s22  ;;  %s303_s12 = scalar_lea.vmem (!%p295_p7), [#allocation2], %s3001_s22  ;;  %v796_v61 = vunpack.c.l.s4 (!%p295_p7), %v2919_v60  ;;  %vm2366_vm5 = vcmask (!%p295_p7), 523264   ;;  %vm2375_vm6 = vcmask (!%p295_p7), 785408  }
  0x29   : > { %v3009_v13 = vld [vmem:[%s310_s23] sm:$0x1] (!%p295_p7)  ;;  %v3011_v14 = vld [vmem:[%s310_s23 + $0x1] sm:$0x1] (!%p295_p7)  ;;  %v3019_v17 = vld [vmem:[%s310_s23 + $0x2] sm:$0x1] (!%p295_p7) }
  0x2a   : > { %v371_v15 = vsel (!%p295_p7), %vm366_vm0, %v3009_v13, 0  ;;  %v417_v16 = vsel (!%p295_p7), %vm366_vm0, %v3011_v14, 0  ;;  %v3021_v18 = vld [vmem:[%s310_s23 + $0x3] sm:$0x1] (!%p295_p7)  ;;  %v3024_v19 = vld [vmem:[%s303_s12] sm:$0x1] (!%p295_p7)  ;;  %v797_v1 = vunpack.c.0.s8 (!%p295_p7), %v796_v61 }
  0x2b   : > { %2607 = vmatpush3.bf16.xpose.msra.mxu0 (!%p295_p7), %v371_v15  ;;  %2613 = vmatpush3.bf16.xpose.msra.mxu1 (!%p295_p7), %v417_v16  ;;  %v3026_v20 = vld [vmem:[%s303_s12 + $0x1] sm:$0x1] (!%p295_p7)  ;;  %v463_v21 = vsel (!%p295_p7), %vm366_vm0, %v3019_v17, 0  ;;  %v509_v22 = vsel (!%p295_p7), %vm366_vm0, %v3021_v18, 0  ;;  %v3042_v23 = vld [vmem:[%s303_s12 + $0x2] sm:$0x1] (!%p295_p7) }
  0x2c   : > { %2618 = vmatprep.subr.bf16.mxu0 (!%p295_p7), %v2917_v12  ;;  %2624 = vmatprep.subr.bf16.mxu1 (!%p295_p7), %v2917_v12  ;;  %v3044_v24 = vld [vmem:[%s303_s12 + $0x3] sm:$0x1] (!%p295_p7)  ;;  %v799_v2 = vshrl.u32 (!%p295_p7), %v798_v62, 7  ;;  %s3090_s25 = scalar_lea.vmem (!%p295_p7), [#allocation4], %s3001_s22  ;;  %s2921_s26 = smov (!%p295_p7), 64  }
  0x2d   : > { %v3093_v11 = vld [vmem:[%s3090_s25] sm:$0x1] (!%p295_p7)  ;;  %s2922_s27 = smov (!%p295_p7), 32   ;;  %s2507_s28 = sshll.u32 (!%p295_p7), %s2486_s15, 2 }
  0x2e   : > { %v3073_v5 = vsub.s32 %v797_v1, %v799_v2  ;;  %p349_p8 = scmp.lt.s32.totalorder %s2507_s28, 7 }
  0x30   : > { %v898_v6 = vrot.slane %v3011_v14, %v3073_v5  ;;  %v801_v7 = vrot.slane %v3024_v19, %v3073_v5  ;;  %v818_v10 = vrot.slane %v3009_v13, %v3073_v5  ;;  %v610_v14 = vsel %vm608_vm3, %v3093_v11, 0  ;;  %v3106_v13 = vld [vmem:[%s3090_s25 + $0x1] sm:$0x1]  ;;  %s3485_s28 = smov (!%p349_p8, %s2507_s28), 7 }
  0x31   : > { %v881_v15 = vrot.slane %v3026_v20, %v3073_v5  ;;  %s351_s4 = scalar_lea.vmem %s3479_s3, %s3485_s28 }
  0x32   : > { %2609 = vmatmul.mubr.msk.bf16.vlgmr.msra.gmra.mrb[0].mxu0 %vm366_vm0, %v3024_v19  ;;  %2615 = vmatmul.mubr.msk.bf16.vlgmr.msra.gmra.mrb[0].mxu1 %vm366_vm0, %v3026_v20  ;;  %v3080_v8 = vrot.slane %v898_v6, %v3073_v5  ;;  %v3085_v9 = vrot.slane %v801_v7, %v3073_v5  ;;  %v3102_v16 = vrot.slane %v818_v10, %v3073_v5 }
  0x33   : > { %2619 = vmatpush3.bf16.xpose.msra.mxu0 %v463_v21  ;;  %2625 = vmatpush3.bf16.xpose.msra.mxu1 %v509_v22  ;;  %v3111_v19 = vrot.slane %v881_v15, %v3073_v5  ;;  %v961_v21 = vrot.slane %v3042_v23, %v3073_v5  ;;  %v656_v22 = vsel %vm608_vm3, %v3106_v13, 0 }
  0x34   : > { %2620 = vmatprep.mubr.msk.bf16.mxu0 %vm2918_vm1, %v2917_v12  ;;  %2626 = vmatprep.mubr.msk.bf16.mxu1 %vm2918_vm1, %v2917_v12 }
  0x35   : > { %2630 = vmatprep.subr.bf16.mxu0 %v2917_v12  ;;  %2636 = vmatprep.subr.bf16.mxu1 %v2917_v12  ;;  %v3121_v20 = vrot.slane %v961_v21, %v3073_v5 }
  0x3a   : > { %2621 = vmatmul.mubr.msk.bf16.vlgmr.msra.gmra.mrb[4].mxu0 %vm366_vm0, %v3042_v23  ;;  %2627 = vmatmul.mubr.msk.bf16.vlgmr.msra.gmra.mrb[4].mxu1 %vm366_vm0, %v3044_v24 }
  0x3b   : > { %2632 = vmatprep.mubr.msk.bf16.mxu0 %vm2918_vm1, %v2917_v12  ;;  %2638 = vmatprep.mubr.msk.bf16.mxu1 %vm2918_vm1, %v2917_v12 }
  0x3c   : > { %2631 = vmatpush3.bf16.msra.mxu0 %v610_v14  ;;  %2637 = vmatpush3.bf16.msra.mxu1 %v656_v22 }
  0x3d   : > { %2642 = vmatprep.subr.bf16.mxu0 %v2917_v12  ;;  %2648 = vmatprep.subr.bf16.mxu1 %v2917_v12 }
 0x105   : > { %v407_v25 = vpop.f32.mrb[0].mxu0  ;;  %v453_v26 = vpop.f32.mrb[0].mxu1 }
 0x106   : > { %v551_v27 = vmul.f32 0.17677669, %v407_v25  ;;  %v2610_v28 = vpop.f32.mrb[1].mxu0  ;;  %v552_v29 = vmul.f32 0.17677669, %v453_v26  ;;  %v2616_v30 = vpop.f32.mrb[1].mxu1 }
 0x107   : > { %v410_v31 = vpop.f32.mrb[2].mxu0  ;;  %v456_v32 = vpop.f32.mrb[2].mxu1  ;;  %v1058_v30 = vrot.slane %v3021_v18, %v3073_v5 }
 0x108   : > { %v2611_v33 = vpop.f32.mrb[3].mxu0  ;;  %v2617_v34 = vpop.f32.mrb[3].mxu1  ;;  %v556_v35 = vsel %vm555_vm2, %v551_v27, -inf  ;;  %v559_v36 = vsel %vm555_vm2, %v552_v29, -inf }
 0x109   : > { %557 = vmax.xlane.f32.xlu0 %v556_v35  ;;  %v3137_v32 = vrot.slane %v1058_v30, %v3073_v5  ;;  %v1041_v33 = vrot.slane %v3044_v24, %v3073_v5 }
 0x10d   : > { %560 = vmax.xlane.f32.xlu0 %v559_v36  ;;  %v499_v37 = vpop.f32.mrb[4].mxu0  ;;  %v545_v38 = vpop.f32.mrb[4].mxu1 }
 0x10e   : > { %v553_v39 = vmul.f32 0.17677669, %v499_v37  ;;  %v3056_v40 = vmul.f32 0.17677669, %v545_v38  ;;  %v2622_v41 = vpop.f32.mrb[5].mxu0  ;;  %v2628_v42 = vpop.f32.mrb[5].mxu1 }
 0x10f   : > { %v502_v43 = vpop.f32.mrb[6].mxu0  ;;  %v548_v44 = vpop.f32.mrb[6].mxu1  ;;  %v3149_v37 = vld [vmem:[%s3090_s25 + $0x2] sm:$0x1]  ;;  %v3155_v41 = vld [vmem:[%s3090_s25 + $0x3] sm:$0x1] }
 0x110   : > { %v562_v45 = vsel %vm555_vm2, %v553_v39, -inf  ;;  %v2623_v46 = vpop.f32.mrb[7].mxu0  ;;  %v2629_v47 = vpop.f32.mrb[7].mxu1  ;;  %v565_v48 = vsel %vm555_vm2, %v3056_v40, -inf  ;;  %v748_v44 = vsel %vm608_vm3, %v3155_v41, 0 }
 0x111   : > { %563 = vmax.xlane.f32.xlu1 %v562_v45 }
 0x115   : > { %566 = vmax.xlane.f32.xlu1 %v565_v48 }
 0x196   : > { %v558_v49 = vpop.xlane.xlu0 %557 }
 0x197   : > { %v568_v50 = vsub.f32 %v551_v27, %v558_v49 }
 0x199   : > { %v572_v51 = vmul.f32 1.442695, %v568_v50 }
 0x19a   : > { %v561_v52 = vpop.xlane.xlu0 %560 }
 0x19b   : > { %2829 = vpow2.f32 %v572_v51  ;;  %v569_v53 = vsub.f32 %v552_v29, %v561_v52  ;;  %v978_v29 = vrot.slane %v3019_v17, %v3073_v5  ;;  %v3144_v17 = vrot.slane %v1041_v33, %v3073_v5 }
 0x19d   : > { %v574_v54 = vmul.f32 1.442695, %v569_v53  ;;  %v3132_v31 = vrot.slane %v978_v29, %v3073_v5 }
 0x19e   : > { %v564_v55 = vpop.xlane.xlu1 %563 }
 0x19f   : > { %2831 = vpow2.f32 %v574_v54  ;;  %v570_v56 = vsub.f32 %v553_v39, %v564_v55  ;;  %v702_v39 = vsel %vm608_vm3, %v3149_v37, 0 }
 0x1a1   : > { %v576_v57 = vmul.f32 1.442695, %v570_v56 }
 0x1a2   : > { %v567_v25 = vpop.xlane.xlu1 %566 }
 0x1a3   : > { %2833 = vpow2.f32 %v576_v57  ;;  %v571_v26 = vsub.f32 %v3056_v40, %v567_v25 }
 0x1a5   : > { %v3061_v58 = vpop.eup %2829  ;;  %v578_v27 = vmul.f32 1.442695, %v571_v26 }
 0x1a6   : > { %v580_v59 = vsel %vm555_vm2, %v3061_v58, 0.0 }
 0x1a7   : > { %581 = vadd.xlane.f32.xlu0 %v580_v59  ;;  %2835 = vpow2.f32 %v578_v27 }
 0x1a9   : > { %v3065_v63 = vpop.eup %2831 }
 0x1aa   : > { %v583_v0 = vsel %vm555_vm2, %v3065_v63, 0.0 }
 0x1ab   : > { %584 = vadd.xlane.f32.xlu1 %v583_v0 }
 0x1ad   : > { %v3069_v3 = vpop.eup %2833 }
 0x1ae   : > { %v586_v4 = vsel %vm555_vm2, %v3069_v3, 0.0 }
 0x1af   : > { %587 = vadd.xlane.f32.xlu0 %v586_v4 }
 0x1b1   : > { %v2836_v23 = vpop.eup %2835 }
 0x1b2   : > { %v589_v28 = vsel %vm555_vm2, %v2836_v23, 0.0 }
 0x1bc   : > { %906 = vrot.lane.b32.xlu1 %v3080_v8, %s2920_s24 }
 0x1c0   : > { %809 = vrot.lane.b32.xlu1 %v3085_v9, %s2920_s24 }
 0x1c5   : > { %826 = vrot.lane.b32.xlu0 %v3102_v16, %s2920_s24 }
 0x1c9   : > { %889 = vrot.lane.b32.xlu0 %v3111_v19, %s2920_s24 }
 0x1cd   : > { %969 = vrot.lane.b32.xlu0 %v3121_v20, %s2920_s24 }
 0x1e4   : > { %590 = vadd.xlane.f32.xlu1 %v589_v28 }
 0x1f5   : > { %986 = vrot.lane.b32.xlu1 %v3132_v31, %s2920_s24 }
 0x1f9   : > { %1066 = vrot.lane.b32.xlu1 %v3137_v32, %s2920_s24 }
 0x1fd   : > { %1049 = vrot.lane.b32.xlu1 %v3144_v17, %s2920_s24 }
 0x234   : > { %v582_v18 = vpop.xlane.xlu0 %581 }
 0x235   : > { %2837 = vrcp.f32 %v582_v18 }
 0x238   : > { %v585_v34 = vpop.xlane.xlu1 %584 }
 0x239   : > { %2839 = vrcp.f32 %v585_v34 }
 0x23c   : > { %v588_v35 = vpop.xlane.xlu0 %587  ;;  %v907_v50 = vpop.permute.xlu1 %906 }
 0x23d   : > { %2841 = vrcp.f32 %v588_v35  ;;  %v912_v60 = vsel %vm366_vm0, %v907_v50, 0 }
 0x23f   : > { %v2838_v36 = vpop.eup %2837 }
 0x240   : > { %v596_v24 = vmul.f32 %v2838_v36, %v3061_v58  ;;  %v827_v47 = vpop.permute.xlu0 %826  ;;  %v810_v51 = vpop.permute.xlu1 %809 }
 0x241   : > { %v832_v49 = vsel %vm366_vm0, %v827_v47, 0 }
 0x242   : > { %v600_v38 = vpack.c.bf16 %v596_v24, %v596_v24 }
 0x243   : > { %v2840_v40 = vpop.eup %2839 }
 0x244   : > { %v597_v42 = vmul.f32 %v2840_v40, %v3065_v63  ;;  %2633 = vmatmul.mubr.msk.bf16.vlgmr.msra.gmra.mrb[8].mxu0 %vm604_vm4, %v600_v38  ;;  %v890_v54 = vpop.permute.xlu0 %889 }
 0x245   : > { %2643 = vmatpush3.bf16.msra.mxu0 %v702_v39  ;;  %2644 = vmatprep.mubr.msk.bf16.mxu0 %vm2918_vm1, %v2917_v12 }
 0x246   : > { %v601_v43 = vpack.c.bf16 %v597_v42, %v597_v42  ;;  %2654 = vmatprep.subr.bf16.mxu0 %v2917_v12 }
 0x247   : > { %v2842_v45 = vpop.eup %2841 }
 0x248   : > { %v598_v46 = vmul.f32 %v2842_v45, %v3069_v3  ;;  %2639 = vmatmul.mubr.msk.bf16.vlgmr.msra.gmra.mrb[8].mxu1 %vm604_vm4, %v601_v43  ;;  %v970_v56 = vpop.permute.xlu0 %969 }
 0x249   : > { %2649 = vmatpush3.bf16.msra.mxu1 %v748_v44  ;;  %2650 = vmatprep.mubr.msk.bf16.mxu1 %vm2918_vm1, %v2917_v12 }
 0x24a   : > { %v602_v48 = vpack.c.bf16 %v598_v46, %v598_v46  ;;  %2660 = vmatprep.subr.bf16.mxu1 %v2917_v12 }
 0x24c   : > { %2645 = vmatmul.mubr.msk.bf16.vlgmr.msra.gmra.mrb[12].mxu0 %vm604_vm4, %v602_v48 }
 0x24d   : > { %2656 = vmatprep.mubr.msk.bf16.mxu0 %vm2918_vm1, %v2917_v12 }
 0x24e   : > { %2655 = vmatpush3.bf16.xpose.msra.mxu0 %v832_v49 }
 0x24f   : > { %2666 = vmatprep.subr.bf16.mxu0 %v2917_v12 }
 0x255   : > { %2657 = vmatmul.mubr.msk.bf16.vlgmr.msra.gmra.mrb[16].mxu0 %vm366_vm0, %v810_v51 }
 0x256   : > { %2668 = vmatprep.mubr.msk.bf16.mxu0 %vm2918_vm1, %v2917_v12 }
 0x271   : > { %v591_v52 = vpop.xlane.xlu1 %590 }
 0x272   : > { %2843 = vrcp.f32 %v591_v52 }
 0x275   : > { %v987_v53 = vpop.permute.xlu1 %986 }
 0x276   : > { %v992_v55 = vsel %vm366_vm0, %v987_v53, 0 }
 0x277   : > { %2667 = vmatpush3.bf16.xpose.msra.mxu0 %v992_v55  ;;  %v1299_v55 = vrot.slane %v3149_v37, %v3073_v5 }
 0x278   : > { %2678 = vmatprep.subr.bf16.mxu0 %v2917_v12 }
 0x279   : > { %v1067_v61 = vpop.permute.xlu1 %1066 }
 0x27a   : > { %v1072_v62 = vsel %vm366_vm0, %v1067_v61, 0 }
 0x27c   : > { %v2844_v57 = vpop.eup %2843 }
 0x27d   : > { %v599_v58 = vmul.f32 %v2844_v57, %v2836_v23  ;;  %v1050_v63 = vpop.permute.xlu1 %1049  ;;  %v1362_v57 = vrot.slane %v3155_v41, %v3073_v5 }
 0x27e   : > { %2669 = vmatmul.mubr.msk.bf16.vlgmr.msra.gmra.mrb[20].mxu0 %vm366_vm0, %v970_v56 }
 0x27f   : > { %v603_v59 = vpack.c.bf16 %v599_v58, %v599_v58  ;;  %2680 = vmatprep.mubr.msk.bf16.mxu0 %vm2918_vm1, %v2917_v12  ;;  %v3219_v58 = vrot.slane %v1299_v55, %v3073_v5 }
 0x281   : > { %2651 = vmatmul.mubr.msk.bf16.vlgmr.msra.gmra.mrb[12].mxu1 %vm604_vm4, %v603_v59 }
 0x282   : > { %2661 = vmatpush3.bf16.xpose.msra.mxu1 %v912_v60  ;;  %2662 = vmatprep.mubr.msk.bf16.mxu1 %vm2918_vm1, %v2917_v12 }
 0x283   : > { %2672 = vmatprep.subr.bf16.mxu1 %v2917_v12 }
 0x289   : > { %2663 = vmatmul.mubr.msk.bf16.vlgmr.msra.gmra.mrb[16].mxu1 %vm366_vm0, %v890_v54  ;;  %v1236_v54 = vrot.slane %v3106_v13, %v3073_v5  ;;  %v3224_v13 = vrot.slane %v1362_v57, %v3073_v5 }
 0x28a   : > { %2673 = vmatpush3.bf16.xpose.msra.mxu1 %v1072_v62  ;;  %2674 = vmatprep.mubr.msk.bf16.mxu1 %vm2918_vm1, %v2917_v12  ;;  %v1173_v62 = vrot.slane %v3093_v11, %v3073_v5 }
 0x28b   : > { %2684 = vmatprep.subr.bf16.mxu1 %v2917_v12  ;;  %v3212_v56 = vrot.slane %v1236_v54, %v3073_v5 }
 0x291   : > { %2675 = vmatmul.mubr.msk.bf16.vlgmr.msra.gmra.mrb[20].mxu1 %vm366_vm0, %v1050_v63  ;;  %v3232_v63 = vrot.slane %v1173_v62, %v3073_v5 }
 0x292   : > { %2686 = vmatprep.mubr.msk.bf16.mxu1 %vm2918_vm1, %v2917_v12 }
 0x317   : > { %v3195_v0 = vpop.f32.mrb[8].mxu0 }
 0x318   : > { %v2634_v1 = vpop.f32.mrb[9].mxu0 }
 0x319   : > { %v649_v2 = vpop.f32.mrb[10].mxu0 }
 0x31a   : > { %v2635_v3 = vpop.f32.mrb[11].mxu0 }
 0x31b   : > { %v3197_v4 = vpop.f32.mrb[8].mxu1 }
 0x31c   : > { %v2640_v6 = vpop.f32.mrb[9].mxu1 }
 0x31d   : > { %v695_v7 = vpop.f32.mrb[10].mxu1 }
 0x31e   : > { %v2641_v10 = vpop.f32.mrb[11].mxu1 }
 0x31f   : > { %v3199_v14 = vpop.f32.mrb[12].mxu0 }
 0x320   : > { %v2646_v15 = vpop.f32.mrb[13].mxu0 }
 0x321   : > { %v741_v21 = vpop.f32.mrb[14].mxu0 }
 0x322   : > { %v2647_v22 = vpop.f32.mrb[15].mxu0 }
 0x328   : > { %v868_v25 = vpop.f32.mrb[16].mxu0 }
 0x329   : > { %v1114_v26 = vmul.f32 0.17677669, %v868_v25  ;;  %v2658_v27 = vpop.f32.mrb[17].mxu0 }
 0x32a   : > { %v871_v23 = vpop.f32.mrb[18].mxu0 }
 0x32b   : > { %v2659_v28 = vpop.f32.mrb[19].mxu0  ;;  %v1118_v29 = vsel %vm555_vm2, %v1114_v26, -inf }
 0x32c   : > { %1119 = vmax.xlane.f32.xlu0 %v1118_v29 }
 0x351   : > { %v1028_v30 = vpop.f32.mrb[20].mxu0 }
 0x352   : > { %v1116_v33 = vmul.f32 0.17677669, %v1028_v30  ;;  %v2670_v18 = vpop.f32.mrb[21].mxu0 }
 0x353   : > { %v1031_v34 = vpop.f32.mrb[22].mxu0 }
 0x354   : > { %v3202_v35 = vpop.f32.mrb[12].mxu1  ;;  %v1124_v36 = vsel %vm555_vm2, %v1116_v33, -inf  ;;  %v2671_v24 = vpop.f32.mrb[23].mxu0 }
 0x355   : > { %v2652_v38 = vpop.f32.mrb[13].mxu1  ;;  %1125 = vmax.xlane.f32.xlu0 %v1124_v36 }
 0x356   : > { %v787_v39 = vpop.f32.mrb[14].mxu1 }
 0x357   : > { %v2653_v40 = vpop.f32.mrb[15].mxu1 }
 0x35c   : > { %v948_v42 = vpop.f32.mrb[16].mxu1 }
 0x35d   : > { %v1115_v43 = vmul.f32 0.17677669, %v948_v42  ;;  %v2664_v44 = vpop.f32.mrb[17].mxu1 }
 0x35e   : > { %v951_v45 = vpop.f32.mrb[18].mxu1 }
 0x35f   : > { %v2665_v46 = vpop.f32.mrb[19].mxu1  ;;  %v1121_v47 = vsel %vm555_vm2, %v1115_v43, -inf }
 0x360   : > { %1122 = vmax.xlane.f32.xlu1 %v1121_v47 }
 0x364   : > { %v1108_v48 = vpop.f32.mrb[20].mxu1 }
 0x365   : > { %v1117_v49 = vmul.f32 0.17677669, %v1108_v48  ;;  %v2676_v50 = vpop.f32.mrb[21].mxu1 }
 0x366   : > { %v1111_v51 = vpop.f32.mrb[22].mxu1 }
 0x367   : > { %v1127_v52 = vsel %vm555_vm2, %v1117_v49, -inf  ;;  %v2677_v53 = vpop.f32.mrb[23].mxu1 }
 0x368   : > { %1128 = vmax.xlane.f32.xlu0 %v1127_v52 }
 0x371   : > { %1244 = vrot.lane.b32.xlu1 %v3212_v56, %s2920_s24 }
 0x375   : > { %1307 = vrot.lane.b32.xlu1 %v3219_v58, %s2920_s24 }
 0x379   : > { %1370 = vrot.lane.b32.xlu1 %v3224_v13, %s2920_s24 }
 0x3b9   : > { %v1120_v37 = vpop.xlane.xlu0 %1119 }
 0x3ba   : > { %v1130_v59 = vsub.f32 %v1114_v26, %v1120_v37 }
 0x3bc   : > { %v1134_v60 = vmul.f32 1.442695, %v1130_v59 }
 0x3be   : > { %2845 = vpow2.f32 %v1134_v60 }
 0x3c8   : > { %v2846_v41 = vpop.eup %2845 }
 0x3c9   : > { %v1142_v61 = vsel %vm555_vm2, %v2846_v41, 0.0 }
 0x3ca   : > { %1143 = vadd.xlane.f32.xlu0 %v1142_v61 }
 0x3e0   : > { %1181 = vrot.lane.b32.xlu0 %v3232_v63, %s2920_s24 }
 0x3e2   : > { %v1126_v1 = vpop.xlane.xlu0 %1125 }
 0x3e3   : > { %v1132_v2 = vsub.f32 %v1116_v33, %v1126_v1 }
 0x3e5   : > { %v1138_v3 = vmul.f32 1.442695, %v1132_v2 }
 0x3e7   : > { %2847 = vpow2.f32 %v1138_v3 }
 0x3ed   : > { %v1123_v6 = vpop.xlane.xlu1 %1122 }
 0x3ee   : > { %v1131_v7 = vsub.f32 %v1115_v43, %v1123_v6 }
 0x3f0   : > { %v1136_v10 = vmul.f32 1.442695, %v1131_v7 }
 0x3f1   : > { %v1245_v15 = vpop.permute.xlu1 %1244  ;;  %v2848_v11 = vpop.eup %2847 }
 0x3f2   : > { %2849 = vpow2.f32 %v1136_v10  ;;  %v1250_v21 = vsel %vm608_vm3, %v1245_v15, 0  ;;  %v1148_v25 = vsel %vm555_vm2, %v2848_v11, 0.0 }
 0x3f3   : > { %2685 = vmatpush3.bf16.msra.mxu1 %v1250_v21 }
 0x3f4   : > { %2696 = vmatprep.subr.bf16.mxu1 %v2917_v12 }
 0x3f5   : > { %v1129_v26 = vpop.xlane.xlu0 %1128  ;;  %v1308_v24 = vpop.permute.xlu1 %1307 }
 0x3f6   : > { %v1133_v27 = vsub.f32 %v1117_v49, %v1129_v26  ;;  %v1313_v39 = vsel %vm608_vm3, %v1308_v24, 0 }
 0x3f8   : > { %v1140_v23 = vmul.f32 1.442695, %v1133_v27 }
 0x3f9   : > { %v1371_v40 = vpop.permute.xlu1 %1370 }
 0x3fa   : > { %2851 = vpow2.f32 %v1140_v23  ;;  %v1376_v52 = vsel %vm608_vm3, %v1371_v40, 0 }
 0x3fc   : > { %v2850_v5 = vpop.eup %2849 }
 0x3fd   : > { %v1145_v22 = vsel %vm555_vm2, %v2850_v5, 0.0 }
 0x3fe   : > { %1146 = vadd.xlane.f32.xlu1 %v1145_v22 }
 0x3ff   : > { %1149 = vadd.xlane.f32.xlu0 %v1148_v25 }
 0x404   : > { %v2852_v28 = vpop.eup %2851 }
 0x405   : > { %v1151_v29 = vsel %vm555_vm2, %v2852_v28, 0.0 }
 0x40f   : > { %1474 = vrot.lane.b32.xlu1 %v3080_v8, %s2921_s26 }
 0x415   : > { %1424 = vrot.lane.b32.xlu0 %v3102_v16, %s2921_s26 }
 0x419   : > { %1422 = vrot.lane.b32.xlu0 %v3085_v9, %s2921_s26 }
 0x41d   : > { %1472 = vrot.lane.b32.xlu0 %v3111_v19, %s2921_s26 }
 0x421   : > { %1522 = vrot.lane.b32.xlu0 %v3121_v20, %s2921_s26 }
 0x433   : > { %1152 = vadd.xlane.f32.xlu1 %v1151_v29 }
 0x444   : > { %1524 = vrot.lane.b32.xlu1 %v3132_v31, %s2921_s26 }
 0x448   : > { %1574 = vrot.lane.b32.xlu1 %v3137_v32, %s2921_s26 }
 0x44c   : > { %1572 = vrot.lane.b32.xlu1 %v3144_v17, %s2921_s26 }
 0x457   : > { %v1144_v30 = vpop.xlane.xlu0 %1143 }
 0x458   : > { %2853 = vrcp.f32 %v1144_v30 }
 0x45b   : > { %v1182_v33 = vpop.permute.xlu0 %1181 }
 0x45c   : > { %v1187_v18 = vsel %vm608_vm3, %v1182_v33, 0 }
 0x45d   : > { %2679 = vmatpush3.bf16.msra.mxu0 %v1187_v18 }
 0x45e   : > { %2690 = vmatprep.subr.bf16.mxu0 %v2917_v12 }
 0x462   : > { %v2854_v34 = vpop.eup %2853 }
 0x463   : > { %v1158_v36 = vmul.f32 %v2854_v34, %v2846_v41 }
 0x465   : > { %v1162_v38 = vpack.c.bf16 %v1158_v36, %v1158_v36 }
 0x467   : > { %2681 = vmatmul.mubr.msk.bf16.vlgmr.msra.gmra.mrb[24].mxu0 %vm604_vm4, %v1162_v38 }
 0x468   : > { %2691 = vmatpush3.bf16.msra.mxu0 %v1313_v39  ;;  %2692 = vmatprep.mubr.msk.bf16.mxu0 %vm2918_vm1, %v2917_v12 }
 0x469   : > { %2702 = vmatprep.subr.bf16.mxu0 %v2917_v12 }
 0x48b   : > { %v1147_v42 = vpop.xlane.xlu1 %1146 }
 0x48c   : > { %2855 = vrcp.f32 %v1147_v42  ;;  %v1150_v43 = vpop.xlane.xlu0 %1149 }
 0x48d   : > { %2857 = vrcp.f32 %v1150_v43 }
 0x48f   : > { %v1475_v54 = vpop.permute.xlu1 %1474 }
 0x490   : > { %v1425_v47 = vpop.permute.xlu0 %1424  ;;  %v1480_v1 = vsel %vm366_vm0, %v1475_v54, 0 }
 0x491   : > { %v1430_v50 = vsel %vm366_vm0, %v1425_v47, 0 }
 0x494   : > { %v1423_v53 = vpop.permute.xlu0 %1422 }
 0x496   : > { %v2856_v44 = vpop.eup %2855 }
 0x497   : > { %v2858_v45 = vpop.eup %2857  ;;  %v1159_v46 = vmul.f32 %v2856_v44, %v2850_v5 }
 0x498   : > { %v1160_v48 = vmul.f32 %v2858_v45, %v2848_v11  ;;  %v1473_v37 = vpop.permute.xlu0 %1472 }
 0x499   : > { %v1163_v49 = vpack.c.bf16 %v1159_v46, %v1159_v46 }
 0x49a   : > { %v1164_v51 = vpack.c.bf16 %v1160_v48, %v1160_v48 }
 0x49b   : > { %2687 = vmatmul.mubr.msk.bf16.vlgmr.msra.gmra.mrb[24].mxu1 %vm604_vm4, %v1163_v49 }
 0x49c   : > { %2693 = vmatmul.mubr.msk.bf16.vlgmr.msra.gmra.mrb[28].mxu0 %vm604_vm4, %v1164_v51  ;;  %2697 = vmatpush3.bf16.msra.mxu1 %v1376_v52  ;;  %v1523_v60 = vpop.permute.xlu0 %1522 }
 0x49d   : > { %2703 = vmatpush3.bf16.xpose.msra.mxu0 %v1430_v50  ;;  %2704 = vmatprep.mubr.msk.bf16.mxu0 %vm2918_vm1, %v2917_v12 }
 0x49e   : > { %2714 = vmatprep.subr.bf16.mxu0 %v2917_v12  ;;  %2698 = vmatprep.mubr.msk.bf16.mxu1 %vm2918_vm1, %v2917_v12 }
 0x49f   : > { %2708 = vmatprep.subr.bf16.mxu1 %v2917_v12 }
 0x4a4   : > { %2705 = vmatmul.mubr.msk.bf16.vlgmr.msra.gmra.mrb[32].mxu0 %vm366_vm0, %v1423_v53 }
 0x4a5   : > { %2716 = vmatprep.mubr.msk.bf16.mxu0 %vm2918_vm1, %v2917_v12 }
 0x4c0   : > { %v1153_v55 = vpop.xlane.xlu1 %1152 }
 0x4c1   : > { %2859 = vrcp.f32 %v1153_v55 }
 0x4c4   : > { %v1525_v57 = vpop.permute.xlu1 %1524 }
 0x4c5   : > { %v1530_v59 = vsel %vm366_vm0, %v1525_v57, 0 }
 0x4c6   : > { %2715 = vmatpush3.bf16.xpose.msra.mxu0 %v1530_v59 }
 0x4c7   : > { %2726 = vmatprep.subr.bf16.mxu0 %v2917_v12 }
 0x4c8   : > { %v1575_v2 = vpop.permute.xlu1 %1574 }
 0x4c9   : > { %v1580_v3 = vsel %vm366_vm0, %v1575_v2, 0 }
 0x4cb   : > { %v2860_v41 = vpop.eup %2859 }
 0x4cc   : > { %v1161_v61 = vmul.f32 %v2860_v41, %v2852_v28  ;;  %v1573_v6 = vpop.permute.xlu1 %1572 }
 0x4cd   : > { %2717 = vmatmul.mubr.msk.bf16.vlgmr.msra.gmra.mrb[36].mxu0 %vm366_vm0, %v1523_v60 }
 0x4ce   : > { %v1165_v62 = vpack.c.bf16 %v1161_v61, %v1161_v61  ;;  %2728 = vmatprep.mubr.msk.bf16.mxu0 %vm2918_vm1, %v2917_v12 }
 0x4d0   : > { %2699 = vmatmul.mubr.msk.bf16.vlgmr.msra.gmra.mrb[28].mxu1 %vm604_vm4, %v1165_v62 }
 0x4d1   : > { %2709 = vmatpush3.bf16.xpose.msra.mxu1 %v1480_v1  ;;  %2710 = vmatprep.mubr.msk.bf16.mxu1 %vm2918_vm1, %v2917_v12 }
 0x4d2   : > { %2720 = vmatprep.subr.bf16.mxu1 %v2917_v12 }
 0x4d8   : > { %2711 = vmatmul.mubr.msk.bf16.vlgmr.msra.gmra.mrb[32].mxu1 %vm366_vm0, %v1473_v37 }
 0x4d9   : > { %2721 = vmatpush3.bf16.xpose.msra.mxu1 %v1580_v3  ;;  %2722 = vmatprep.mubr.msk.bf16.mxu1 %vm2918_vm1, %v2917_v12 }
 0x4da   : > { %2732 = vmatprep.subr.bf16.mxu1 %v2917_v12 }
 0x4e0   : > { %2723 = vmatmul.mubr.msk.bf16.vlgmr.msra.gmra.mrb[36].mxu1 %vm366_vm0, %v1573_v6 }
 0x4e1   : > { %2734 = vmatprep.mubr.msk.bf16.mxu1 %vm2918_vm1, %v2917_v12 }
 0x53a   : > { %v3295_v7 = vpop.f32.mrb[24].mxu0 }
 0x53b   : > { %v2682_v10 = vpop.f32.mrb[25].mxu0 }
 0x53c   : > { %v1226_v15 = vpop.f32.mrb[26].mxu0 }
 0x53d   : > { %v2683_v21 = vpop.f32.mrb[27].mxu0 }
 0x56e   : > { %v3297_v11 = vpop.f32.mrb[24].mxu1 }
 0x56f   : > { %v3299_v5 = vpop.f32.mrb[28].mxu0  ;;  %v2688_v22 = vpop.f32.mrb[25].mxu1 }
 0x570   : > { %v2694_v25 = vpop.f32.mrb[29].mxu0  ;;  %v1289_v26 = vpop.f32.mrb[26].mxu1 }
 0x571   : > { %v1352_v27 = vpop.f32.mrb[30].mxu0  ;;  %v2689_v23 = vpop.f32.mrb[27].mxu1 }
 0x572   : > { %v2695_v28 = vpop.f32.mrb[31].mxu0 }
 0x577   : > { %v1466_v29 = vpop.f32.mrb[32].mxu0 }
 0x578   : > { %v1622_v30 = vmul.f32 0.17677669, %v1466_v29  ;;  %v2706_v33 = vpop.f32.mrb[33].mxu0 }
 0x579   : > { %v1469_v18 = vpop.f32.mrb[34].mxu0 }
 0x57a   : > { %v1626_v34 = vsel %vm555_vm2, %v1622_v30, -inf  ;;  %v2707_v36 = vpop.f32.mrb[35].mxu0 }
 0x57b   : > { %1627 = vmax.xlane.f32.xlu0 %v1626_v34 }
 0x5a0   : > { %v1566_v24 = vpop.f32.mrb[36].mxu0 }
 0x5a1   : > { %v1624_v38 = vmul.f32 0.17677669, %v1566_v24  ;;  %v2718_v39 = vpop.f32.mrb[37].mxu0 }
 0x5a2   : > { %v1569_v40 = vpop.f32.mrb[38].mxu0 }
 0x5a3   : > { %v3302_v42 = vpop.f32.mrb[28].mxu1  ;;  %v1632_v43 = vsel %vm555_vm2, %v1624_v38, -inf  ;;  %v2719_v44 = vpop.f32.mrb[39].mxu0 }
 0x5a4   : > { %v2700_v45 = vpop.f32.mrb[29].mxu1  ;;  %1633 = vmax.xlane.f32.xlu0 %v1632_v43 }
 0x5a5   : > { %v1415_v46 = vpop.f32.mrb[30].mxu1 }
 0x5a6   : > { %v2701_v47 = vpop.f32.mrb[31].mxu1 }
 0x5ab   : > { %v1516_v48 = vpop.f32.mrb[32].mxu1 }
 0x5ac   : > { %v1623_v49 = vmul.f32 0.17677669, %v1516_v48  ;;  %v2712_v50 = vpop.f32.mrb[33].mxu1 }
 0x5ad   : > { %v1519_v51 = vpop.f32.mrb[34].mxu1 }
 0x5ae   : > { %v2713_v52 = vpop.f32.mrb[35].mxu1  ;;  %v1629_v53 = vsel %vm555_vm2, %v1623_v49, -inf }
 0x5af   : > { %1630 = vmax.xlane.f32.xlu1 %v1629_v53 }
 0x5b3   : > { %v1616_v54 = vpop.f32.mrb[36].mxu1 }
 0x5b4   : > { %v1625_v55 = vmul.f32 0.17677669, %v1616_v54  ;;  %v2724_v57 = vpop.f32.mrb[37].mxu1 }
 0x5b5   : > { %v1619_v37 = vpop.f32.mrb[38].mxu1 }
 0x5b6   : > { %v1635_v59 = vsel %vm555_vm2, %v1625_v55, -inf  ;;  %v2725_v60 = vpop.f32.mrb[39].mxu1 }
 0x5b7   : > { %1636 = vmax.xlane.f32.xlu0 %v1635_v59 }
 0x5c0   : > { %1722 = vrot.lane.b32.xlu1 %v3212_v56, %s2921_s26 }
 0x5c4   : > { %1770 = vrot.lane.b32.xlu1 %v3219_v58, %s2921_s26 }
 0x5c8   : > { %1818 = vrot.lane.b32.xlu1 %v3224_v13, %s2921_s26 }
 0x608   : > { %v1628_v41 = vpop.xlane.xlu0 %1627 }
 0x609   : > { %v1638_v61 = vsub.f32 %v1622_v30, %v1628_v41 }
 0x60b   : > { %v1642_v62 = vmul.f32 1.442695, %v1638_v61 }
 0x60d   : > { %2861 = vpow2.f32 %v1642_v62 }
 0x617   : > { %v2862_v1 = vpop.eup %2861 }
 0x618   : > { %v1650_v2 = vsel %vm555_vm2, %v2862_v1, 0.0 }
 0x619   : > { %1651 = vadd.xlane.f32.xlu0 %v1650_v2 }
 0x62f   : > { %1674 = vrot.lane.b32.xlu0 %v3232_v63, %s2921_s26 }
 0x631   : > { %v1634_v3 = vpop.xlane.xlu0 %1633 }
 0x632   : > { %v1640_v6 = vsub.f32 %v1624_v38, %v1634_v3 }
 0x634   : > { %v1646_v10 = vmul.f32 1.442695, %v1640_v6 }
 0x636   : > { %2863 = vpow2.f32 %v1646_v10 }
 0x63c   : > { %v1631_v15 = vpop.xlane.xlu1 %1630 }
 0x63d   : > { %v1639_v21 = vsub.f32 %v1623_v49, %v1631_v15 }
 0x63f   : > { %v1644_v22 = vmul.f32 1.442695, %v1639_v21 }
 0x640   : > { %v1723_v25 = vpop.permute.xlu1 %1722  ;;  %v2864_v27 = vpop.eup %2863 }
 0x641   : > { %2865 = vpow2.f32 %v1644_v22  ;;  %v1728_v26 = vsel %vm608_vm3, %v1723_v25, 0  ;;  %v1656_v29 = vsel %vm555_vm2, %v2864_v27, 0.0 }
 0x642   : > { %2733 = vmatpush3.bf16.msra.mxu1 %v1728_v26 }
 0x643   : > { %2744 = vmatprep.subr.bf16.mxu1 %v2917_v12 }
 0x644   : > { %v1637_v30 = vpop.xlane.xlu0 %1636  ;;  %v1771_v24 = vpop.permute.xlu1 %1770 }
 0x645   : > { %v1641_v33 = vsub.f32 %v1625_v55, %v1637_v30 }
 0x647   : > { %v1648_v18 = vmul.f32 1.442695, %v1641_v33 }
 0x649   : > { %2867 = vpow2.f32 %v1648_v18 }
 0x64b   : > { %v2866_v23 = vpop.eup %2865 }
 0x64c   : > { %v1653_v28 = vsel %vm555_vm2, %v2866_v23, 0.0 }
 0x64d   : > { %1654 = vadd.xlane.f32.xlu1 %v1653_v28 }
 0x64e   : > { %1657 = vadd.xlane.f32.xlu0 %v1656_v29 }
 0x653   : > { %v2868_v34 = vpop.eup %2867 }
 0x654   : > { %v1659_v36 = vsel %vm555_vm2, %v2868_v34, 0.0 }
 0x65e   : > { %1922 = vrot.lane.b32.xlu1 %v3080_v8, %s2922_s27 }
 0x664   : > { %1872 = vrot.lane.b32.xlu0 %v3102_v16, %s2922_s27 }
 0x668   : > { %1870 = vrot.lane.b32.xlu0 %v3085_v9, %s2922_s27 }
 0x66c   : > { %1920 = vrot.lane.b32.xlu0 %v3111_v19, %s2922_s27 }
 0x670   : > { %1970 = vrot.lane.b32.xlu0 %v3121_v20, %s2922_s27 }
 0x682   : > { %1660 = vadd.xlane.f32.xlu1 %v1659_v36 }
 0x693   : > { %1972 = vrot.lane.b32.xlu1 %v3132_v31, %s2922_s27  ;;  %v1776_v31 = vsel %vm608_vm3, %v1771_v24, 0 }
 0x697   : > { %2022 = vrot.lane.b32.xlu1 %v3137_v32, %s2922_s27  ;;  %v1819_v32 = vpop.permute.xlu1 %1818 }
 0x698   : > { %v1824_v50 = vsel %vm608_vm3, %v1819_v32, 0 }
 0x69b   : > { %2020 = vrot.lane.b32.xlu1 %v3144_v17, %s2922_s27 }
 0x6a6   : > { %v1652_v8 = vpop.xlane.xlu0 %1651 }
 0x6a7   : > { %2869 = vrcp.f32 %v1652_v8 }
 0x6aa   : > { %v1675_v9 = vpop.permute.xlu0 %1674 }
 0x6ab   : > { %v1680_v16 = vsel %vm608_vm3, %v1675_v9, 0 }
 0x6ac   : > { %2727 = vmatpush3.bf16.msra.mxu0 %v1680_v16 }
 0x6ad   : > { %2738 = vmatprep.subr.bf16.mxu0 %v2917_v12 }
 0x6b1   : > { %v2870_v19 = vpop.eup %2869 }
 0x6b2   : > { %v1666_v20 = vmul.f32 %v2870_v19, %v2862_v1 }
 0x6b4   : > { %v1670_v38 = vpack.c.bf16 %v1666_v20, %v1666_v20 }
 0x6b6   : > { %2729 = vmatmul.mubr.msk.bf16.vlgmr.msra.gmra.mrb[40].mxu0 %vm604_vm4, %v1670_v38 }
 0x6b7   : > { %2739 = vmatpush3.bf16.msra.mxu0 %v1776_v31  ;;  %2740 = vmatprep.mubr.msk.bf16.mxu0 %vm2918_vm1, %v2917_v12 }
 0x6b8   : > { %2750 = vmatprep.subr.bf16.mxu0 %v2917_v12 }
 0x6da   : > { %v1655_v17 = vpop.xlane.xlu1 %1654 }
 0x6db   : > { %2871 = vrcp.f32 %v1655_v17  ;;  %v1658_v39 = vpop.xlane.xlu0 %1657 }
 0x6dc   : > { %2873 = vrcp.f32 %v1658_v39 }
 0x6de   : > { %v1923_v52 = vpop.permute.xlu1 %1922 }
 0x6df   : > { %v1873_v45 = vpop.permute.xlu0 %1872  ;;  %v1928_v61 = vsel %vm366_vm0, %v1923_v52, 0 }
 0x6e0   : > { %v1878_v48 = vsel %vm366_vm0, %v1873_v45, 0 }
 0x6e3   : > { %v1871_v51 = vpop.permute.xlu0 %1870 }
 0x6e5   : > { %v2872_v40 = vpop.eup %2871 }
 0x6e6   : > { %v2874_v43 = vpop.eup %2873  ;;  %v1667_v44 = vmul.f32 %v2872_v40, %v2866_v23 }
 0x6e7   : > { %v1668_v46 = vmul.f32 %v2874_v43, %v2864_v27  ;;  %v1921_v55 = vpop.permute.xlu0 %1920 }
 0x6e8   : > { %v1671_v47 = vpack.c.bf16 %v1667_v44, %v1667_v44 }
 0x6e9   : > { %v1672_v49 = vpack.c.bf16 %v1668_v46, %v1668_v46 }
 0x6ea   : > { %2735 = vmatmul.mubr.msk.bf16.vlgmr.msra.gmra.mrb[40].mxu1 %vm604_vm4, %v1671_v47 }
 0x6eb   : > { %2741 = vmatmul.mubr.msk.bf16.vlgmr.msra.gmra.mrb[44].mxu0 %vm604_vm4, %v1672_v49  ;;  %2745 = vmatpush3.bf16.msra.mxu1 %v1824_v50  ;;  %v1971_v37 = vpop.permute.xlu0 %1970 }
 0x6ec   : > { %2751 = vmatpush3.bf16.xpose.msra.mxu0 %v1878_v48  ;;  %2752 = vmatprep.mubr.msk.bf16.mxu0 %vm2918_vm1, %v2917_v12 }
 0x6ed   : > { %2762 = vmatprep.subr.bf16.mxu0 %v2917_v12  ;;  %2746 = vmatprep.mubr.msk.bf16.mxu1 %vm2918_vm1, %v2917_v12 }
 0x6ee   : > { %2756 = vmatprep.subr.bf16.mxu1 %v2917_v12 }
 0x6f3   : > { %2753 = vmatmul.mubr.msk.bf16.vlgmr.msra.gmra.mrb[48].mxu0 %vm366_vm0, %v1871_v51 }
 0x6f4   : > { %2764 = vmatprep.mubr.msk.bf16.mxu0 %vm2918_vm1, %v2917_v12 }
 0x70f   : > { %v1661_v53 = vpop.xlane.xlu1 %1660 }
 0x710   : > { %2875 = vrcp.f32 %v1661_v53 }
 0x713   : > { %v1973_v54 = vpop.permute.xlu1 %1972 }
 0x714   : > { %v1978_v57 = vsel %vm366_vm0, %v1973_v54, 0 }
 0x715   : > { %2763 = vmatpush3.bf16.xpose.msra.mxu0 %v1978_v57 }
 0x716   : > { %2774 = vmatprep.subr.bf16.mxu0 %v2917_v12 }
 0x717   : > { %v2023_v62 = vpop.permute.xlu1 %2022 }
 0x718   : > { %v2028_v1 = vsel %vm366_vm0, %v2023_v62, 0 }
 0x71a   : > { %v2876_v59 = vpop.eup %2875 }
 0x71b   : > { %v1669_v60 = vmul.f32 %v2876_v59, %v2868_v34  ;;  %v2021_v2 = vpop.permute.xlu1 %2020 }
 0x71c   : > { %2765 = vmatmul.mubr.msk.bf16.vlgmr.msra.gmra.mrb[52].mxu0 %vm366_vm0, %v1971_v37 }
 0x71d   : > { %v1673_v41 = vpack.c.bf16 %v1669_v60, %v1669_v60  ;;  %2776 = vmatprep.mubr.msk.bf16.mxu0 %vm2918_vm1, %v2917_v12 }
 0x71f   : > { %2747 = vmatmul.mubr.msk.bf16.vlgmr.msra.gmra.mrb[44].mxu1 %vm604_vm4, %v1673_v41 }
 0x720   : > { %2757 = vmatpush3.bf16.xpose.msra.mxu1 %v1928_v61  ;;  %2758 = vmatprep.mubr.msk.bf16.mxu1 %vm2918_vm1, %v2917_v12 }
 0x721   : > { %2768 = vmatprep.subr.bf16.mxu1 %v2917_v12 }
 0x727   : > { %2759 = vmatmul.mubr.msk.bf16.vlgmr.msra.gmra.mrb[48].mxu1 %vm366_vm0, %v1921_v55 }
 0x728   : > { %2769 = vmatpush3.bf16.xpose.msra.mxu1 %v2028_v1  ;;  %2770 = vmatprep.mubr.msk.bf16.mxu1 %vm2918_vm1, %v2917_v12 }
 0x729   : > { %2780 = vmatprep.subr.bf16.mxu1 %v2917_v12 }
 0x72f   : > { %2771 = vmatmul.mubr.msk.bf16.vlgmr.msra.gmra.mrb[52].mxu1 %vm366_vm0, %v2021_v2 }
 0x730   : > { %2782 = vmatprep.mubr.msk.bf16.mxu1 %vm2918_vm1, %v2917_v12 }
 0x789   : > { %v3375_v3 = vpop.f32.mrb[40].mxu0 }
 0x78a   : > { %v2730_v6 = vpop.f32.mrb[41].mxu0 }
 0x78b   : > { %v1719_v10 = vpop.f32.mrb[42].mxu0 }
 0x78c   : > { %v2731_v15 = vpop.f32.mrb[43].mxu0 }
 0x7bd   : > { %v3377_v21 = vpop.f32.mrb[40].mxu1 }
 0x7be   : > { %v3379_v22 = vpop.f32.mrb[44].mxu0  ;;  %v2736_v25 = vpop.f32.mrb[41].mxu1 }
 0x7bf   : > { %v2742_v26 = vpop.f32.mrb[45].mxu0  ;;  %v1767_v27 = vpop.f32.mrb[42].mxu1 }
 0x7c0   : > { %v1815_v23 = vpop.f32.mrb[46].mxu0  ;;  %v2737_v28 = vpop.f32.mrb[43].mxu1  ;;  %v1418_v26 = vpack.c.bf16 %v3295_v7, %v3295_v7  ;;  %v1866_v27 = vpack.c.bf16 %v3375_v3, %v3375_v3 }
 0x7c1   : > { %v2743_v29 = vpop.f32.mrb[47].mxu0  ;;  %v1867_v23 = vpack.c.bf16 %v3377_v21, %v3377_v21  ;;  %v1868_v21 = vpack.c.bf16 %v3379_v22, %v3379_v22 }
 0x7c6   : > { %v1914_v30 = vpop.f32.mrb[48].mxu0 }
 0x7c7   : > { %v2070_v33 = vmul.f32 0.17677669, %v1914_v30  ;;  %v2754_v18 = vpop.f32.mrb[49].mxu0 }
 0x7c8   : > { %v1917_v34 = vpop.f32.mrb[50].mxu0 }
 0x7c9   : > { %v2074_v36 = vsel %vm555_vm2, %v2070_v33, -inf  ;;  %v2755_v8 = vpop.f32.mrb[51].mxu0 }
 0x7ca   : > { %2075 = vmax.xlane.f32.xlu0 %v2074_v36 }
 0x7ef   : > { %v2014_v9 = vpop.f32.mrb[52].mxu0 }
 0x7f0   : > { %v2072_v16 = vmul.f32 0.17677669, %v2014_v9  ;;  %v2766_v19 = vpop.f32.mrb[53].mxu0 }
 0x7f1   : > { %v2017_v20 = vpop.f32.mrb[54].mxu0 }
 0x7f2   : > { %v3382_v24 = vpop.f32.mrb[44].mxu1  ;;  %v2080_v38 = vsel %vm555_vm2, %v2072_v16, -inf  ;;  %v2767_v31 = vpop.f32.mrb[55].mxu0 }
 0x7f3   : > { %v2748_v32 = vpop.f32.mrb[45].mxu1  ;;  %2081 = vmax.xlane.f32.xlu0 %v2080_v38  ;;  %v1869_v30 = vpack.c.bf16 %v3382_v24, %v3382_v24 }
 0x7f4   : > { %v1863_v17 = vpop.f32.mrb[46].mxu1 }
 0x7f5   : > { %v2749_v39 = vpop.f32.mrb[47].mxu1 }
 0x7fa   : > { %v1964_v40 = vpop.f32.mrb[48].mxu1 }
 0x7fb   : > { %v2071_v43 = vmul.f32 0.17677669, %v1964_v40  ;;  %v2760_v44 = vpop.f32.mrb[49].mxu1 }
 0x7fc   : > { %v1967_v45 = vpop.f32.mrb[50].mxu1 }
 0x7fd   : > { %v2761_v46 = vpop.f32.mrb[51].mxu1  ;;  %v2077_v47 = vsel %vm555_vm2, %v2071_v43, -inf }
 0x7fe   : > { %2078 = vmax.xlane.f32.xlu1 %v2077_v47 }
 0x802   : > { %v2064_v48 = vpop.f32.mrb[52].mxu1 }
 0x803   : > { %v2073_v49 = vmul.f32 0.17677669, %v2064_v48  ;;  %v2772_v50 = vpop.f32.mrb[53].mxu1 }
 0x804   : > { %v2067_v51 = vpop.f32.mrb[54].mxu1 }
 0x805   : > { %v2083_v52 = vsel %vm555_vm2, %v2073_v49, -inf  ;;  %v2773_v53 = vpop.f32.mrb[55].mxu1 }
 0x806   : > { %2084 = vmax.xlane.f32.xlu0 %v2083_v52 }
 0x857   : > { %v2076_v54 = vpop.xlane.xlu0 %2075 }
 0x858   : > { %v2086_v55 = vsub.f32 %v2070_v33, %v2076_v54 }
 0x85a   : > { %v2090_v57 = vmul.f32 1.442695, %v2086_v55 }
 0x85c   : > { %2877 = vpow2.f32 %v2090_v57 }
 0x866   : > { %v2878_v37 = vpop.eup %2877 }
 0x867   : > { %v2098_v59 = vsel %vm555_vm2, %v2878_v37, 0.0 }
 0x868   : > { %2099 = vadd.xlane.f32.xlu0 %v2098_v59 }
 0x880   : > { %v2082_v60 = vpop.xlane.xlu0 %2081 }
 0x881   : > { %v2088_v41 = vsub.f32 %v2072_v16, %v2082_v60 }
 0x883   : > { %v2094_v61 = vmul.f32 1.442695, %v2088_v41 }
 0x885   : > { %2879 = vpow2.f32 %v2094_v61 }
 0x88b   : > { %v2079_v62 = vpop.xlane.xlu1 %2078 }
 0x88c   : > { %v2087_v1 = vsub.f32 %v2071_v43, %v2079_v62 }
 0x88e   : > { %v2092_v2 = vmul.f32 1.442695, %v2087_v1 }
 0x88f   : > { %v2880_v6 = vpop.eup %2879 }
 0x890   : > { %2881 = vpow2.f32 %v2092_v2  ;;  %v2104_v10 = vsel %vm555_vm2, %v2880_v6, 0.0 }
 0x891   : > { %2105 = vadd.xlane.f32.xlu0 %v2104_v10 }
 0x893   : > { %v2085_v7 = vpop.xlane.xlu0 %2084 }
 0x894   : > { %v2089_v3 = vsub.f32 %v2073_v49, %v2085_v7 }
 0x896   : > { %v2096_v28 = vmul.f32 1.442695, %v2089_v3 }
 0x898   : > { %2883 = vpow2.f32 %v2096_v28 }
 0x89a   : > { %v2882_v15 = vpop.eup %2881 }
 0x89b   : > { %v2101_v25 = vsel %vm555_vm2, %v2882_v15, 0.0 }
 0x89c   : > { %2102 = vadd.xlane.f32.xlu1 %v2101_v25 }
 0x8a7   : > { %2122 = vrot.lane.b32.xlu0 %v3232_v63, %s2922_s27  ;;  %v1421_v63 = vpack.c.bf16 %v3302_v42, %v3302_v42  ;;  %v1420_v42 = vpack.c.bf16 %v3299_v5, %v3299_v5 }
 0x8ab   : > { %2322 = vrot.lane.b32.xlu0 %v1418_v26, %s2922_s27 }
 0x8ad   : > { %2170 = vrot.lane.b32.xlu1 %v3212_v56, %s2922_s27  ;;  %v2884_v56 = vpop.eup %2883 }
 0x8ae   : > { %v2107_v29 = vsel %vm555_vm2, %v2884_v56, 0.0 }
 0x8af   : > { %2334 = vrot.lane.b32.xlu0 %v1866_v27, %s2921_s26 }
 0x8b1   : > { %2218 = vrot.lane.b32.xlu1 %v3219_v58, %s2922_s27  ;;  %v1419_v58 = vpack.c.bf16 %v3297_v11, %v3297_v11 }
 0x8b3   : > { %2336 = vrot.lane.b32.xlu0 %v1867_v23, %s2921_s26  ;;  %v790_v23 = vpack.c.bf16 %v3195_v0, %v3195_v0 }
 0x8b7   : > { %2328 = vrot.lane.b32.xlu0 %v1421_v63, %s2922_s27 }
 0x8d5   : > { %2108 = vadd.xlane.f32.xlu1 %v2107_v29 }
 0x8e6   : > { %2266 = vrot.lane.b32.xlu1 %v3224_v13, %s2922_s27 }
 0x8ea   : > { %2324 = vrot.lane.b32.xlu1 %v1419_v58, %s2922_s27  ;;  %v791_v58 = vpack.c.bf16 %v3197_v4, %v3197_v4  ;;  %v793_v4 = vpack.c.bf16 %v3202_v35, %v3202_v35 }
 0x8ee   : > { %2326 = vrot.lane.b32.xlu1 %v1420_v42, %s2922_s27 }
 0x8f2   : > { %2338 = vrot.lane.b32.xlu1 %v1868_v21, %s2921_s26 }
 0x8f5   : > { %v2100_v13 = vpop.xlane.xlu0 %2099 }
 0x8f6   : > { %2340 = vrot.lane.b32.xlu1 %v1869_v30, %s2921_s26  ;;  %2885 = vrcp.f32 %v2100_v13  ;;  %v792_v13 = vpack.c.bf16 %v3199_v14, %v3199_v14 }
 0x900   : > { %v2886_v11 = vpop.eup %2885 }
 0x901   : > { %v2114_v18 = vmul.f32 %v2886_v11, %v2878_v37 }
 0x903   : > { %v2118_v36 = vpack.c.bf16 %v2114_v18, %v2114_v18 }
 0x91e   : > { %v2106_v33 = vpop.xlane.xlu0 %2105 }
 0x91f   : > { %2887 = vrcp.f32 %v2106_v33 }
 0x922   : > { %v2123_v34 = vpop.permute.xlu0 %2122 }
 0x923   : > { %v2128_v5 = vsel %vm608_vm3, %v2123_v34, 0 }
 0x924   : > { %2775 = vmatpush3.bf16.msra.mxu0 %v2128_v5 }
 0x925   : > { %2786 = vmatprep.subr.bf16.mxu0 %v2917_v12 }
 0x926   : > { %v2323_v26 = vpop.permute.xlu0 %2322 }
 0x927   : > { %2777 = vmatmul.mubr.msk.bf16.vlgmr.msra.gmra.mrb[56].mxu0 %vm604_vm4, %v2118_v36  ;;  %v2356_v7 = vsel %vm366_vm0, %v790_v23, %v2323_v26 }
 0x928   : > { %2788 = vmatprep.mubr.msk.bf16.mxu0 %vm2918_vm1, %v2917_v12 }
 0x929   : > { %v2103_v22 = vpop.xlane.xlu1 %2102  ;;  %v2888_v8 = vpop.eup %2887 }
 0x92a   : > { %2889 = vrcp.f32 %v2103_v22  ;;  %v2116_v19 = vmul.f32 %v2888_v8, %v2880_v6  ;;  %v2335_v63 = vpop.permute.xlu0 %2334 }
 0x92b   : > { %v2368_v3 = vsel %vm2366_vm5, %v2356_v7, %v2335_v63 }
 0x92c   : > { %v2120_v31 = vpack.c.bf16 %v2116_v19, %v2116_v19 }
 0x92d   : > { %v2171_v9 = vpop.permute.xlu1 %2170 }
 0x92e   : > { %v2176_v16 = vsel %vm608_vm3, %v2171_v9, 0  ;;  %v2337_v29 = vpop.permute.xlu0 %2336 }
 0x92f   : > { %2781 = vmatpush3.bf16.msra.mxu1 %v2176_v16 }
 0x930   : > { %2792 = vmatprep.subr.bf16.mxu1 %v2917_v12 }
 0x931   : > { %v2219_v20 = vpop.permute.xlu1 %2218 }
 0x932   : > { %v2224_v24 = vsel %vm608_vm3, %v2219_v20, 0  ;;  %v2329_v0 = vpop.permute.xlu0 %2328 }
 0x933   : > { %2787 = vmatpush3.bf16.msra.mxu0 %v2224_v24  ;;  %v2365_v36 = vsel %vm366_vm0, %v793_v4, %v2329_v0 }
 0x934   : > { %v2890_v38 = vpop.eup %2889 }
 0x935   : > { %v2115_v32 = vmul.f32 %v2890_v38, %v2882_v15 }
 0x936   : > { %2789 = vmatmul.mubr.msk.bf16.vlgmr.msra.gmra.mrb[60].mxu0 %vm604_vm4, %v2120_v31 }
 0x937   : > { %v2119_v17 = vpack.c.bf16 %v2115_v32, %v2115_v32 }
 0x939   : > { %2783 = vmatmul.mubr.msk.bf16.vlgmr.msra.gmra.mrb[56].mxu1 %vm604_vm4, %v2119_v17 }
 0x93a   : > { %2794 = vmatprep.mubr.msk.bf16.mxu1 %vm2918_vm1, %v2917_v12 }
 0x962   : > { %v2109_v39 = vpop.xlane.xlu1 %2108 }
 0x963   : > { %2891 = vrcp.f32 %v2109_v39 }
 0x966   : > { %v2267_v40 = vpop.permute.xlu1 %2266 }
 0x967   : > { %v2272_v43 = vsel %vm608_vm3, %v2267_v40, 0 }
 0x968   : > { %2793 = vmatpush3.bf16.msra.mxu1 %v2272_v43 }
 0x96a   : > { %v2325_v10 = vpop.permute.xlu1 %2324 }
 0x96b   : > { %v2359_v42 = vsel %vm366_vm0, %v791_v58, %v2325_v10 }
 0x96c   : > { %v2370_v21 = vsel %vm2366_vm5, %v2359_v42, %v2337_v29 }
 0x96d   : > { %v2892_v44 = vpop.eup %2891 }
 0x96e   : > { %v2117_v45 = vmul.f32 %v2892_v44, %v2884_v56  ;;  %v2327_v15 = vpop.permute.xlu1 %2326 }
 0x96f   : > { %v2362_v33 = vsel %vm366_vm0, %v792_v13, %v2327_v15 }
 0x970   : > { %v2121_v46 = vpack.c.bf16 %v2117_v45, %v2117_v45 }
 0x972   : > { %2795 = vmatmul.mubr.msk.bf16.vlgmr.msra.gmra.mrb[60].mxu1 %vm604_vm4, %v2121_v46  ;;  %v2339_v25 = vpop.permute.xlu1 %2338 }
 0x973   : > { %v2372_v18 = vsel %vm2366_vm5, %v2362_v33, %v2339_v25 }
 0x976   : > { %v2341_v27 = vpop.permute.xlu1 %2340 }
 0x977   : > { %v2374_v22 = vsel %vm2366_vm5, %v2365_v36, %v2341_v27 }
 0x9fa   : > { %v2164_v47 = vpop.f32.mrb[56].mxu0 }
 0x9fb   : > { %v2314_v48 = vpack.c.bf16 %v2164_v47, %v2164_v47  ;;  %v2778_v49 = vpop.f32.mrb[57].mxu0 }
 0x9fc   : > { %v2167_v50 = vpop.f32.mrb[58].mxu0 }
 0x9fd   : > { %2346 = vrot.lane.b32.xlu1 %v2314_v48, %s2920_s24  ;;  %v2779_v51 = vpop.f32.mrb[59].mxu0 }
 0xa09   : > { %v2260_v52 = vpop.f32.mrb[60].mxu0 }
 0xa0a   : > { %v2790_v12 = vpop.f32.mrb[61].mxu0  ;;  %v2316_v41 = vpack.c.bf16 %v2260_v52, %v2260_v52 }
 0xa0b   : > { %v2263_v53 = vpop.f32.mrb[62].mxu0 }
 0xa0c   : > { %v2212_v54 = vpop.f32.mrb[56].mxu1  ;;  %v2791_v55 = vpop.f32.mrb[63].mxu0 }
 0xa0d   : > { %v2315_v57 = vpack.c.bf16 %v2212_v54, %v2212_v54  ;;  %v2784_v37 = vpop.f32.mrb[57].mxu1 }
 0xa0e   : > { %v2215_v59 = vpop.f32.mrb[58].mxu1 }
 0xa0f   : > { %v2785_v60 = vpop.f32.mrb[59].mxu1  ;;  %2348 = vrot.lane.b32.xlu0 %v2315_v57, %s2920_s24 }
 0xa13   : > { %2350 = vrot.lane.b32.xlu0 %v2316_v41, %s2920_s24 }
 0xa45   : > { %v2308_v61 = vpop.f32.mrb[60].mxu1 }
 0xa46   : > { %v2317_v62 = vpack.c.bf16 %v2308_v61, %v2308_v61  ;;  %v2796_v1 = vpop.f32.mrb[61].mxu1 }
 0xa47   : > { %v2311_v2 = vpop.f32.mrb[62].mxu1 }
 0xa48   : > { %v2797_v6 = vpop.f32.mrb[63].mxu1  ;;  %2352 = vrot.lane.b32.xlu1 %v2317_v62, %s2920_s24 }
 0xa6f   : > { %v2347_v28 = vpop.permute.xlu1 %2346 }
 0xa70   : > { %v2377_v56 = vsel %vm2375_vm6, %v2368_v3, %v2347_v28 }
 0xa71   : > { %2388 = vst [vmem:[%s351_s4] sm:$0x1] %v2377_v56 }
 0xa81   : > { %v2349_v30 = vpop.permute.xlu0 %2348 }
 0xa82   : > { %v2380_v11 = vsel %vm2375_vm6, %v2370_v21, %v2349_v30 }
 0xa83   : > { %2389 = vst [vmem:[%s351_s4 + $0x1] sm:$0x1] %v2380_v11 }
 0xa85   : > { %v2351_v34 = vpop.permute.xlu0 %2350 }
 0xa86   : > { %v2383_v5 = vsel %vm2375_vm6, %v2372_v18, %v2351_v34 }
 0xa87   : > { %2390 = vst [vmem:[%s351_s4 + $0x2] sm:$0x1] %v2383_v5 }
 0xaba   : > { %v2353_v8 = vpop.permute.xlu1 %2352 }
 0xabb   : > { %v2386_v14 = vsel %vm2375_vm6, %v2374_v22, %v2353_v8 }
 0xabc   : > { %2391 = vst [vmem:[%s351_s4 + $0x3] sm:$0x1] %v2386_v14 }
 0xabd PF: > { %p10_p9 = scmp.ge.s32.totalorder %s2960_s16, 4   ;;  %s3481_s12 = smov %s2911_s13 }
 0xabe   : > { %s3482_s13 = smov %s2969_s19  ;;  %s3483_s14 = smov %s2960_s16 }
 0xabf   :  { %12 = sbr.rel (!%p10_p9) target bundleno = 2 (0x2), region = 185 }

// kernel: timesformer_forward.32
= control target key start
LH: loop header
LB: loop body
LE: loop exit
PB: predicated region body
PF: predicated region fallthrough
CT: control target
= control target key end

     0   :  { %s155_s0 = inlined_call_operand.vmem [shape: bf16[24,128], index: 0, kind: input, shape index: {}]   ;;  %s156_s1 = inlined_call_operand.vmem [shape: f32[1,128], index: 1, kind: input, shape index: {}]   ;;  %s157_s2 = inlined_call_operand.vmem [shape: f32[1,128], index: 2, kind: input, shape index: {}]   ;;  %s158_s3 = inlined_call_operand.vmem [shape: bf16[24,128], index: 3, kind: output, shape index: {}]  }
   0x1   :  { %v103_v0 = vld [vmem:[%s155_s0] sm:$0xff]   ;;  %v16_v1 = vld [vmem:[%s155_s0 + $0x8] sm:$0xf] }
   0x2   :  { %v104_v2 = vunpack.c.l.bf16 %v103_v0  ;;  %v19_v3 = vunpack.c.l.bf16 %v16_v1  ;;  %v105_v4 = vunpack.c.h.bf16 %v103_v0  ;;  %v94_v28 = vld [vmem:[%s156_s1] ss:$0 sm:$0xff] }
   0x3   :  { %v95_v34 = vld [vmem:[%s157_s2] ss:$0 sm:$0xff] }
   0x4   :  { %20 = vadd.xlane.f32.xlu0 %v104_v2  ;;  %24 = vadd.xlane.f32.xlu1 %v19_v3 }
   0x8   :  { %22 = vadd.xlane.f32.xlu0 %v105_v4 }
  0x91   :  { %v21_v5 = vpop.xlane.xlu0 %20  ;;  %v25_v6 = vpop.xlane.xlu1 %24 }
  0x92   :  { %v27_v7 = vmul.f32 0.0078125, %v21_v5  ;;  %v29_v8 = vmul.f32 0.0078125, %v25_v6 }
  0x94   :  { %v30_v9 = vsub.f32 %v104_v2, %v27_v7  ;;  %v32_v10 = vsub.f32 %v19_v3, %v29_v8 }
  0x95   :  { %v23_v11 = vpop.xlane.xlu0 %22 }
  0x96   :  { %v28_v12 = vmul.f32 0.0078125, %v23_v11  ;;  %v33_v13 = vmul.f32 %v30_v9, %v30_v9  ;;  %v35_v15 = vmul.f32 %v32_v10, %v32_v10 }
  0x98   :  { %v31_v14 = vsub.f32 %v105_v4, %v28_v12  ;;  %36 = vadd.xlane.f32.xlu1 %v33_v13 }
  0x9a   :  { %v34_v16 = vmul.f32 %v31_v14, %v31_v14 }
  0x9c   :  { %40 = vadd.xlane.f32.xlu1 %v35_v15  ;;  %38 = vadd.xlane.f32.xlu0 %v34_v16 }
 0x125   :  { %v37_v17 = vpop.xlane.xlu1 %36 }
 0x126   :  { %v42_v18 = vmul.f32 0.0078125, %v37_v17 }
 0x128   :  { %v45_v19 = vadd.f32 1e-06, %v42_v18 }
 0x129   :  { %v41_v20 = vpop.xlane.xlu1 %40  ;;  %v39_v21 = vpop.xlane.xlu0 %38 }
 0x12a   :  { %111 = vrsqrt.f32 %v45_v19  ;;  %v44_v22 = vmul.f32 0.0078125, %v41_v20  ;;  %v43_v23 = vmul.f32 0.0078125, %v39_v21 }
 0x12c   :  { %v47_v24 = vadd.f32 1e-06, %v44_v22  ;;  %v46_v25 = vadd.f32 1e-06, %v43_v23 }
 0x12e   :  { %113 = vrsqrt.f32 %v47_v24 }
 0x12f   :  { %115 = vrsqrt.f32 %v46_v25 }
 0x134   :  { %v112_v26 = vpop.eup %111 }
 0x135   :  { %v51_v27 = vmul.f32 %v112_v26, %v30_v9 }
 0x137   :  { %v61_v32 = vmul.f32 %v94_v28, %v51_v27 }
 0x138   :  { %v114_v29 = vpop.eup %113 }
 0x139   :  { %v116_v30 = vpop.eup %115  ;;  %v53_v31 = vmul.f32 %v114_v29, %v32_v10  ;;  %v71_v38 = vadd.f32 %v95_v34, %v61_v32 }
 0x13a   :  { %v52_v33 = vmul.f32 %v116_v30, %v31_v14 }
 0x13b   :  { %v63_v35 = vmul.f32 %v94_v28, %v53_v31 }
 0x13c   :  { %v62_v36 = vmul.f32 %v94_v28, %v52_v33 }
 0x13d   :  { %v73_v37 = vadd.f32 %v95_v34, %v63_v35 }
 0x13e   :  { %v72_v39 = vadd.f32 %v95_v34, %v62_v36 }
 0x13f   :  { %v101_v40 = vpack.c.bf16 %v73_v37, %v73_v37 }
 0x140   :  { %v109_v41 = vpack.c.bf16 %v72_v39, %v71_v38 }
 0x141   :  { %89 = vst [vmem:[%s158_s3 + $0x8] sm:$0xf] %v101_v40 }
 0x142   :  { %110 = vst [vmem:[%s158_s3] sm:$0xff] %v109_v41  }

// kernel: timesformer_forward.33
= control target key start
LH: loop header
LB: loop body
LE: loop exit
PB: predicated region body
PF: predicated region fallthrough
CT: control target
= control target key end

     0   :  { %v450_v1 = vmov 0   ;;  %v52_v27 = vlaneseq  ;;  %s570_s1 = inlined_call_operand.vmem [shape: bf16[128,384], index: 1, kind: input, shape index: {}]   ;;  %s571_s0 = inlined_call_operand.vmem [shape: bf16[24,128], index: 0, kind: input, shape index: {}]   ;;  %s572_s2 = inlined_call_operand.vmem [shape: f32[1,384], index: 2, kind: input, shape index: {}]   ;;  %s573_s3 = inlined_call_operand.vmem [shape: bf16[24,384], index: 3, kind: output, shape index: {}]  }
   0x1   :  { %v416_v0 = vld [vmem:[%s570_s1 + $0x4] ss:$12 sps:$4 sm:$0xff]   ;;  %237 = vmatprep.mubr.bf16.mxu0 %v450_v1  ;;  %v418_v2 = vld [vmem:[%s570_s1] ss:$12 sps:$4 sm:$0xff]   ;;  %v419_v3 = vld [vmem:[%s570_s1 + $0x8] ss:$12 sps:$4 sm:$0xff]  }
   0x2   :  { %205 = vmatprep.subr.bf16.mxu0 %v416_v0  ;;  %v420_v4 = vld [vmem:[%s570_s1 + $0x1c] ss:$12 sps:$4 sm:$0xff]   ;;  %v422_v5 = vld [vmem:[%s570_s1 + $0x18] ss:$12 sps:$4 sm:$0xff]   ;;  %395 = vmatprep.subr.bf16.mxu1 %v419_v3  ;;  %v423_v6 = vld [vmem:[%s570_s1 + $0x20] ss:$12 sps:$4 sm:$0xff]  }
   0x3   :  { %206 = vmatpush1.bf16.msra.mxu0 %v418_v2  ;;  %396 = vmatpush3.bf16.msra.mxu1 %v419_v3  ;;  %v424_v7 = vld [vmem:[%s570_s1 + $0x34] ss:$12 sps:$4 sm:$0xff]   ;;  %v427_v8 = vld [vmem:[%s570_s1 + $0x38] ss:$12 sps:$4 sm:$0xff]   ;;  %v426_v9 = vld [vmem:[%s570_s1 + $0x30] ss:$12 sps:$4 sm:$0xff]  }
   0x4   :  { %207 = vmatprep.subr.bf16.mxu0 %v420_v4  ;;  %397 = vmatprep.subr.bf16.mxu1 %v423_v6  ;;  %v428_v10 = vld [vmem:[%s570_s1 + $0x4c] ss:$12 sps:$4 sm:$0xff]   ;;  %v431_v11 = vld [vmem:[%s570_s1 + $0x50] ss:$12 sps:$4 sm:$0xff]   ;;  %v430_v12 = vld [vmem:[%s570_s1 + $0x48] ss:$12 sps:$4 sm:$0xff]  }
   0x5   :  { %v432_v13 = vld [vmem:[%s570_s1 + $0x64] ss:$12 sps:$4 sm:$0xff]   ;;  %v435_v14 = vld [vmem:[%s570_s1 + $0x68] ss:$12 sps:$4 sm:$0xff]   ;;  %v434_v15 = vld [vmem:[%s570_s1 + $0x60] ss:$12 sps:$4 sm:$0xff]  }
   0x6   :  { %v436_v16 = vld [vmem:[%s570_s1 + $0x7c] ss:$12 sps:$4 sm:$0xff]   ;;  %v438_v17 = vld [vmem:[%s570_s1 + $0x78] ss:$12 sps:$4 sm:$0xff]   ;;  %v439_v18 = vld [vmem:[%s570_s1 + $0x80] ss:$12 sps:$4 sm:$0xff]  }
   0x7   :  { %208 = vmatpush1.bf16.msra.mxu0 %v422_v5  ;;  %398 = vmatpush3.bf16.msra.mxu1 %v423_v6  ;;  %v448_v19 = vld [vmem:[%s571_s0] sm:$0xff]   ;;  %v442_v22 = vld [vmem:[%s570_s1 + $0x90] ss:$12 sps:$4 sm:$0xff]   ;;  %v444_v23 = vld [vmem:[%s570_s1 + $0xac] ss:$12 sps:$4 sm:$0xff]   ;;  %v53_v28 = vshrl.u32 %v52_v27, 7 }
   0x8   :  { %209 = vmatprep.subr.bf16.mxu0 %v424_v7  ;;  %399 = vmatprep.subr.bf16.mxu1 %v427_v8  ;;  %v440_v20 = vld [vmem:[%s570_s1 + $0x94] ss:$12 sps:$4 sm:$0xff]   ;;  %v443_v21 = vld [vmem:[%s570_s1 + $0x98] ss:$12 sps:$4 sm:$0xff]   ;;  %v447_v24 = vld [vmem:[%s570_s1 + $0xb0] ss:$12 sps:$4 sm:$0xff]  }
   0x9   :  { %411 = vmatprep.mubr.bf16.mxu1 %v448_v19  ;;  %v446_v25 = vld [vmem:[%s570_s1 + $0xa8] ss:$12 sps:$4 sm:$0xff]   ;;  %v54_v29 = vsub.s32 0, %v53_v28  ;;  %v50_v30 = vld [vmem:[%s572_s2] sm:$0x7]  ;;  %v58_v31 = vsub.s32 1, %v53_v28 }
   0xa   :  { %v449_v26 = vld [vmem:[%s571_s0 + $0x8] ss:$0 sps:$4 sm:$0xff]   ;;  %v62_v32 = vsub.s32 2, %v53_v28 }
   0xb   :  { %210 = vmatpush1.bf16.msra.mxu0 %v426_v9  ;;  %400 = vmatpush3.bf16.msra.mxu1 %v427_v8  ;;  %v55_v33 = vrot.slane %v50_v30, %v54_v29  ;;  %v59_v34 = vrot.slane %v50_v30, %v58_v31 }
   0xc   :  { %211 = vmatprep.subr.bf16.mxu0 %v428_v10  ;;  %401 = vmatprep.subr.bf16.mxu1 %v431_v11  ;;  %v63_v35 = vrot.slane %v50_v30, %v62_v32 }
   0xf   :  { %212 = vmatpush1.bf16.msra.mxu0 %v430_v12  ;;  %402 = vmatpush3.bf16.msra.mxu1 %v431_v11 }
  0x10   :  { %213 = vmatprep.subr.bf16.mxu0 %v432_v13  ;;  %403 = vmatprep.subr.bf16.mxu1 %v435_v14 }
  0x13   :  { %214 = vmatpush1.bf16.msra.mxu0 %v434_v15  ;;  %404 = vmatpush3.bf16.msra.mxu1 %v435_v14 }
  0x14   :  { %215 = vmatprep.subr.bf16.mxu0 %v436_v16  ;;  %405 = vmatprep.subr.bf16.mxu1 %v439_v18 }
  0x17   :  { %216 = vmatpush1.bf16.msra.mxu0 %v438_v17  ;;  %406 = vmatpush3.bf16.msra.mxu1 %v439_v18 }
  0x18   :  { %217 = vmatprep.subr.bf16.mxu0 %v440_v20  ;;  %407 = vmatprep.subr.bf16.mxu1 %v443_v21 }
  0x1b   :  { %218 = vmatpush1.bf16.msra.mxu0 %v442_v22  ;;  %408 = vmatpush3.bf16.msra.mxu1 %v443_v21 }
  0x1c   :  { %219 = vmatprep.subr.bf16.mxu0 %v444_v23  ;;  %409 = vmatprep.subr.bf16.mxu1 %v447_v24 }
  0x1f   :  { %220 = vmatpush1.bf16.msra.mxu0 %v446_v25  ;;  %410 = vmatpush3.bf16.msra.mxu1 %v447_v24 }
  0x22   :  { %238 = vmatmul.mubr.bf16.vlgmr.msra.gmra.mrb[0].mxu0 %v448_v19  ;;  %412 = vmatmul.mubr.bf16.vlgmr.msra.gmra.mrb[0].mxu1 %v449_v26 }
  0x23   :  { %247 = vmatprep.mubr.bf16.mxu0 %v450_v1 }
  0x2a   :  { %248 = vmatmul.mubr.bf16.gmra.mrb[4].mxu0 %v449_v26 }
  0xf5   :  { %v239_v36 = vpop.f32.mrb[0].mxu0  ;;  %v413_v41 = vpop.f32.mrb[0].mxu1 }
  0xf6   :  { %v240_v37 = vadd.f32 %v239_v36, %v55_v33  ;;  %v241_v38 = vpop.f32.mrb[1].mxu0  ;;  %v299_v44 = vadd.f32 %v413_v41, %v63_v35  ;;  %v290_v45 = vpop.f32.mrb[1].mxu1 }
  0xf7   :  { %v242_v39 = vadd.f32 %v241_v38, %v59_v34  ;;  %v243_v40 = vpop.f32.mrb[2].mxu0  ;;  %v291_v48 = vadd.f32 %v290_v45, %v63_v35  ;;  %v414_v49 = vpop.f32.mrb[2].mxu1 }
  0xf8   :  { %v244_v42 = vadd.f32 %v243_v40, %v55_v33  ;;  %v245_v43 = vpop.f32.mrb[3].mxu0  ;;  %v384_v50 = vpack.c.bf16 %v299_v44, %v299_v44  ;;  %v293_v51 = vpop.f32.mrb[3].mxu1 }
  0xf9   :  { %v379_v46 = vpack.c.bf16 %v242_v39, %v240_v37  ;;  %v246_v47 = vadd.f32 %v245_v43, %v59_v34  ;;  %v380_v53 = vpack.c.bf16 %v291_v48, %v291_v48  ;;  %v294_v54 = vadd.f32 %v293_v51, %v63_v35 }
  0xfa   :  { %342 = vst [vmem:[%s573_s3 + $0x20] sm:$0xf] %v384_v50 }
  0xfb   :  { %337 = vst [vmem:[%s573_s3] sm:$0xff] %v379_v46  ;;  %v381_v52 = vpack.c.bf16 %v246_v47, %v244_v42  ;;  %338 = vst [vmem:[%s573_s3 + $0x8] sm:$0xf] %v380_v53  ;;  %v382_v55 = vpack.c.bf16 %v294_v54, %v294_v54 }
  0xfd   :  { %339 = vst [vmem:[%s573_s3 + $0xc] sm:$0xff] %v381_v52  ;;  %v249_v56 = vpop.f32.mrb[4].mxu0  ;;  %340 = vst [vmem:[%s573_s3 + $0x14] sm:$0xf] %v382_v55 }
  0xfe   :  { %v250_v57 = vadd.f32 %v249_v56, %v55_v33  ;;  %v251_v58 = vpop.f32.mrb[5].mxu0 }
  0xff   :  { %v252_v59 = vadd.f32 %v251_v58, %v59_v34  ;;  %v253_v60 = vpop.f32.mrb[6].mxu0 }
 0x100   :  { %v254_v61 = vpop.f32.mrb[7].mxu0 }
 0x101   :  { %v383_v62 = vpack.c.bf16 %v252_v59, %v250_v57 }
 0x103   :  { %341 = vst [vmem:[%s573_s3 + $0x18] sm:$0xff] %v383_v62 }

// kernel: timesformer_forward.35
= control target key start
LH: loop header
LB: loop body
LE: loop exit
PB: predicated region body
PF: predicated region fallthrough
CT: control target
= control target key end

     0   :  { %s288_s1 = inlined_call_operand.vmem [shape: bf16[128,128], index: 1, kind: input, shape index: {}]   ;;  %s289_s0 = inlined_call_operand.vmem [shape: bf16[24,128], index: 0, kind: input, shape index: {}]   ;;  %s290_s2 = inlined_call_operand.vmem [shape: f32[1,128], index: 2, kind: input, shape index: {}]   ;;  %s291_s3 = inlined_call_operand.vmem [shape: bf16[24,128], index: 3, kind: output, shape index: {}]  }
   0x1   :  { %v219_v0 = vld [vmem:[%s288_s1] sm:$0xff]   ;;  %v220_v1 = vld [vmem:[%s288_s1 + $0x8] sm:$0xff]   ;;  %v221_v2 = vld [vmem:[%s288_s1 + $0x10] sm:$0xff]  }
   0x2   :  { %199 = vmatprep.subr.bf16.mxu0 %v219_v0  ;;  %v222_v3 = vld [vmem:[%s288_s1 + $0x18] sm:$0xff]   ;;  %v227_v4 = vld [vmem:[%s289_s0] sm:$0xff]   ;;  %v224_v6 = vld [vmem:[%s288_s1 + $0x28] sm:$0xff]  }
   0x3   :  { %200 = vmatpush3.bf16.msra.mxu0 %v219_v0  ;;  %215 = vmatprep.mubr.bf16.mxu0 %v227_v4  ;;  %v223_v5 = vld [vmem:[%s288_s1 + $0x20] sm:$0xff]   ;;  %v225_v7 = vld [vmem:[%s288_s1 + $0x30] sm:$0xff]   ;;  %v226_v8 = vld [vmem:[%s288_s1 + $0x38] sm:$0xff]  }
   0x4   :  { %201 = vmatprep.subr.bf16.mxu0 %v220_v1  ;;  %v228_v9 = vld [vmem:[%s289_s0 + $0x8] ss:$0 sps:$4 sm:$0xff]   ;;  %v167_v10 = vld [vmem:[%s290_s2] ss:$0 sm:$0xff] }
   0x7   :  { %202 = vmatpush3.bf16.msra.mxu0 %v220_v1 }
   0x8   :  { %203 = vmatprep.subr.bf16.mxu0 %v221_v2 }
   0xb   :  { %204 = vmatpush3.bf16.msra.mxu0 %v221_v2 }
   0xc   :  { %205 = vmatprep.subr.bf16.mxu0 %v222_v3 }
   0xf   :  { %206 = vmatpush3.bf16.msra.mxu0 %v222_v3 }
  0x10   :  { %207 = vmatprep.subr.bf16.mxu0 %v223_v5 }
  0x13   :  { %208 = vmatpush3.bf16.msra.mxu0 %v223_v5 }
  0x14   :  { %209 = vmatprep.subr.bf16.mxu0 %v224_v6 }
  0x17   :  { %210 = vmatpush3.bf16.msra.mxu0 %v224_v6 }
  0x18   :  { %211 = vmatprep.subr.bf16.mxu0 %v225_v7 }
  0x1b   :  { %212 = vmatpush3.bf16.msra.mxu0 %v225_v7 }
  0x1c   :  { %213 = vmatprep.subr.bf16.mxu0 %v226_v8 }
  0x1f   :  { %214 = vmatpush3.bf16.msra.mxu0 %v226_v8 }
  0x22   :  { %216 = vmatmul.mubr.bf16.vlgmr.msra.gmra.mrb[0].mxu0 %v228_v9 }
  0xf5   :  { %v217_v11 = vpop.f32.mrb[0].mxu0 }
  0xf6   :  { %v142_v12 = vadd.f32 %v217_v11, %v167_v10  ;;  %v133_v13 = vpop.f32.mrb[1].mxu0 }
  0xf7   :  { %v218_v14 = vpop.f32.mrb[2].mxu0  ;;  %v134_v17 = vadd.f32 %v167_v10, %v133_v13 }
  0xf8   :  { %v183_v15 = vpack.c.bf16 %v142_v12, %v142_v12  ;;  %v136_v16 = vpop.f32.mrb[3].mxu0 }
  0xf9   :  { %v137_v18 = vadd.f32 %v167_v10, %v136_v16 }
  0xfa   :  { %162 = vst [vmem:[%s291_s3 + $0x8] sm:$0xf] %v183_v15 }
  0xfb   :  { %v187_v19 = vpack.c.bf16 %v137_v18, %v134_v17 }
  0xfd   :  { %188 = vst [vmem:[%s291_s3] sm:$0xff] %v187_v19  }

// kernel: timesformer_forward.34
= control target key start
LH: loop header
LB: loop body
LE: loop exit
PB: predicated region body
PF: predicated region fallthrough
CT: control target
= control target key end

     0   :  { %s1714_s12 = smov 0   ;;  %s1716_s13 = smov 0   ;;  %s1976_s0 = inlined_call_operand.vmem [shape: bf16[4,5,384], index: 0, kind: input, shape index: {}, may-alias: {0,1,2}]   ;;  %s1977_s1 = inlined_call_operand.vmem [shape: bf16[4,5,384], index: 1, kind: input, shape index: {}, may-alias: {0,1,2}]   ;;  %s1978_s2 = inlined_call_operand.vmem [shape: bf16[4,5,384], index: 2, kind: input, shape index: {}, may-alias: {0,1,2}]   ;;  %s1979_s3 = inlined_call_operand.vmem [shape: bf16[4,5,128], index: 3, kind: output, shape index: {}]  }
   0x1   :  { %s1718_s14 = smov 0  }
   0x2 LB: > { %s1421_s15 = sadd.s32 4294967295, %s1686_s14   ;;  %s1731_s16 = sadd.s32 1, %s1686_s14   ;;  %s1686_s14 = sphi %s1718_s14, %s1985_s14   ;;  %s1682_s13 = sphi %s1716_s13, %s1984_s13   ;;  %s1678_s12 = sphi %s1714_s12, %s1983_s12  }
   0x3   : > { %s17_s17 = ssub.s32 %s1686_s14, %s1731_s16  ;;  %s20_s18 = sadd.s32 1, %s1682_s13 }
   0x4   : > { %p18_p0 = scmp.eq.s32.totalorder %s17_s17, 0  ;;  %p27_p1 = scmp.ne.s32.totalorder %s1682_s13, %s1678_s12 }
   0x5   : > { %p28_p2 = scmp.eq.s32.totalorder %s1686_s14, 0  ;;  %p1424_p4 = scmp.ge.s32.totalorder %s1686_s14, 2 }
   0x6   : > { %s1740_s19 = scalar_select %p18_p0, %s1682_s13, %s20_s18  }
   0x7   : > { %p1742_p3 = por %p28_p2, %p27_p1  ;;  %131 = sbr.rel (%p1424_p4) target bundleno = 35 (0x23), region = 16 }
   0xe   : > { %134 = sbr.rel (!%p1742_p3) target bundleno = 21 (0x15), region = 20  ;;  %s136_s21 = sand.u32 (%p1742_p3), 1, %s1682_s13  }
   0xf   : > { %s1595_s22 = smul.u32 (%p1742_p3), 24, %s1686_s14  ;;  %s1425_s23 = sshll.u32 (%p1742_p3), %s136_s21, 3 }
  0x10   : > { %s138_s27 = scalar_lea.vmem (%p1742_p3), [#allocation2], %s1425_s23 }
  0x11   : > { %s142_s26 = scalar_lea.vmem (%p1742_p3), %s1976_s0, %s1595_s22 }
  0x12   : > { %v158_v0 = vld [vmem:[%s142_s26] sm:$0xf] (%p1742_p3)  ;;  %v160_v1 = vld [vmem:[%s142_s26 + $0xc] sm:$0xf] (%p1742_p3) }
  0x13   : > { %159 = vst [vmem:[%s138_s27] sm:$0xf] (%p1742_p3), %v158_v0  ;;  %161 = vst [vmem:[%s138_s27 + $0x4] sm:$0xf] (%p1742_p3), %v160_v1 }
  0x15 PF: > { %188 = sbr.rel (!%p1742_p3) target bundleno = 28 (0x1c), region = 61  ;;  %s190_s28 = sand.u32 (%p1742_p3), 1, %s1682_s13  }
  0x16   : > { %s1430_s29 = smul.u32 (%p1742_p3), 24, %s1686_s14  ;;  %s1429_s30 = sshll.u32 (%p1742_p3), %s190_s28, 3 }
  0x17   : > { %s192_s7 = scalar_lea.vmem (%p1742_p3), [#allocation3], %s1429_s30 }
  0x18   : > { %s1349_s6 = scalar_lea.vmem (%p1742_p3), %s1977_s1, %s1430_s29 }
  0x19   : > { %v1431_v2 = vld [vmem:[%s1349_s6 + $0x4] sm:$0xf] (%p1742_p3)  ;;  %v1432_v3 = vld [vmem:[%s1349_s6 + $0x10] sm:$0xf] (%p1742_p3) }
  0x1a   : > { %214 = vst [vmem:[%s192_s7] sm:$0xf] (%p1742_p3), %v1431_v2  ;;  %216 = vst [vmem:[%s192_s7 + $0x4] sm:$0xf] (%p1742_p3), %v1432_v3 }
  0x1c PF: > { %243 = sbr.rel (!%p1742_p3) target bundleno = 35 (0x23), region = 102  ;;  %s245_s8 = sand.u32 (%p1742_p3), 1, %s1682_s13  }
  0x1d   : > { %s1434_s9 = smul.u32 (%p1742_p3), 24, %s1686_s14  ;;  %s1433_s10 = sshll.u32 (%p1742_p3), %s245_s8, 3 }
  0x1e   : > { %s247_s21 = scalar_lea.vmem (%p1742_p3), [#allocation4], %s1433_s10 }
  0x1f   : > { %s1355_s18 = scalar_lea.vmem (%p1742_p3), %s1978_s2, %s1434_s9 }
  0x20   : > { %v1435_v4 = vld [vmem:[%s1355_s18 + $0x8] sm:$0xf] (%p1742_p3)  ;;  %v1436_v5 = vld [vmem:[%s1355_s18 + $0x14] sm:$0xf] (%p1742_p3) }
  0x21   : > { %269 = vst [vmem:[%s247_s21] sm:$0xf] (%p1742_p3), %v1435_v4  ;;  %271 = vst [vmem:[%s247_s21 + $0x4] sm:$0xf] (%p1742_p3), %v1436_v5 }
  0x23 PF: > { %p1437_p5 = scmp.ge.s32.totalorder %s1686_s14, 1  ;;  %p297_p6 = scmp.lt.s32.totalorder %s1686_s14, 3 }
  0x25   : > { %p298_p7 = pnand %p1437_p5, %p297_p6 }
  0x26   : > { %s304_s20 = sand.u32 (!%p298_p7), 1, %s1678_s12   ;;  %v1688_v6 = vmov (!%p298_p7), 0.0   ;;  %vm365_vm0 = vcmask (!%p298_p7), 261120   ;;  %vm1689_vm1 = vmmov (!%p298_p7), 0   ;;  %s1690_s24 = smov (!%p298_p7), 96   ;;  %vm460_vm2 = vcmask (!%p298_p7), 36864  }
  0x27   : > { %301 = sbr.rel (%p298_p7) target bundleno = 2579 (0xa13), region = 143  ;;  %1499 = vmatprep.subr.bf16.mxu0 (!%p298_p7), %v1688_v6  ;;  %s1772_s22 = sshll.u32 (!%p298_p7), %s304_s20, 3  ;;  %1505 = vmatprep.subr.bf16.mxu1 (!%p298_p7), %v1688_v6  ;;  %vm489_vm3 = vcmask (!%p298_p7), 1041408   ;;  %vm490_vm4 = vcmask (!%p298_p7), 1042432   ;;  %v1691_v39 = vmov (!%p298_p7), 65535   ;;  %vm485_vm5 = vcmask (!%p298_p7), 39936  }
  0x28   : > { %1501 = vmatprep.mubr.msk.bf16.mxu0 (!%p298_p7), %vm1689_vm1, %v1688_v6  ;;  %1507 = vmatprep.mubr.msk.bf16.mxu1 (!%p298_p7), %vm1689_vm1, %v1688_v6  ;;  %s313_s23 = scalar_lea.vmem (!%p298_p7), [#allocation3], %s1772_s22  ;;  %s306_s12 = scalar_lea.vmem (!%p298_p7), [#allocation2], %s1772_s22  ;;  %v491_v40 = vsel (!%p298_p7), %vm489_vm3, 4294967295, %v1691_v39  ;;  %vm1311_vm6 = vsmask.f32 (!%p298_p7), 2304  ;;  %vm1298_vm7 = vcmask (!%p298_p7), 523264  }
  0x29   : > { %v361_v7 = vld [vmem:[%s313_s23] sm:$0x7] (!%p298_p7)  ;;  %v362_v9 = vld [vmem:[%s313_s23 + $0x4] sm:$0x7] (!%p298_p7)  ;;  %v359_v11 = vld [vmem:[%s306_s12] sm:$0x7] (!%p298_p7) }
  0x2a   : > { %v370_v8 = vsel (!%p298_p7), %vm365_vm0, %v361_v7, 0  ;;  %v416_v10 = vsel (!%p298_p7), %vm365_vm0, %v362_v9, 0  ;;  %v360_v12 = vld [vmem:[%s306_s12 + $0x4] sm:$0x7] (!%p298_p7)  ;;  %v1791_v13 = vcombine.low (!%p298_p7), %v359_v11, %v359_v11  ;;  %v1797_v26 = vcombine.low (!%p298_p7), %v361_v7, %v361_v7  ;;  %s320_s25 = scalar_lea.vmem (!%p298_p7), [#allocation4], %s1772_s22  ;;  %s1692_s26 = smov (!%p298_p7), 64   ;;  %vm1955_vm9 = vmand (!%p298_p7), %vm490_vm4, %vm1311_vm6 }
  0x2b   : > { %1500 = vmatpush3.bf16.xpose.msra.mxu0 (!%p298_p7), %v370_v8  ;;  %1506 = vmatpush3.bf16.xpose.msra.mxu1 (!%p298_p7), %v416_v10  ;;  %v1804_v37 = vld [vmem:[%s320_s25] sm:$0x7] (!%p298_p7)  ;;  %v1806_v38 = vcombine.low (!%p298_p7), %v362_v9, %v362_v9  ;;  %v1809_v41 = vsel (!%p298_p7), %vm490_vm4, %v491_v40, 0  ;;  %v364_v43 = vld [vmem:[%s320_s25 + $0x4] sm:$0x7] (!%p298_p7)  ;;  %v1815_v44 = vcombine.low (!%p298_p7), %v360_v12, %v360_v12  ;;  %s1693_s27 = smov (!%p298_p7), 32  }
  0x2c   : > { %1511 = vmatprep.subr.bf16.mxu0 (!%p298_p7), %v1688_v6  ;;  %1517 = vmatprep.subr.bf16.mxu1 (!%p298_p7), %v1688_v6  ;;  %v494_v42 = vand.u32 (!%p298_p7), %v1809_v41, %v1804_v37  ;;  %v540_v45 = vand.u32 (!%p298_p7), %v1809_v41, %v364_v43  ;;  %s1441_s28 = sshll.u32 (!%p298_p7), %s1421_s15, 1  ;;  %vm1303_vm8 = vcmask (!%p298_p7), 785408  }
  0x2d   : > { %587 = vrot.lane.b32.xlu1 (!%p298_p7), %v1791_v13, %s1690_s24  ;;  %p353_p8 = scmp.lt.s32.totalorder (!%p298_p7), %s1441_s28, 3 }
  0x2f   : > { %s1987_s28 = smov (!%p353_p8, %s1441_s28), 3 }
  0x30   : > { %s1442_s29 = sshll.u32 %s1987_s28, 2 }
  0x31   : > { %s356_s5 = scalar_lea.vmem %s1979_s3, %s1442_s29 }
  0x32   : > { %1502 = vmatmul.mubr.msk.bf16.vlgmr.msra.gmra.mrb[0].mxu0 %vm365_vm0, %v359_v11  ;;  %1508 = vmatmul.mubr.msk.bf16.vlgmr.msra.gmra.mrb[0].mxu1 %vm365_vm0, %v360_v12 }
  0x33   : > { %1513 = vmatprep.mubr.msk.bf16.mxu0 %vm1689_vm1, %v1688_v6  ;;  %1519 = vmatprep.mubr.msk.bf16.mxu1 %vm1689_vm1, %v1688_v6 }
  0x34   : > { %1512 = vmatpush3.bf16.msra.mxu0 %v494_v42  ;;  %1518 = vmatpush3.bf16.msra.mxu1 %v540_v45 }
  0x35   : > { %1523 = vmatprep.subr.bf16.mxu0 %v1688_v6  ;;  %1529 = vmatprep.subr.bf16.mxu1 %v1688_v6 }
  0x9f   : > { %v588_v46 = vpop.permute.xlu1 %587 }
 0x105   : > { %v406_v14 = vpop.f32.mrb[0].mxu0  ;;  %v452_v17 = vpop.f32.mrb[0].mxu1 }
 0x106   : > { %v458_v15 = vmul.f32 0.17677669, %v406_v14  ;;  %v1503_v16 = vpop.f32.mrb[1].mxu0  ;;  %v459_v19 = vmul.f32 0.17677669, %v452_v17  ;;  %v1509_v20 = vpop.f32.mrb[1].mxu1 }
 0x107   : > { %v409_v18 = vpop.f32.mrb[2].mxu0  ;;  %v455_v23 = vpop.f32.mrb[2].mxu1 }
 0x108   : > { %v1504_v21 = vpop.f32.mrb[3].mxu0  ;;  %v461_v22 = vsel %vm460_vm2, %v458_v15, -inf  ;;  %v1510_v24 = vpop.f32.mrb[3].mxu1  ;;  %v464_v25 = vsel %vm460_vm2, %v459_v19, -inf  ;;  %v1844_v18 = vcombine.low %v364_v43, %v364_v43 }
 0x109   : > { %462 = vmax.xlane.f32.xlu0 %v461_v22  ;;  %v1857_v24 = vcombine.low %v1804_v37, %v1804_v37 }
 0x10d   : > { %465 = vmax.xlane.f32.xlu0 %v464_v25 }
 0x123   : > { %592 = vrot.lane.b32.xlu0 %v1797_v26, %s1690_s24 }
 0x196   : > { %v463_v27 = vpop.xlane.xlu0 %462 }
 0x197   : > { %v467_v28 = vsub.f32 %v458_v15, %v463_v27 }
 0x199   : > { %v469_v29 = vmul.f32 1.442695, %v467_v28 }
 0x19a   : > { %v466_v30 = vpop.xlane.xlu0 %465 }
 0x19b   : > { %1632 = vpow2.f32 %v469_v29  ;;  %v468_v31 = vsub.f32 %v459_v19, %v466_v30 }
 0x19d   : > { %v471_v32 = vmul.f32 1.442695, %v468_v31 }
 0x19e   : > { %v593_v50 = vpop.permute.xlu0 %592 }
 0x19f   : > { %1634 = vpow2.f32 %v471_v32  ;;  %v598_v52 = vsel %vm365_vm0, %v593_v50, 0 }
 0x1a5   : > { %v1633_v33 = vpop.eup %1632 }
 0x1a6   : > { %v473_v34 = vsel %vm460_vm2, %v1633_v33, 0.0 }
 0x1a7   : > { %474 = vadd.xlane.f32.xlu1 %v473_v34 }
 0x1a9   : > { %v1635_v35 = vpop.eup %1634 }
 0x1aa   : > { %v476_v36 = vsel %vm460_vm2, %v1635_v35, 0.0 }
 0x1ab   : > { %477 = vadd.xlane.f32.xlu1 %v476_v36 }
 0x1bc   : > { %648 = vrot.lane.b32.xlu1 %v1806_v38, %s1690_s24 }
 0x1c0   : > { %643 = vrot.lane.b32.xlu1 %v1815_v44, %s1690_s24 }
 0x234   : > { %v475_v47 = vpop.xlane.xlu1 %474 }
 0x235   : > { %1636 = vrcp.f32 %v475_v47 }
 0x238   : > { %v478_v48 = vpop.xlane.xlu1 %477 }
 0x239   : > { %1638 = vrcp.f32 %v478_v48 }
 0x23c   : > { %v649_v55 = vpop.permute.xlu1 %648 }
 0x23d   : > { %v654_v57 = vsel %vm365_vm0, %v649_v55, 0 }
 0x23f   : > { %v1637_v49 = vpop.eup %1636 }
 0x240   : > { %v481_v51 = vmul.f32 %v1637_v49, %v1633_v33  ;;  %v644_v59 = vpop.permute.xlu1 %643 }
 0x242   : > { %v483_v53 = vpack.c.bf16 %v481_v51, %v481_v51 }
 0x243   : > { %v1639_v54 = vpop.eup %1638 }
 0x244   : > { %v482_v56 = vmul.f32 %v1639_v54, %v1635_v35  ;;  %1514 = vmatmul.mubr.msk.bf16.vlgmr.msra.gmra.mrb[4].mxu0 %vm485_vm5, %v483_v53 }
 0x245   : > { %1524 = vmatpush3.bf16.xpose.msra.mxu0 %v598_v52  ;;  %1525 = vmatprep.mubr.msk.bf16.mxu0 %vm1689_vm1, %v1688_v6 }
 0x246   : > { %v484_v58 = vpack.c.bf16 %v482_v56, %v482_v56  ;;  %1535 = vmatprep.subr.bf16.mxu0 %v1688_v6 }
 0x248   : > { %1520 = vmatmul.mubr.msk.bf16.vlgmr.msra.gmra.mrb[4].mxu1 %vm485_vm5, %v484_v58 }
 0x249   : > { %1530 = vmatpush3.bf16.xpose.msra.mxu1 %v654_v57  ;;  %1531 = vmatprep.mubr.msk.bf16.mxu1 %vm1689_vm1, %v1688_v6 }
 0x24a   : > { %1541 = vmatprep.subr.bf16.mxu1 %v1688_v6 }
 0x24c   : > { %1526 = vmatmul.mubr.msk.bf16.vlgmr.msra.gmra.mrb[8].mxu0 %vm365_vm0, %v588_v46 }
 0x24d   : > { %1537 = vmatprep.mubr.msk.bf16.mxu0 %vm1689_vm1, %v1688_v6 }
 0x250   : > { %1532 = vmatmul.mubr.msk.bf16.vlgmr.msra.gmra.mrb[8].mxu1 %vm365_vm0, %v644_v59 }
 0x251   : > { %1543 = vmatprep.mubr.msk.bf16.mxu1 %vm1689_vm1, %v1688_v6 }
 0x317   : > { %v1838_v60 = vpop.f32.mrb[4].mxu0 }
 0x318   : > { %v1515_v61 = vpop.f32.mrb[5].mxu0 }
 0x319   : > { %v533_v62 = vpop.f32.mrb[6].mxu0 }
 0x31a   : > { %v1516_v63 = vpop.f32.mrb[7].mxu0 }
 0x31b   : > { %v1840_v0 = vpop.f32.mrb[4].mxu1 }
 0x31c   : > { %v1521_v1 = vpop.f32.mrb[5].mxu1 }
 0x31d   : > { %v579_v2 = vpop.f32.mrb[6].mxu1 }
 0x31e   : > { %v1522_v3 = vpop.f32.mrb[7].mxu1 }
 0x31f   : > { %v634_v4 = vpop.f32.mrb[8].mxu0 }
 0x320   : > { %v696_v5 = vmul.f32 0.17677669, %v634_v4  ;;  %v1527_v7 = vpop.f32.mrb[9].mxu0 }
 0x321   : > { %v637_v8 = vpop.f32.mrb[10].mxu0 }
 0x322   : > { %v1528_v9 = vpop.f32.mrb[11].mxu0  ;;  %v698_v10 = vsel %vm460_vm2, %v696_v5, -inf }
 0x323   : > { %v690_v11 = vpop.f32.mrb[8].mxu1  ;;  %699 = vmax.xlane.f32.xlu0 %v698_v10 }
 0x324   : > { %v697_v12 = vmul.f32 0.17677669, %v690_v11  ;;  %v1533_v14 = vpop.f32.mrb[9].mxu1 }
 0x325   : > { %v693_v15 = vpop.f32.mrb[10].mxu1 }
 0x326   : > { %v701_v16 = vsel %vm460_vm2, %v697_v12, -inf  ;;  %v1534_v17 = vpop.f32.mrb[11].mxu1 }
 0x327   : > { %702 = vmax.xlane.f32.xlu1 %v701_v16 }
 0x338   : > { %776 = vrot.lane.b32.xlu1 %v1844_v18, %s1690_s24 }
 0x33c   : > { %828 = vrot.lane.b32.xlu1 %v1797_v26, %s1692_s26 }
 0x340   : > { %826 = vrot.lane.b32.xlu1 %v1791_v13, %s1692_s26 }
 0x344   : > { %876 = vrot.lane.b32.xlu1 %v1815_v44, %s1692_s26 }
 0x3b0   : > { %v700_v19 = vpop.xlane.xlu0 %699 }
 0x3b1   : > { %v704_v20 = vsub.f32 %v696_v5, %v700_v19 }
 0x3b3   : > { %v706_v21 = vmul.f32 1.442695, %v704_v20 }
 0x3b4   : > { %v703_v25 = vpop.xlane.xlu1 %702 }
 0x3b5   : > { %1640 = vpow2.f32 %v706_v21  ;;  %v705_v29 = vsub.f32 %v697_v12, %v703_v25 }
 0x3b7   : > { %v708_v30 = vmul.f32 1.442695, %v705_v29 }
 0x3b8   : > { %v777_v27 = vpop.permute.xlu1 %776 }
 0x3b9   : > { %v782_v28 = vand.u32 %v777_v27, %v1809_v41  ;;  %1642 = vpow2.f32 %v708_v30 }
 0x3bb   : > { %1542 = vmatpush3.bf16.msra.mxu1 %v782_v28 }
 0x3bc   : > { %1553 = vmatprep.subr.bf16.mxu1 %v1688_v6  ;;  %v829_v37 = vpop.permute.xlu1 %828 }
 0x3bd   : > { %v834_v40 = vsel %vm365_vm0, %v829_v37, 0 }
 0x3bf   : > { %v1641_v22 = vpop.eup %1640 }
 0x3c0   : > { %v710_v23 = vsel %vm460_vm2, %v1641_v22, 0.0  ;;  %v827_v43 = vpop.permute.xlu1 %826 }
 0x3c1   : > { %711 = vadd.xlane.f32.xlu0 %v710_v23 }
 0x3c3   : > { %v1643_v31 = vpop.eup %1642 }
 0x3c4   : > { %v713_v32 = vsel %vm460_vm2, %v1643_v31, 0.0  ;;  %v877_v51 = vpop.permute.xlu1 %876 }
 0x3d7   : > { %725 = vrot.lane.b32.xlu0 %v1857_v24, %s1690_s24 }
 0x3f6   : > { %714 = vadd.xlane.f32.xlu0 %v713_v32 }
 0x40c   : > { %878 = vrot.lane.b32.xlu0 %v1806_v38, %s1692_s26 }
 0x44e   : > { %v712_v33 = vpop.xlane.xlu0 %711 }
 0x44f   : > { %1644 = vrcp.f32 %v712_v33 }
 0x452   : > { %v726_v34 = vpop.permute.xlu0 %725 }
 0x453   : > { %v731_v35 = vand.u32 %v726_v34, %v1809_v41 }
 0x455   : > { %1536 = vmatpush3.bf16.msra.mxu0 %v731_v35 }
 0x456   : > { %1547 = vmatprep.subr.bf16.mxu0 %v1688_v6 }
 0x459   : > { %v1645_v36 = vpop.eup %1644 }
 0x45a   : > { %v718_v39 = vmul.f32 %v1645_v36, %v1641_v22 }
 0x45c   : > { %v720_v42 = vpack.c.bf16 %v718_v39, %v718_v39 }
 0x45e   : > { %1538 = vmatmul.mubr.msk.bf16.vlgmr.msra.gmra.mrb[12].mxu0 %vm485_vm5, %v720_v42 }
 0x45f   : > { %1548 = vmatpush3.bf16.xpose.msra.mxu0 %v834_v40  ;;  %1549 = vmatprep.mubr.msk.bf16.mxu0 %vm1689_vm1, %v1688_v6 }
 0x460   : > { %1559 = vmatprep.subr.bf16.mxu0 %v1688_v6 }
 0x466   : > { %1550 = vmatmul.mubr.msk.bf16.vlgmr.msra.gmra.mrb[16].mxu0 %vm365_vm0, %v827_v43 }
 0x467   : > { %1561 = vmatprep.mubr.msk.bf16.mxu0 %vm1689_vm1, %v1688_v6 }
 0x483   : > { %v715_v45 = vpop.xlane.xlu0 %714 }
 0x484   : > { %1646 = vrcp.f32 %v715_v45 }
 0x487   : > { %v879_v47 = vpop.permute.xlu0 %878 }
 0x488   : > { %v884_v49 = vsel %vm365_vm0, %v879_v47, 0 }
 0x48e   : > { %v1647_v46 = vpop.eup %1646 }
 0x48f   : > { %v719_v48 = vmul.f32 %v1647_v46, %v1643_v31 }
 0x491   : > { %v721_v50 = vpack.c.bf16 %v719_v48, %v719_v48 }
 0x493   : > { %1544 = vmatmul.mubr.msk.bf16.vlgmr.msra.gmra.mrb[12].mxu1 %vm485_vm5, %v721_v50 }
 0x494   : > { %1554 = vmatpush3.bf16.xpose.msra.mxu1 %v884_v49  ;;  %1555 = vmatprep.mubr.msk.bf16.mxu1 %vm1689_vm1, %v1688_v6 }
 0x495   : > { %1565 = vmatprep.subr.bf16.mxu1 %v1688_v6 }
 0x49b   : > { %1556 = vmatmul.mubr.msk.bf16.vlgmr.msra.gmra.mrb[16].mxu1 %vm365_vm0, %v877_v51 }
 0x49c   : > { %1567 = vmatprep.mubr.msk.bf16.mxu1 %vm1689_vm1, %v1688_v6 }
 0x531   : > { %v1884_v52 = vpop.f32.mrb[12].mxu0 }
 0x532   : > { %v1539_v53 = vpop.f32.mrb[13].mxu0 }
 0x533   : > { %v770_v54 = vpop.f32.mrb[14].mxu0 }
 0x534   : > { %v1540_v55 = vpop.f32.mrb[15].mxu0 }
 0x539   : > { %v870_v56 = vpop.f32.mrb[16].mxu0 }
 0x53a   : > { %v926_v57 = vmul.f32 0.17677669, %v870_v56  ;;  %v1551_v58 = vpop.f32.mrb[17].mxu0 }
 0x53b   : > { %v873_v59 = vpop.f32.mrb[18].mxu0 }
 0x53c   : > { %v1552_v61 = vpop.f32.mrb[19].mxu0  ;;  %v928_v62 = vsel %vm460_vm2, %v926_v57, -inf }
 0x53d   : > { %929 = vmax.xlane.f32.xlu0 %v928_v62 }
 0x566   : > { %v1887_v63 = vpop.f32.mrb[12].mxu1 }
 0x567   : > { %v1545_v1 = vpop.f32.mrb[13].mxu1 }
 0x568   : > { %v821_v2 = vpop.f32.mrb[14].mxu1  ;;  %v824_v1 = vpack.c.bf16 %v1884_v52, %v1884_v52 }
 0x569   : > { %v1546_v3 = vpop.f32.mrb[15].mxu1 }
 0x56a   : > { %v825_v3 = vpack.c.bf16 %v1887_v63, %v1887_v63 }
 0x56e   : > { %v920_v4 = vpop.f32.mrb[16].mxu1 }
 0x56f   : > { %v927_v5 = vmul.f32 0.17677669, %v920_v4  ;;  %v1557_v7 = vpop.f32.mrb[17].mxu1 }
 0x570   : > { %v923_v8 = vpop.f32.mrb[18].mxu1 }
 0x571   : > { %v1558_v9 = vpop.f32.mrb[19].mxu1  ;;  %v931_v10 = vsel %vm460_vm2, %v927_v5, -inf }
 0x572   : > { %932 = vmax.xlane.f32.xlu1 %v931_v10 }
 0x583   : > { %1000 = vrot.lane.b32.xlu1 %v1844_v18, %s1692_s26 }
 0x587   : > { %1052 = vrot.lane.b32.xlu1 %v1797_v26, %s1693_s27 }
 0x58b   : > { %1050 = vrot.lane.b32.xlu1 %v1791_v13, %s1693_s27 }
 0x58f   : > { %1100 = vrot.lane.b32.xlu1 %v1815_v44, %s1693_s27 }
 0x5ca   : > { %v930_v11 = vpop.xlane.xlu0 %929 }
 0x5cb   : > { %v934_v12 = vsub.f32 %v926_v57, %v930_v11 }
 0x5cd   : > { %v936_v14 = vmul.f32 1.442695, %v934_v12 }
 0x5cf   : > { %1648 = vpow2.f32 %v936_v14 }
 0x5d9   : > { %v1649_v15 = vpop.eup %1648 }
 0x5da   : > { %v940_v16 = vsel %vm460_vm2, %v1649_v15, 0.0 }
 0x5db   : > { %941 = vadd.xlane.f32.xlu0 %v940_v16 }
 0x5f1   : > { %952 = vrot.lane.b32.xlu0 %v1857_v24, %s1692_s26 }
 0x5ff   : > { %v933_v17 = vpop.xlane.xlu1 %932 }
 0x600   : > { %v935_v19 = vsub.f32 %v927_v5, %v933_v17 }
 0x602   : > { %v938_v26 = vmul.f32 1.442695, %v935_v19 }
 0x603   : > { %v1001_v20 = vpop.permute.xlu1 %1000 }
 0x604   : > { %1650 = vpow2.f32 %v938_v26  ;;  %v1006_v13 = vand.u32 %v1001_v20, %v1809_v41 }
 0x606   : > { %1566 = vmatpush3.bf16.msra.mxu1 %v1006_v13 }
 0x607   : > { %1577 = vmatprep.subr.bf16.mxu1 %v1688_v6  ;;  %v1053_v28 = vpop.permute.xlu1 %1052 }
 0x608   : > { %v1058_v30 = vsel %vm365_vm0, %v1053_v28, 0 }
 0x60e   : > { %v1651_v44 = vpop.eup %1650 }
 0x60f   : > { %v943_v21 = vsel %vm460_vm2, %v1651_v44, 0.0 }
 0x610   : > { %944 = vadd.xlane.f32.xlu0 %v943_v21 }
 0x626   : > { %1102 = vrot.lane.b32.xlu0 %v1806_v38, %s1693_s27  ;;  %v1051_v38 = vpop.permute.xlu1 %1050 }
 0x62a   : > { %v1101_v39 = vpop.permute.xlu1 %1100 }
 0x668   : > { %v942_v22 = vpop.xlane.xlu0 %941 }
 0x669   : > { %1652 = vrcp.f32 %v942_v22 }
 0x66c   : > { %v953_v23 = vpop.permute.xlu0 %952 }
 0x66d   : > { %v958_v25 = vand.u32 %v953_v23, %v1809_v41 }
 0x66f   : > { %1560 = vmatpush3.bf16.msra.mxu0 %v958_v25 }
 0x670   : > { %1571 = vmatprep.subr.bf16.mxu0 %v1688_v6 }
 0x673   : > { %v1653_v27 = vpop.eup %1652 }
 0x674   : > { %v948_v29 = vmul.f32 %v1653_v27, %v1649_v15 }
 0x676   : > { %v950_v31 = vpack.c.bf16 %v948_v29, %v948_v29 }
 0x678   : > { %1562 = vmatmul.mubr.msk.bf16.vlgmr.msra.gmra.mrb[20].mxu0 %vm485_vm5, %v950_v31 }
 0x679   : > { %1572 = vmatpush3.bf16.xpose.msra.mxu0 %v1058_v30  ;;  %1573 = vmatprep.mubr.msk.bf16.mxu0 %vm1689_vm1, %v1688_v6 }
 0x67a   : > { %1583 = vmatprep.subr.bf16.mxu0 %v1688_v6 }
 0x680   : > { %1574 = vmatmul.mubr.msk.bf16.vlgmr.msra.gmra.mrb[24].mxu0 %vm365_vm0, %v1051_v38 }
 0x681   : > { %1585 = vmatprep.mubr.msk.bf16.mxu0 %vm1689_vm1, %v1688_v6 }
 0x69d   : > { %v945_v32 = vpop.xlane.xlu0 %944 }
 0x69e   : > { %1654 = vrcp.f32 %v945_v32 }
 0x6a1   : > { %v1103_v34 = vpop.permute.xlu0 %1102 }
 0x6a2   : > { %v1108_v36 = vsel %vm365_vm0, %v1103_v34, 0  ;;  %v582_v34 = vpack.c.bf16 %v1838_v60, %v1838_v60  ;;  %v583_v60 = vpack.c.bf16 %v1840_v0, %v1840_v0 }
 0x6a8   : > { %v1655_v33 = vpop.eup %1654 }
 0x6a9   : > { %v949_v35 = vmul.f32 %v1655_v33, %v1651_v44 }
 0x6ab   : > { %v951_v37 = vpack.c.bf16 %v949_v35, %v949_v35 }
 0x6ad   : > { %1568 = vmatmul.mubr.msk.bf16.vlgmr.msra.gmra.mrb[20].mxu1 %vm485_vm5, %v951_v37 }
 0x6ae   : > { %1578 = vmatpush3.bf16.xpose.msra.mxu1 %v1108_v36  ;;  %1579 = vmatprep.mubr.msk.bf16.mxu1 %vm1689_vm1, %v1688_v6 }
 0x6af   : > { %1589 = vmatprep.subr.bf16.mxu1 %v1688_v6 }
 0x6b5   : > { %1580 = vmatmul.mubr.msk.bf16.vlgmr.msra.gmra.mrb[24].mxu1 %vm365_vm0, %v1101_v39  ;;  %v1313_v39 = vld [vmem:[%s356_s5] sm:$0x7] }
 0x6b6   : > { %1591 = vmatprep.mubr.msk.bf16.mxu1 %vm1689_vm1, %v1688_v6 }
 0x74b   : > { %v994_v40 = vpop.f32.mrb[20].mxu0 }
 0x74c   : > { %v1563_v42 = vpop.f32.mrb[21].mxu0  ;;  %v1048_v2 = vpack.c.bf16 %v994_v40, %v994_v40 }
 0x74d   : > { %v997_v43 = vpop.f32.mrb[22].mxu0 }
 0x74e   : > { %v1564_v45 = vpop.f32.mrb[23].mxu0 }
 0x753   : > { %v1094_v46 = vpop.f32.mrb[24].mxu0 }
 0x754   : > { %v1150_v47 = vmul.f32 0.17677669, %v1094_v46  ;;  %v1575_v48 = vpop.f32.mrb[25].mxu0 }
 0x755   : > { %v1097_v49 = vpop.f32.mrb[26].mxu0 }
 0x756   : > { %v1152_v50 = vsel %vm460_vm2, %v1150_v47, -inf  ;;  %v1576_v51 = vpop.f32.mrb[27].mxu0 }
 0x757   : > { %1153 = vmax.xlane.f32.xlu0 %v1152_v50 }
 0x780   : > { %v1042_v53 = vpop.f32.mrb[20].mxu1 }
 0x781   : > { %v1569_v54 = vpop.f32.mrb[21].mxu1  ;;  %v1049_v29 = vpack.c.bf16 %v1042_v53, %v1042_v53  ;;  %v1316_v53 = vld [vmem:[%s356_s5 + $0x4] sm:$0x7] }
 0x782   : > { %v1045_v55 = vpop.f32.mrb[22].mxu1 }
 0x783   : > { %v1570_v56 = vpop.f32.mrb[23].mxu1 }
 0x788   : > { %v1144_v57 = vpop.f32.mrb[24].mxu1 }
 0x789   : > { %v1151_v58 = vmul.f32 0.17677669, %v1144_v57  ;;  %v1581_v59 = vpop.f32.mrb[25].mxu1 }
 0x78a   : > { %v1147_v6 = vpop.f32.mrb[26].mxu1 }
 0x78b   : > { %v1582_v61 = vpop.f32.mrb[27].mxu1  ;;  %v1155_v62 = vsel %vm460_vm2, %v1151_v58, -inf }
 0x78c   : > { %1156 = vmax.xlane.f32.xlu1 %v1155_v62 }
 0x79d   : > { %1224 = vrot.lane.b32.xlu1 %v1844_v18, %s1693_s27 }
 0x7a1   : > { %1276 = vrot.lane.b32.xlu1 %v824_v1, %s1693_s27 }
 0x7a5   : > { %1282 = vrot.lane.b32.xlu1 %v1048_v2, %s1692_s26 }
 0x7a9   : > { %1278 = vrot.lane.b32.xlu1 %v825_v3, %s1693_s27 }
 0x7e4   : > { %v1154_v4 = vpop.xlane.xlu0 %1153 }
 0x7e5   : > { %v1158_v5 = vsub.f32 %v1150_v47, %v1154_v4 }
 0x7e7   : > { %v1160_v7 = vmul.f32 1.442695, %v1158_v5 }
 0x7e9   : > { %1656 = vpow2.f32 %v1160_v7 }
 0x7f3   : > { %v1657_v8 = vpop.eup %1656 }
 0x7f4   : > { %v1164_v18 = vsel %vm460_vm2, %v1657_v8, 0.0 }
 0x7f5   : > { %1165 = vadd.xlane.f32.xlu0 %v1164_v18 }
 0x819   : > { %v1157_v9 = vpop.xlane.xlu1 %1156 }
 0x81a   : > { %v1159_v52 = vsub.f32 %v1151_v58, %v1157_v9 }
 0x81c   : > { %v1162_v10 = vmul.f32 1.442695, %v1159_v52 }
 0x81d   : > { %v1225_v11 = vpop.permute.xlu1 %1224 }
 0x81e   : > { %1658 = vpow2.f32 %v1162_v10  ;;  %v1230_v12 = vand.u32 %v1225_v11, %v1809_v41 }
 0x820   : > { %1590 = vmatpush3.bf16.msra.mxu1 %v1230_v12 }
 0x821   : > { %v1277_v33 = vpop.permute.xlu1 %1276 }
 0x822   : > { %v1294_v36 = vsel %vm365_vm0, %v582_v34, %v1277_v33 }
 0x825   : > { %v1283_v35 = vpop.permute.xlu1 %1282 }
 0x826   : > { %v1300_v40 = vsel %vm1298_vm7, %v1294_v36, %v1283_v35 }
 0x828   : > { %v1659_v14 = vpop.eup %1658 }
 0x829   : > { %v1167_v63 = vsel %vm460_vm2, %v1659_v14, 0.0  ;;  %v1279_v46 = vpop.permute.xlu1 %1278 }
 0x82a   : > { %1168 = vadd.xlane.f32.xlu0 %v1167_v63  ;;  %v1297_v48 = vsel %vm365_vm0, %v583_v60, %v1279_v46 }
 0x840   : > { %1176 = vrot.lane.b32.xlu0 %v1857_v24, %s1693_s27 }
 0x882   : > { %v1166_v15 = vpop.xlane.xlu0 %1165 }
 0x883   : > { %1660 = vrcp.f32 %v1166_v15 }
 0x88d   : > { %v1661_v17 = vpop.eup %1660 }
 0x88e   : > { %v1172_v19 = vmul.f32 %v1661_v17, %v1657_v8 }
 0x890   : > { %v1174_v13 = vpack.c.bf16 %v1172_v19, %v1172_v19 }
 0x8b7   : > { %v1169_v16 = vpop.xlane.xlu0 %1168 }
 0x8b8   : > { %1662 = vrcp.f32 %v1169_v16 }
 0x8bb   : > { %v1177_v26 = vpop.permute.xlu0 %1176 }
 0x8bc   : > { %v1182_v20 = vand.u32 %v1177_v26, %v1809_v41 }
 0x8be   : > { %1584 = vmatpush3.bf16.msra.mxu0 %v1182_v20 }
 0x8c1   : > { %1586 = vmatmul.mubr.msk.bf16.vlgmr.msra.gmra.mrb[28].mxu0 %vm485_vm5, %v1174_v13 }
 0x8c2   : > { %v1663_v44 = vpop.eup %1662 }
 0x8c3   : > { %v1173_v21 = vmul.f32 %v1663_v44, %v1659_v14 }
 0x8c5   : > { %v1175_v22 = vpack.c.bf16 %v1173_v21, %v1173_v21 }
 0x8c7   : > { %1592 = vmatmul.mubr.msk.bf16.vlgmr.msra.gmra.mrb[28].mxu1 %vm485_vm5, %v1175_v22 }
 0x994   : > { %v1218_v24 = vpop.f32.mrb[28].mxu0 }
 0x995   : > { %v1272_v23 = vpack.c.bf16 %v1218_v24, %v1218_v24  ;;  %v1587_v25 = vpop.f32.mrb[29].mxu0 }
 0x996   : > { %v1221_v27 = vpop.f32.mrb[30].mxu0 }
 0x997   : > { %1288 = vrot.lane.b32.xlu0 %v1272_v23, %s1690_s24  ;;  %v1588_v28 = vpop.f32.mrb[31].mxu0 }
 0x99a   : > { %v1266_v30 = vpop.f32.mrb[28].mxu1 }
 0x99b   : > { %v1273_v41 = vpack.c.bf16 %v1266_v30, %v1266_v30  ;;  %v1593_v31 = vpop.f32.mrb[29].mxu1  ;;  %1284 = vrot.lane.b32.xlu0 %v1049_v29, %s1692_s26 }
 0x99c   : > { %v1269_v38 = vpop.f32.mrb[30].mxu1 }
 0x99d   : > { %1290 = vrot.lane.b32.xlu1 %v1273_v41, %s1690_s24  ;;  %v1594_v32 = vpop.f32.mrb[31].mxu1 }
 0xa09   : > { %v1289_v42 = vpop.permute.xlu0 %1288 }
 0xa0a   : > { %v1305_v43 = vsel %vm1303_vm8, %v1300_v40, %v1289_v42 }
 0xa0b   : > { %v1314_v45 = vsel %vm1955_vm9, %v1305_v43, %v1313_v39 }
 0xa0c   : > { %1315 = vst [vmem:[%s356_s5] sm:$0x7] %v1314_v45 }
 0xa0d   : > { %v1285_v47 = vpop.permute.xlu0 %1284 }
 0xa0e   : > { %v1302_v49 = vsel %vm1298_vm7, %v1297_v48, %v1285_v47 }
 0xa0f   : > { %v1291_v50 = vpop.permute.xlu1 %1290 }
 0xa10   : > { %v1308_v51 = vsel %vm1303_vm8, %v1302_v49, %v1291_v50 }
 0xa11   : > { %v1317_v54 = vsel %vm1955_vm9, %v1308_v51, %v1316_v53 }
 0xa12   : > { %1318 = vst [vmem:[%s356_s5 + $0x4] sm:$0x7] %v1317_v54 }
 0xa13 PF: > { %p10_p9 = scmp.ge.s32.totalorder %s1731_s16, 4   ;;  %s1983_s12 = smov %s1682_s13 }
 0xa14   : > { %s1984_s13 = smov %s1740_s19  ;;  %s1985_s14 = smov %s1731_s16 }
 0xa15   :  { %12 = sbr.rel (!%p10_p9) target bundleno = 2 (0x2), region = 206 }

// kernel: timesformer_forward.51
= control target key start
LH: loop header
LB: loop body
LE: loop exit
PB: predicated region body
PF: predicated region fallthrough
CT: control target
= control target key end

     0   :  { %s134_s0 = inlined_call_operand.vmem [shape: bf16[24,128], index: 0, kind: input, shape index: {}]   ;;  %s135_s1 = inlined_call_operand.vmem [shape: f32[1,128], index: 1, kind: input, shape index: {}]   ;;  %s136_s2 = inlined_call_operand.vmem [shape: f32[1,128], index: 2, kind: input, shape index: {}]   ;;  %s137_s3 = inlined_call_operand.vmem [shape: f32[24,128], index: 3, kind: output, shape index: {}]  }
   0x1   :  { %v84_v0 = vld [vmem:[%s134_s0] sm:$0xff]   ;;  %v16_v1 = vld [vmem:[%s134_s0 + $0x8] sm:$0xf] }
   0x2   :  { %v85_v2 = vunpack.c.l.bf16 %v84_v0  ;;  %v19_v3 = vunpack.c.l.bf16 %v16_v1  ;;  %v86_v4 = vunpack.c.h.bf16 %v84_v0  ;;  %v81_v27 = vld [vmem:[%s135_s1] ss:$0 sm:$0xff] }
   0x3   :  { %v82_v29 = vld [vmem:[%s136_s2] ss:$0 sm:$0xff] }
   0x4   :  { %20 = vadd.xlane.f32.xlu0 %v85_v2  ;;  %24 = vadd.xlane.f32.xlu1 %v19_v3 }
   0x8   :  { %22 = vadd.xlane.f32.xlu0 %v86_v4 }
  0x91   :  { %v21_v5 = vpop.xlane.xlu0 %20  ;;  %v25_v6 = vpop.xlane.xlu1 %24 }
  0x92   :  { %v27_v7 = vmul.f32 0.0078125, %v21_v5  ;;  %v29_v8 = vmul.f32 0.0078125, %v25_v6 }
  0x94   :  { %v30_v9 = vsub.f32 %v85_v2, %v27_v7  ;;  %v32_v10 = vsub.f32 %v19_v3, %v29_v8 }
  0x95   :  { %v23_v11 = vpop.xlane.xlu0 %22 }
  0x96   :  { %v28_v12 = vmul.f32 0.0078125, %v23_v11  ;;  %v33_v13 = vmul.f32 %v30_v9, %v30_v9  ;;  %v35_v15 = vmul.f32 %v32_v10, %v32_v10 }
  0x98   :  { %v31_v14 = vsub.f32 %v86_v4, %v28_v12  ;;  %36 = vadd.xlane.f32.xlu1 %v33_v13 }
  0x9a   :  { %v34_v16 = vmul.f32 %v31_v14, %v31_v14 }
  0x9c   :  { %40 = vadd.xlane.f32.xlu1 %v35_v15  ;;  %38 = vadd.xlane.f32.xlu0 %v34_v16 }
 0x125   :  { %v37_v17 = vpop.xlane.xlu1 %36 }
 0x126   :  { %v42_v18 = vmul.f32 0.0078125, %v37_v17 }
 0x128   :  { %v45_v19 = vadd.f32 1e-06, %v42_v18 }
 0x129   :  { %v41_v20 = vpop.xlane.xlu1 %40  ;;  %v39_v21 = vpop.xlane.xlu0 %38 }
 0x12a   :  { %87 = vrsqrt.f32 %v45_v19  ;;  %v44_v22 = vmul.f32 0.0078125, %v41_v20  ;;  %v43_v23 = vmul.f32 0.0078125, %v39_v21 }
 0x12c   :  { %v47_v24 = vadd.f32 1e-06, %v44_v22  ;;  %v46_v25 = vadd.f32 1e-06, %v43_v23 }
 0x12e   :  { %89 = vrsqrt.f32 %v47_v24 }
 0x12f   :  { %91 = vrsqrt.f32 %v46_v25 }
 0x134   :  { %v88_v26 = vpop.eup %87 }
 0x135   :  { %v51_v28 = vmul.f32 %v88_v26, %v30_v9 }
 0x137   :  { %v61_v30 = vmul.f32 %v81_v27, %v51_v28 }
 0x138   :  { %v90_v31 = vpop.eup %89 }
 0x139   :  { %v92_v32 = vpop.eup %91  ;;  %v71_v33 = vadd.f32 %v82_v29, %v61_v30  ;;  %v53_v34 = vmul.f32 %v90_v31, %v32_v10 }
 0x13a   :  { %v52_v35 = vmul.f32 %v92_v32, %v31_v14 }
 0x13b   :  { %74 = vst [vmem:[%s137_s3] sm:$0xff] %v71_v33  ;;  %v63_v36 = vmul.f32 %v81_v27, %v53_v34 }
 0x13c   :  { %v62_v37 = vmul.f32 %v81_v27, %v52_v35 }
 0x13d   :  { %v73_v38 = vadd.f32 %v82_v29, %v63_v36 }
 0x13e   :  { %v72_v39 = vadd.f32 %v82_v29, %v62_v37 }
 0x13f   :  { %76 = vst [vmem:[%s137_s3 + $0x10] sm:$0xff] %v73_v38 }
 0x140   :  { %75 = vst [vmem:[%s137_s3 + $0x8] sm:$0xff] %v72_v39 }

// kernel: timesformer_forward.38
= control target key start
LH: loop header
LB: loop body
LE: loop exit
PB: predicated region body
PF: predicated region fallthrough
CT: control target
= control target key end

     0   :  { %s727_s1 = inlined_call_operand.vmem [shape: bf16[512,128], index: 1, kind: input, shape index: {}]   ;;  %s728_s0 = inlined_call_operand.vmem [shape: bf16[24,512], index: 0, kind: input, shape index: {}]   ;;  %s729_s2 = inlined_call_operand.vmem [shape: f32[1,128], index: 2, kind: input, shape index: {}]   ;;  %s730_s3 = inlined_call_operand.vmem [shape: bf16[24,128], index: 3, kind: output, shape index: {}]  }
   0x1   :  { %v542_v0 = vld [vmem:[%s727_s1 + $0x40] sm:$0xff]   ;;  %v546_v4 = vld [vmem:[%s727_s1 + $0x48] sm:$0xff]   ;;  %v550_v8 = vld [vmem:[%s727_s1 + $0x50] sm:$0xff]  }
   0x2   :  { %v543_v1 = vld [vmem:[%s727_s1 + $0xc0] sm:$0xff]   ;;  %486 = vmatprep.subr.bf16.mxu0 %v542_v0  ;;  %v547_v5 = vld [vmem:[%s727_s1 + $0xc8] sm:$0xff]   ;;  %v551_v9 = vld [vmem:[%s727_s1 + $0xd0] sm:$0xff]  }
   0x3   :  { %v544_v2 = vld [vmem:[%s727_s1] sm:$0xff]   ;;  %514 = vmatprep.subr.bf16.mxu1 %v543_v1  ;;  %v548_v6 = vld [vmem:[%s727_s1 + $0x8] sm:$0xff]   ;;  %v552_v10 = vld [vmem:[%s727_s1 + $0x10] sm:$0xff]  }
   0x4   :  { %v545_v3 = vld [vmem:[%s727_s1 + $0x80] sm:$0xff]   ;;  %487 = vmatpush3.bf16.msra.mxu0 %v544_v2  ;;  %v549_v7 = vld [vmem:[%s727_s1 + $0x88] sm:$0xff]   ;;  %v553_v11 = vld [vmem:[%s727_s1 + $0x90] sm:$0xff]  }
   0x5   :  { %515 = vmatpush3.bf16.msra.mxu1 %v545_v3  ;;  %488 = vmatprep.subr.bf16.mxu0 %v546_v4  ;;  %v554_v12 = vld [vmem:[%s727_s1 + $0x58] sm:$0xff]   ;;  %v558_v16 = vld [vmem:[%s727_s1 + $0x60] sm:$0xff]   ;;  %v562_v20 = vld [vmem:[%s727_s1 + $0x68] sm:$0xff]  }
   0x6   :  { %516 = vmatprep.subr.bf16.mxu1 %v547_v5  ;;  %v555_v13 = vld [vmem:[%s727_s1 + $0xd8] sm:$0xff]   ;;  %v559_v17 = vld [vmem:[%s727_s1 + $0xe0] sm:$0xff]   ;;  %v563_v21 = vld [vmem:[%s727_s1 + $0xe8] sm:$0xff]  }
   0x7   :  { %v556_v14 = vld [vmem:[%s727_s1 + $0x18] sm:$0xff]   ;;  %v560_v18 = vld [vmem:[%s727_s1 + $0x20] sm:$0xff]   ;;  %v564_v22 = vld [vmem:[%s727_s1 + $0x28] sm:$0xff]  }
   0x8   :  { %489 = vmatpush3.bf16.msra.mxu0 %v548_v6  ;;  %v557_v15 = vld [vmem:[%s727_s1 + $0x98] sm:$0xff]   ;;  %v561_v19 = vld [vmem:[%s727_s1 + $0xa0] sm:$0xff]   ;;  %v565_v23 = vld [vmem:[%s727_s1 + $0xa8] sm:$0xff]  }
   0x9   :  { %517 = vmatpush3.bf16.msra.mxu1 %v549_v7  ;;  %490 = vmatprep.subr.bf16.mxu0 %v550_v8  ;;  %v566_v24 = vld [vmem:[%s727_s1 + $0x70] sm:$0xff]   ;;  %v570_v28 = vld [vmem:[%s727_s1 + $0x78] sm:$0xff]   ;;  %v19_v36 = vld [vmem:[%s728_s0 + $0x20] sm:$0xff] }
   0xa   :  { %518 = vmatprep.subr.bf16.mxu1 %v551_v9  ;;  %v567_v25 = vld [vmem:[%s727_s1 + $0xf0] sm:$0xff]   ;;  %v571_v29 = vld [vmem:[%s727_s1 + $0xf8] sm:$0xff]   ;;  %v440_v37 = vcombine.high %v19_v36, %v19_v36  ;;  %v20_v38 = vld [vmem:[%s728_s0 + $0x28] sm:$0xff]  ;;  %v439_v40 = vcombine.low %v19_v36, %v19_v36 }
   0xb   :  { %v568_v26 = vld [vmem:[%s727_s1 + $0x30] sm:$0xff]   ;;  %v572_v30 = vld [vmem:[%s727_s1 + $0x38] sm:$0xff]   ;;  %v442_v39 = vcombine.high %v20_v38, %v20_v38  ;;  %v441_v41 = vcombine.low %v20_v38, %v20_v38  ;;  %v434_v44 = vld [vmem:[%s729_s2] ss:$0 sm:$0xff] }
   0xc   :  { %491 = vmatpush3.bf16.msra.mxu0 %v552_v10  ;;  %v569_v27 = vld [vmem:[%s727_s1 + $0xb0] sm:$0xff]   ;;  %v573_v31 = vld [vmem:[%s727_s1 + $0xb8] sm:$0xff]  }
   0xd   :  { %519 = vmatpush3.bf16.msra.mxu1 %v553_v11  ;;  %492 = vmatprep.subr.bf16.mxu0 %v554_v12  ;;  %v574_v32 = vld [vmem:[%s728_s0] ss:$16 sps:$4 sm:$0xff]   ;;  %v576_v33 = vld [vmem:[%s728_s0 + $0x4] ss:$16 sps:$4 sm:$0xff]   ;;  %v577_v34 = vld [vmem:[%s728_s0 + $0x8] ss:$16 sps:$4 sm:$0xff]  }
   0xe   :  { %520 = vmatprep.subr.bf16.mxu1 %v555_v13  ;;  %v579_v35 = vld [vmem:[%s728_s0 + $0xc] ss:$16 sps:$4 sm:$0xff]   ;;  %350 = vmatprep.mubr.bf16.mxu0 %v576_v33 }
   0xf   :  { %398 = vmatprep.mubr.bf16.mxu1 %v579_v35 }
  0x10   :  { %493 = vmatpush3.bf16.msra.mxu0 %v556_v14 }
  0x11   :  { %521 = vmatpush3.bf16.msra.mxu1 %v557_v15  ;;  %494 = vmatprep.subr.bf16.mxu0 %v558_v16 }
  0x12   :  { %522 = vmatprep.subr.bf16.mxu1 %v559_v17 }
  0x14   :  { %495 = vmatpush3.bf16.msra.mxu0 %v560_v18 }
  0x15   :  { %523 = vmatpush3.bf16.msra.mxu1 %v561_v19  ;;  %496 = vmatprep.subr.bf16.mxu0 %v562_v20 }
  0x16   :  { %524 = vmatprep.subr.bf16.mxu1 %v563_v21 }
  0x18   :  { %497 = vmatpush3.bf16.msra.mxu0 %v564_v22 }
  0x19   :  { %525 = vmatpush3.bf16.msra.mxu1 %v565_v23  ;;  %498 = vmatprep.subr.bf16.mxu0 %v566_v24 }
  0x1a   :  { %526 = vmatprep.subr.bf16.mxu1 %v567_v25 }
  0x1c   :  { %499 = vmatpush3.bf16.msra.mxu0 %v568_v26 }
  0x1d   :  { %527 = vmatpush3.bf16.msra.mxu1 %v569_v27  ;;  %500 = vmatprep.subr.bf16.mxu0 %v570_v28 }
  0x1e   :  { %528 = vmatprep.subr.bf16.mxu1 %v571_v29 }
  0x20   :  { %501 = vmatpush3.bf16.msra.mxu0 %v572_v30 }
  0x21   :  { %529 = vmatpush3.bf16.msra.mxu1 %v573_v31 }
  0x23   :  { %351 = vmatmul.mubr.bf16.vlgmr.msra.gmra.mrb[0].mxu0 %v574_v32 }
  0x24   :  { %399 = vmatmul.mubr.bf16.vlgmr.msra.gmra.mrb[0].mxu1 %v577_v34  ;;  %358 = vmatprep.mubr.bf16.mxu0 %v440_v37 }
  0x25   :  { %406 = vmatprep.mubr.bf16.mxu1 %v442_v39 }
  0x2b   :  { %359 = vmatmul.mubr.bf16.gmra.mrb[4].mxu0 %v439_v40 }
  0x2c   :  { %407 = vmatmul.mubr.bf16.gmra.mrb[4].mxu1 %v441_v41 }
  0xf6   :  { %v502_v42 = vpop.f32.mrb[0].mxu0 }
  0xf7   :  { %v530_v43 = vpop.f32.mrb[0].mxu1  ;;  %v503_v45 = vpop.f32.mrb[1].mxu0 }
  0xf8   :  { %v504_v46 = vadd.f32 %v503_v45, %v502_v42  ;;  %v531_v47 = vpop.f32.mrb[1].mxu1  ;;  %v505_v48 = vpop.f32.mrb[2].mxu0 }
  0xf9   :  { %v532_v49 = vadd.f32 %v531_v47, %v530_v43  ;;  %v533_v50 = vpop.f32.mrb[2].mxu1  ;;  %v506_v51 = vpop.f32.mrb[3].mxu0 }
  0xfa   :  { %v353_v52 = vadd.f32 %v504_v46, %v434_v44  ;;  %v507_v53 = vadd.f32 %v506_v51, %v505_v48  ;;  %v534_v54 = vpop.f32.mrb[3].mxu1 }
  0xfb   :  { %v535_v55 = vadd.f32 %v534_v54, %v533_v50 }
  0xfc   :  { %v401_v56 = vadd.f32 %v532_v49, %v353_v52  ;;  %v356_v57 = vadd.f32 %v507_v53, %v434_v44 }
  0xfe   :  { %v404_v58 = vadd.f32 %v535_v55, %v356_v57  ;;  %v508_v59 = vpop.f32.mrb[4].mxu0 }
  0xff   :  { %v536_v60 = vpop.f32.mrb[4].mxu1  ;;  %v509_v61 = vpop.f32.mrb[5].mxu0 }
 0x100   :  { %v484_v62 = vpack.c.bf16 %v404_v58, %v401_v56  ;;  %v510_v63 = vadd.f32 %v509_v61, %v508_v59  ;;  %v537_v0 = vpop.f32.mrb[5].mxu1  ;;  %v511_v1 = vpop.f32.mrb[6].mxu0 }
 0x101   :  { %v538_v2 = vadd.f32 %v537_v0, %v536_v60  ;;  %v539_v3 = vpop.f32.mrb[6].mxu1  ;;  %v512_v4 = vpop.f32.mrb[7].mxu0 }
 0x102   :  { %v361_v5 = vadd.f32 %v510_v63, %v434_v44  ;;  %485 = vst [vmem:[%s730_s3] sm:$0xff] %v484_v62   ;;  %v540_v6 = vpop.f32.mrb[7].mxu1 }
 0x104   :  { %v409_v7 = vadd.f32 %v538_v2, %v361_v5 }
 0x106   :  { %v480_v8 = vpack.c.bf16 %v409_v7, %v409_v7 }
 0x108   :  { %429 = vst [vmem:[%s730_s3 + $0x8] sm:$0xf] %v480_v8 }

// kernel: timesformer_forward.37
= control target key start
LH: loop header
LB: loop body
LE: loop exit
PB: predicated region body
PF: predicated region fallthrough
CT: control target
= control target key end

     0   :  { %v575_v1 = vmov 0   ;;  %v52_v35 = vlaneseq  ;;  %s735_s1 = inlined_call_operand.vmem [shape: bf16[128,512], index: 1, kind: input, shape index: {}]   ;;  %s736_s0 = inlined_call_operand.vmem [shape: bf16[24,128], index: 0, kind: input, shape index: {}]   ;;  %s737_s2 = inlined_call_operand.vmem [shape: f32[1,512], index: 2, kind: input, shape index: {}]   ;;  %s738_s3 = inlined_call_operand.vmem [shape: bf16[24,512], index: 3, kind: output, shape index: {}]  }
   0x1   :  { %v501_v0 = vld [vmem:[%s735_s1 + $0x4] ss:$16 sps:$4 sm:$0xff]   ;;  %274 = vmatprep.mubr.bf16.mxu0 %v575_v1  ;;  %325 = vmatprep.mubr.bf16.mxu1 %v575_v1  ;;  %v503_v2 = vld [vmem:[%s735_s1 + $0xc] ss:$16 sps:$4 sm:$0xff]   ;;  %v505_v3 = vld [vmem:[%s735_s1] ss:$16 sps:$4 sm:$0xff]  }
   0x2   :  { %242 = vmatprep.subr.bf16.mxu0 %v501_v0  ;;  %v506_v4 = vld [vmem:[%s735_s1 + $0x8] ss:$16 sps:$4 sm:$0xff]   ;;  %293 = vmatprep.subr.bf16.mxu1 %v503_v2  ;;  %v507_v5 = vld [vmem:[%s735_s1 + $0x24] ss:$16 sps:$4 sm:$0xff]   ;;  %v509_v6 = vld [vmem:[%s735_s1 + $0x2c] ss:$16 sps:$4 sm:$0xff]  }
   0x3   :  { %243 = vmatpush1.bf16.msra.mxu0 %v505_v3  ;;  %294 = vmatpush1.bf16.msra.mxu1 %v506_v4  ;;  %v511_v7 = vld [vmem:[%s735_s1 + $0x20] ss:$16 sps:$4 sm:$0xff]   ;;  %v512_v8 = vld [vmem:[%s735_s1 + $0x28] ss:$16 sps:$4 sm:$0xff]   ;;  %v513_v9 = vld [vmem:[%s735_s1 + $0x44] ss:$16 sps:$4 sm:$0xff]  }
   0x4   :  { %244 = vmatprep.subr.bf16.mxu0 %v507_v5  ;;  %295 = vmatprep.subr.bf16.mxu1 %v509_v6  ;;  %v515_v10 = vld [vmem:[%s735_s1 + $0x4c] ss:$16 sps:$4 sm:$0xff]   ;;  %v517_v11 = vld [vmem:[%s735_s1 + $0x40] ss:$16 sps:$4 sm:$0xff]   ;;  %v518_v12 = vld [vmem:[%s735_s1 + $0x48] ss:$16 sps:$4 sm:$0xff]  }
   0x5   :  { %v519_v13 = vld [vmem:[%s735_s1 + $0x64] ss:$16 sps:$4 sm:$0xff]   ;;  %v521_v14 = vld [vmem:[%s735_s1 + $0x6c] ss:$16 sps:$4 sm:$0xff]   ;;  %v523_v15 = vld [vmem:[%s735_s1 + $0x60] ss:$16 sps:$4 sm:$0xff]  }
   0x6   :  { %v524_v16 = vld [vmem:[%s735_s1 + $0x68] ss:$16 sps:$4 sm:$0xff]   ;;  %v525_v17 = vld [vmem:[%s735_s1 + $0x84] ss:$16 sps:$4 sm:$0xff]   ;;  %v527_v18 = vld [vmem:[%s735_s1 + $0x8c] ss:$16 sps:$4 sm:$0xff]  }
   0x7   :  { %245 = vmatpush1.bf16.msra.mxu0 %v511_v7  ;;  %296 = vmatpush1.bf16.msra.mxu1 %v512_v8  ;;  %v529_v19 = vld [vmem:[%s735_s1 + $0x80] ss:$16 sps:$4 sm:$0xff]   ;;  %v530_v20 = vld [vmem:[%s735_s1 + $0x88] ss:$16 sps:$4 sm:$0xff]   ;;  %v531_v21 = vld [vmem:[%s735_s1 + $0xa4] ss:$16 sps:$4 sm:$0xff]  }
   0x8   :  { %246 = vmatprep.subr.bf16.mxu0 %v513_v9  ;;  %297 = vmatprep.subr.bf16.mxu1 %v515_v10  ;;  %v533_v22 = vld [vmem:[%s735_s1 + $0xac] ss:$16 sps:$4 sm:$0xff]   ;;  %v535_v23 = vld [vmem:[%s735_s1 + $0xa0] ss:$16 sps:$4 sm:$0xff]   ;;  %v536_v24 = vld [vmem:[%s735_s1 + $0xa8] ss:$16 sps:$4 sm:$0xff]  }
   0x9   :  { %v537_v25 = vld [vmem:[%s735_s1 + $0xc4] ss:$16 sps:$4 sm:$0xff]   ;;  %v539_v26 = vld [vmem:[%s735_s1 + $0xcc] ss:$16 sps:$4 sm:$0xff]   ;;  %v541_v27 = vld [vmem:[%s735_s1 + $0xc0] ss:$16 sps:$4 sm:$0xff]  }
   0xa   :  { %v542_v28 = vld [vmem:[%s735_s1 + $0xc8] ss:$16 sps:$4 sm:$0xff]   ;;  %v543_v29 = vld [vmem:[%s735_s1 + $0xe4] ss:$16 sps:$4 sm:$0xff]   ;;  %v545_v30 = vld [vmem:[%s735_s1 + $0xec] ss:$16 sps:$4 sm:$0xff]  }
   0xb   :  { %247 = vmatpush1.bf16.msra.mxu0 %v517_v11  ;;  %298 = vmatpush1.bf16.msra.mxu1 %v518_v12  ;;  %v547_v31 = vld [vmem:[%s735_s1 + $0xe0] ss:$16 sps:$4 sm:$0xff]   ;;  %v548_v32 = vld [vmem:[%s735_s1 + $0xe8] ss:$16 sps:$4 sm:$0xff]   ;;  %v53_v36 = vshrl.u32 %v52_v35, 7 }
   0xc   :  { %248 = vmatprep.subr.bf16.mxu0 %v519_v13  ;;  %299 = vmatprep.subr.bf16.mxu1 %v521_v14  ;;  %v549_v33 = vld [vmem:[%s736_s0] sm:$0xff]   ;;  %v550_v34 = vld [vmem:[%s736_s0 + $0x8] ss:$0 sps:$4 sm:$0xff]  }
   0xd   :  { %v54_v37 = vsub.s32 0, %v53_v36  ;;  %v62_v38 = vsub.s32 2, %v53_v36  ;;  %v50_v39 = vld [vmem:[%s737_s2] sm:$0xf]  ;;  %v58_v40 = vsub.s32 1, %v53_v36  ;;  %v66_v41 = vsub.s32 3, %v53_v36 }
   0xf   :  { %249 = vmatpush1.bf16.msra.mxu0 %v523_v15  ;;  %300 = vmatpush1.bf16.msra.mxu1 %v524_v16  ;;  %v55_v42 = vrot.slane %v50_v39, %v54_v37  ;;  %v63_v43 = vrot.slane %v50_v39, %v62_v38  ;;  %v59_v44 = vrot.slane %v50_v39, %v58_v40 }
  0x10   :  { %250 = vmatprep.subr.bf16.mxu0 %v525_v17  ;;  %301 = vmatprep.subr.bf16.mxu1 %v527_v18  ;;  %v67_v45 = vrot.slane %v50_v39, %v66_v41 }
  0x13   :  { %251 = vmatpush1.bf16.msra.mxu0 %v529_v19  ;;  %302 = vmatpush1.bf16.msra.mxu1 %v530_v20 }
  0x14   :  { %252 = vmatprep.subr.bf16.mxu0 %v531_v21  ;;  %303 = vmatprep.subr.bf16.mxu1 %v533_v22 }
  0x17   :  { %253 = vmatpush1.bf16.msra.mxu0 %v535_v23  ;;  %304 = vmatpush1.bf16.msra.mxu1 %v536_v24 }
  0x18   :  { %254 = vmatprep.subr.bf16.mxu0 %v537_v25  ;;  %305 = vmatprep.subr.bf16.mxu1 %v539_v26 }
  0x1b   :  { %255 = vmatpush1.bf16.msra.mxu0 %v541_v27  ;;  %306 = vmatpush1.bf16.msra.mxu1 %v542_v28 }
  0x1c   :  { %256 = vmatprep.subr.bf16.mxu0 %v543_v29  ;;  %307 = vmatprep.subr.bf16.mxu1 %v545_v30 }
  0x1f   :  { %257 = vmatpush1.bf16.msra.mxu0 %v547_v31  ;;  %308 = vmatpush1.bf16.msra.mxu1 %v548_v32 }
  0x22   :  { %275 = vmatmul.mubr.bf16.vlgmr.msra.gmra.mrb[0].mxu0 %v549_v33  ;;  %326 = vmatmul.mubr.bf16.vlgmr.msra.gmra.mrb[0].mxu1 %v549_v33 }
  0x23   :  { %284 = vmatprep.mubr.bf16.mxu0 %v575_v1  ;;  %335 = vmatprep.mubr.bf16.mxu1 %v575_v1 }
  0x2a   :  { %285 = vmatmul.mubr.bf16.gmra.mrb[4].mxu0 %v550_v34  ;;  %336 = vmatmul.mubr.bf16.gmra.mrb[4].mxu1 %v550_v34 }
  0xf5   :  { %v276_v46 = vpop.f32.mrb[0].mxu0  ;;  %v327_v47 = vpop.f32.mrb[0].mxu1 }
  0xf6   :  { %v277_v48 = vadd.f32 %v276_v46, %v55_v42  ;;  %v328_v49 = vadd.f32 %v327_v47, %v63_v43  ;;  %v278_v50 = vpop.f32.mrb[1].mxu0  ;;  %v329_v51 = vpop.f32.mrb[1].mxu1 }
  0xf7   :  { %v279_v52 = vadd.f32 %v278_v50, %v59_v44  ;;  %v330_v53 = vadd.f32 %v329_v51, %v67_v45  ;;  %v280_v54 = vpop.f32.mrb[2].mxu0  ;;  %v331_v55 = vpop.f32.mrb[2].mxu1 }
  0xf8   :  { %v356_v56 = vmul.f32 0.70710677, %v277_v48  ;;  %v358_v57 = vmul.f32 0.70710677, %v328_v49  ;;  %v281_v60 = vadd.f32 %v280_v54, %v55_v42  ;;  %v332_v61 = vadd.f32 %v331_v55, %v63_v43  ;;  %v282_v62 = vpop.f32.mrb[3].mxu0  ;;  %v333_v63 = vpop.f32.mrb[3].mxu1 }
  0xf9   :  { %v357_v58 = vmul.f32 0.70710677, %v279_v52  ;;  %v359_v59 = vmul.f32 0.70710677, %v330_v53  ;;  %v283_v0 = vadd.f32 %v282_v62, %v59_v44  ;;  %v705_v1 = vadd.f32 %v333_v63, %v67_v45 }
  0xfa   :  { %551 = verf.f32 %v356_v56  ;;  %v360_v2 = vmul.f32 0.70710677, %v281_v60  ;;  %v362_v3 = vmul.f32 0.70710677, %v332_v61  ;;  %v344_v24 = vmul.f32 0.5, %v277_v48 }
  0xfb   :  { %553 = verf.f32 %v358_v57  ;;  %v361_v4 = vmul.f32 0.70710677, %v283_v0  ;;  %v363_v6 = vmul.f32 0.70710677, %v705_v1  ;;  %v346_v27 = vmul.f32 0.5, %v328_v49 }
  0xfc   :  { %555 = verf.f32 %v357_v58  ;;  %v345_v31 = vmul.f32 0.5, %v279_v52  ;;  %v347_v35 = vmul.f32 0.5, %v330_v53  ;;  %v348_v39 = vmul.f32 0.5, %v281_v60 }
  0xfd   :  { %557 = verf.f32 %v359_v59  ;;  %v286_v5 = vpop.f32.mrb[4].mxu0  ;;  %v337_v8 = vpop.f32.mrb[4].mxu1  ;;  %v349_v48 = vmul.f32 0.5, %v283_v0  ;;  %v351_v54 = vmul.f32 0.5, %v705_v1 }
  0xfe   :  { %559 = verf.f32 %v360_v2  ;;  %v287_v7 = vadd.f32 %v286_v5, %v55_v42  ;;  %v288_v9 = vpop.f32.mrb[5].mxu0  ;;  %v338_v10 = vadd.f32 %v337_v8, %v63_v43  ;;  %v339_v12 = vpop.f32.mrb[5].mxu1  ;;  %v350_v43 = vmul.f32 0.5, %v332_v61 }
  0xff   :  { %561 = verf.f32 %v362_v3  ;;  %v708_v11 = vadd.f32 %v288_v9, %v59_v44  ;;  %v290_v13 = vpop.f32.mrb[6].mxu0  ;;  %v710_v15 = vadd.f32 %v339_v12, %v67_v45  ;;  %v341_v16 = vpop.f32.mrb[6].mxu1 }
 0x100   :  { %563 = verf.f32 %v361_v4  ;;  %v364_v14 = vmul.f32 0.70710677, %v287_v7  ;;  %v291_v17 = vpop.f32.mrb[7].mxu0  ;;  %v366_v18 = vmul.f32 0.70710677, %v338_v10  ;;  %v342_v19 = vpop.f32.mrb[7].mxu1 }
 0x101   :  { %565 = verf.f32 %v363_v6  ;;  %v365_v20 = vmul.f32 0.70710677, %v708_v11  ;;  %v367_v21 = vmul.f32 0.70710677, %v710_v15  ;;  %v352_v57 = vmul.f32 0.5, %v287_v7 }
 0x102   :  { %567 = verf.f32 %v364_v14  ;;  %v354_v61 = vmul.f32 0.5, %v338_v10  ;;  %v353_v2 = vmul.f32 0.5, %v708_v11  ;;  %v355_v6 = vmul.f32 0.5, %v710_v15 }
 0x103   :  { %569 = verf.f32 %v366_v18 }
 0x104   :  { %v552_v22 = vpop.eup %551  ;;  %571 = verf.f32 %v365_v20 }
 0x105   :  { %v554_v23 = vpop.eup %553  ;;  %v380_v25 = vadd.f32 1.0, %v552_v22  ;;  %573 = verf.f32 %v367_v21 }
 0x106   :  { %v556_v26 = vpop.eup %555  ;;  %v382_v28 = vadd.f32 1.0, %v554_v23 }
 0x107   :  { %v558_v29 = vpop.eup %557  ;;  %v392_v30 = vmul.f32 %v380_v25, %v344_v24  ;;  %v381_v32 = vadd.f32 1.0, %v556_v26 }
 0x108   :  { %v560_v33 = vpop.eup %559  ;;  %v394_v34 = vmul.f32 %v382_v28, %v346_v27  ;;  %v383_v36 = vadd.f32 1.0, %v558_v29 }
 0x109   :  { %v562_v37 = vpop.eup %561  ;;  %v393_v38 = vmul.f32 %v381_v32, %v345_v31  ;;  %v384_v40 = vadd.f32 1.0, %v560_v33 }
 0x10a   :  { %v564_v41 = vpop.eup %563  ;;  %v395_v42 = vmul.f32 %v383_v36, %v347_v35  ;;  %v386_v44 = vadd.f32 1.0, %v562_v37 }
 0x10b   :  { %v566_v45 = vpop.eup %565  ;;  %v494_v46 = vpack.c.bf16 %v393_v38, %v392_v30  ;;  %v396_v47 = vmul.f32 %v384_v40, %v348_v39  ;;  %v385_v49 = vadd.f32 1.0, %v564_v41 }
 0x10c   :  { %v568_v50 = vpop.eup %567  ;;  %v495_v51 = vpack.c.bf16 %v395_v42, %v394_v34  ;;  %v398_v52 = vmul.f32 %v386_v44, %v350_v43  ;;  %v387_v53 = vadd.f32 1.0, %v566_v45 }
 0x10d   :  { %v570_v55 = vpop.eup %569  ;;  %444 = vst [vmem:[%s738_s3] sm:$0xff] %v494_v46  ;;  %v397_v56 = vmul.f32 %v385_v49, %v349_v48  ;;  %v388_v58 = vadd.f32 1.0, %v568_v50 }
 0x10e   :  { %v572_v59 = vpop.eup %571  ;;  %445 = vst [vmem:[%s738_s3 + $0x8] sm:$0xff] %v495_v51  ;;  %v399_v60 = vmul.f32 %v387_v53, %v351_v54  ;;  %v390_v62 = vadd.f32 1.0, %v570_v55 }
 0x10f   :  { %v574_v63 = vpop.eup %573  ;;  %v496_v0 = vpack.c.bf16 %v397_v56, %v396_v47  ;;  %v400_v1 = vmul.f32 %v388_v58, %v352_v57  ;;  %v389_v3 = vadd.f32 1.0, %v572_v59 }
 0x110   :  { %v497_v4 = vpack.c.bf16 %v399_v60, %v398_v52  ;;  %v402_v5 = vmul.f32 %v390_v62, %v354_v61  ;;  %v391_v7 = vadd.f32 1.0, %v574_v63 }
 0x111   :  { %446 = vst [vmem:[%s738_s3 + $0x10] sm:$0xff] %v496_v0  ;;  %v401_v8 = vmul.f32 %v389_v3, %v353_v2 }
 0x112   :  { %447 = vst [vmem:[%s738_s3 + $0x18] sm:$0xff] %v497_v4  ;;  %v403_v9 = vmul.f32 %v391_v7, %v355_v6 }
 0x113   :  { %v498_v10 = vpack.c.bf16 %v401_v8, %v400_v1 }
 0x114   :  { %v499_v12 = vpack.c.bf16 %v403_v9, %v402_v5 }
 0x115   :  { %448 = vst [vmem:[%s738_s3 + $0x20] sm:$0xff] %v498_v10 }
 0x116   :  { %449 = vst [vmem:[%s738_s3 + $0x28] sm:$0xff] %v499_v12 }

</bundles_post_ra>
